<compile_context>
chip_gen: v6e
topology: v6e:2x2x1
jax: 0.10.0
libtpu: 0.0.40
codegen_flags: <defaults>
</compile_context>

<pallas_src>
import functools

import jax
import jax.numpy as jnp
from jax.experimental import pallas as pl
from jax.experimental.pallas import tpu as pltpu

EPS = 1e-5


def _round_up(x, m):
    return (x + m - 1) // m * m


def _vmem_limit_bytes():
    """Generation-aware scoped-VMEM budget (v5e/v6e: 96 MiB, v7x: 48 MiB)."""
    try:
        cap = int(pltpu.get_tpu_info().vmem_capacity_bytes)
        return max(32 * 1024 * 1024, min(96 * 1024 * 1024, (cap * 3) // 4))
    except Exception:
        return 64 * 1024 * 1024


_VMEM_LIMIT = _vmem_limit_bytes()


# ----------------------------- Pallas kernels -------------------------------
def conv_stats_kernel(x_ref, w_ref, conv_ref, stats_ref, acc_ref, *, H, W):
    """One (image, Cin-tile) step: 9 shifted MXU matmuls over the NHWC halo
    tile with f32 accumulation; on the last Cin tile store the conv activation
    and per-image BN partials (mean, sum of squared deviations)."""
    k = pl.program_id(1)
    HW = H * W
    tcin = x_ref.shape[-1]

    @pl.when(k == 0)
    def _():
        acc_ref[...] = jnp.zeros_like(acc_ref)

    acc = acc_ref[...]
    for dy in range(3):                       # static 9-tap unroll
        for dx in range(3):
            patch = x_ref[dy:dy + H, dx:dx + W, :].reshape(HW, tcin)
            acc = acc + jnp.dot(patch, w_ref[dy, dx],
                                preferred_element_type=jnp.float32)
    acc_ref[...] = acc

    @pl.when(k == pl.num_programs(1) - 1)
    def _():
        a = acc_ref[...]
        conv_ref[...] = a.astype(conv_ref.dtype)               # bf16 store
        mu = jnp.sum(a, axis=0, keepdims=True) * (1.0 / HW)    # (1, Cp)
        d = a - mu
        ssd = jnp.sum(d * d, axis=0, keepdims=True)            # (1, Cp)
        stats_ref[...] = jnp.concatenate([mu, ssd], axis=0)    # (2, Cp)


def bn_relu_kernel(conv_ref, scale_ref, shift_ref, o_ref):
    """Folded BN affine (f32 VPU math) + ReLU, lane-dense store."""
    x = conv_ref[...].astype(jnp.float32)
    o_ref[...] = jnp.maximum(x * scale_ref[...] + shift_ref[...],
                             0.0).astype(o_ref.dtype)


# ---------------------------- pallas_call wrappers ---------------------------
def conv_and_stats(x_pad, w_k, *, H, W, tcin, store_dtype):
    N, Hp2, Wp2, Cin_p = x_pad.shape
    Cp = w_k.shape[3]
    nk = Cin_p // tcin
    HW = H * W
    kernel = functools.partial(conv_stats_kernel, H=H, W=W)
    return pl.pallas_call(
        kernel,
        out_shape=(
            jax.ShapeDtypeStruct((N, HW, Cp), store_dtype),
            jax.ShapeDtypeStruct((N, 2, Cp), jnp.float32),
        ),
        grid=(N, nk),
        in_specs=[
            pl.BlockSpec((None, Hp2, Wp2, tcin), lambda n, k: (n, 0, 0, k)),
            pl.BlockSpec((3, 3, tcin, Cp), lambda n, k: (0, 0, k, 0)),
        ],
        out_specs=(
            pl.BlockSpec((None, HW, Cp), lambda n, k: (n, 0, 0)),
            pl.BlockSpec((None, 2, Cp), lambda n, k: (n, 0, 0)),
        ),
        scratch_shapes=[pltpu.VMEM((HW, Cp), jnp.float32)],
        compiler_params=pltpu.CompilerParams(
            dimension_semantics=("parallel", "arbitrary"),
            vmem_limit_bytes=_VMEM_LIMIT),
    )(x_pad, w_k)


def bn_relu_apply(conv2d, scale, shift, *, out_dtype, tile_rows=1024):
    M2, Cp = conv2d.shape
    tm = min(tile_rows, _round_up(M2, 8))        # big elementwise tiles
    return pl.pallas_call(
        bn_relu_kernel,
        out_shape=jax.ShapeDtypeStruct((M2, Cp), out_dtype),
        grid=(pl.cdiv(M2, tm),),
        in_specs=[
            pl.BlockSpec((tm, Cp), lambda i: (i, 0)),
            pl.BlockSpec((1, Cp), lambda i: (0, 0)),
            pl.BlockSpec((1, Cp), lambda i: (0, 0)),
        ],
        out_specs=pl.BlockSpec((tm, Cp), lambda i: (i, 0)),
        compiler_params=pltpu.CompilerParams(
            dimension_semantics=("parallel",),
            vmem_limit_bytes=_VMEM_LIMIT),
    )(conv2d, scale, shift)


# ------------------------------- ConvBlock -----------------------------------
def conv_block_forward(x_nhwc, params, *, mxu_dtype):
    """One ConvBlock in NHWC on channel-padded input.

    `x_nhwc` may carry more channels than the conv weight's Cin; the extra
    channels must be zero (the weight's Cin dim is zero-padded to match), so
    block 2 can consume block 1's lane-padded output without a slice/copy.
    Returns ((N, H, W, Cp) activation with padded channels exactly 0, Cout).
    """
    N, H, W, Cin_x = x_nhwc.shape
    w, gamma, beta = params["w"], params["gamma"], params["beta"]
    Cout, Cin_w = int(w.shape[0]), int(w.shape[1])
    assert Cin_x >= Cin_w, "input must carry at least the conv's input channels"

    # Contraction (Cin) padding: 16 for bf16 sublane packing, 8 for f32.
    cmult = 16 if mxu_dtype == jnp.bfloat16 else 8
    Cin_p = _round_up(Cin_x, cmult)
    # Cin (contraction) grid-tiling for large channel counts (v7x 64 MiB/TC).
    if Cin_p > 512:
        Cin_p = _round_up(Cin_p, 256)
        tcin = 256
    else:
        tcin = Cin_p
    Cp = _round_up(Cout, 128)                    # lane-dense output channels

    # Halo (+1 spatial) + channel pad, done directly in the MXU dtype so no
    # padded f32 copy is ever materialized on the bf16 path.
    x_pad = jnp.pad(x_nhwc.astype(mxu_dtype),
                    ((0, 0), (1, 1), (1, 1), (0, Cin_p - Cin_x)))

    # Weight: (Cout,Cin,3,3) -> (3,3,Cin,Cout), zero-pad Cin->Cin_p, Cout->Cp.
    w_k = jnp.transpose(w, (2, 3, 1, 0))
    w_k = jnp.pad(w_k, ((0, 0), (0, 0), (0, Cin_p - Cin_w), (0, Cp - Cout)))
    w_k = w_k.astype(mxu_dtype)

    # NOTE: the conv bias is intentionally NOT added -- a per-channel constant
    # cancels exactly in training-mode BatchNorm, so it never reaches the
    # output.  TODO(synk): if this module is ever run with eval-mode BN
    # (running stats), the bias no longer cancels and must be added in pass 1.

    # Pass 1: fused 9-tap MXU conv + per-image BN partials.
    conv, stats = conv_and_stats(x_pad, w_k, H=H, W=W, tcin=tcin,
                                 store_dtype=mxu_dtype)

    # Tiny per-channel BN math in f32.  Per-image (mean, ssd) partials are
    # combined with Chan's formula -> no E[x^2] - mean^2 cancellation.
    HW = H * W
    M = N * HW
    mu_n = stats[:, 0, :]                                    # (N, Cp)
    ssd_n = stats[:, 1, :]                                   # (N, Cp)
    mean = jnp.mean(mu_n, axis=0)                            # equal count/image
    var = (jnp.sum(ssd_n, axis=0)
           + HW * jnp.sum((mu_n - mean[None, :]) ** 2, axis=0)) / M
    inv = jax.lax.rsqrt(var + EPS)
    g_p = jnp.pad(gamma.astype(jnp.float32), (0, Cp - Cout))
    b_p = jnp.pad(beta.astype(jnp.float32), (0, Cp - Cout))
    scale = (inv * g_p).reshape(1, Cp)
    shift = (b_p - mean * inv * g_p).reshape(1, Cp)

    # Pass 2: folded affine + ReLU; output stays in the MXU dtype and padded
    # channels stay exactly 0 (gamma_pad = 0 -> scale = shift = 0).
    out = bn_relu_apply(conv.reshape(M, Cp), scale, shift, out_dtype=mxu_dtype)
    return out.reshape(N, H, W, Cp), Cout


@functools.partial(jax.jit, static_argnames=("mxu_dtype",))
def bridge_forward(x_nchw, params1, params2, *, mxu_dtype=jnp.bfloat16):
    """Bridge.forward: NCHW f32 in, NCHW f32 out."""
    x = jnp.transpose(x_nchw, (0, 2, 3, 1)).astype(mxu_dtype)   # NHWC, MXU dtype
    y1, _ = conv_block_forward(x, params1, mxu_dtype=mxu_dtype)
    y2, cout2 = conv_block_forward(y1, params2, mxu_dtype=mxu_dtype)
    out = y2[..., :cout2].astype(jnp.float32)                   # drop lane pad
    return jnp.transpose(out, (0, 3, 1, 2))                     # NHWC -> NCHW


# ---------------------------- parameter setup -------------------------------
def init_convblock_params(key, cin, cout):
    k1, k2 = jax.random.split(key)
    fan_in = cin * 9
    bound = 1.0 / jnp.sqrt(fan_in)
    return {
        "w": jax.random.uniform(k1, (cout, cin, 3, 3), jnp.float32, -bound, bound),
        "b": jax.random.uniform(k2, (cout,), jnp.float32, -bound, bound),
        "gamma": jnp.ones((cout,), jnp.float32),
        "beta": jnp.zeros((cout,), jnp.float32),
    }


# --------------------------- pure-JAX reference -----------------------------
def ref_convblock(x_nchw, p):
    y = jax.lax.conv_general_dilated(
        x_nchw, p["w"], (1, 1), ((1, 1), (1, 1)),
        dimension_numbers=("NCHW", "OIHW", "NCHW"))
    y = y + p["b"][None, :, None, None]
    mean = jnp.mean(y, axis=(0, 2, 3), keepdims=True)
    var = jnp.mean((y - mean) ** 2, axis=(0, 2, 3), keepdims=True)
    y = (y - mean) * jax.lax.rsqrt(var + EPS)
    y = y * p["gamma"][None, :, None, None] + p["beta"][None, :, None, None]
    return jnp.maximum(y, 0.0)


def ref_bridge(x_nchw, p1, p2):
    return ref_convblock(ref_convblock(x_nchw, p1), p2)


# --------------------------------- main -------------------------------------
if __name__ == "__main__":
    key = jax.random.PRNGKey(0)
    kx, k1, k2 = jax.random.split(key, 3)

    N, Cin, Cout, H, W = 2, 4, 8, 16, 16
    x = jax.random.normal(kx, (N, Cin, H, W), jnp.float32)   # NCHW, like PyTorch

    params1 = init_convblock_params(k1, Cin, Cout)
    params2 = init_convblock_params(k2, Cout, Cout)

    ref = jax.block_until_ready(ref_bridge(x, params1, params2))

    # f32 MXU path: tight numerical check against the pure-JAX reference.
    out_f32 = jax.block_until_ready(
        bridge_forward(x, params1, params2, mxu_dtype=jnp.float32))
    assert out_f32.shape == (N, Cout, H, W)
    err32 = float(jnp.max(jnp.abs(out_f32 - ref)))
    assert err32 < 1e-3, f"f32 path mismatch vs reference: {err32}"

    # bf16 MXU path (default): bf16 operands AND bf16 intermediates across two
    # stacked conv + train-mode-BN blocks -> loose sanity tolerance only.
    out_bf16 = jax.block_until_ready(bridge_forward(x, params1, params2))
    assert out_bf16.shape == (N, Cout, H, W)
    err16 = float(jnp.max(jnp.abs(out_bf16 - ref)))
    assert err16 < 2.5e-1, f"bf16 path diverged: {err16}"

    print("KERNEL_OK")
</pallas_src>

<mosaic_0001>
module attributes {stable_mosaic.version = 11 : i64} {
  func.func @conv_stats_kernel(%arg0: i32, %arg1: i32, %arg2: memref<1x18x18x8xf32, #tpu.memory_space<vmem>>, %arg3: memref<3x3x8x128xf32, #tpu.memory_space<vmem>>, %arg4: memref<1x256x128xf32, #tpu.memory_space<vmem>>, %arg5: memref<1x2x128xf32, #tpu.memory_space<vmem>>, %arg6: memref<256x128xf32, #tpu.memory_space<vmem>>) attributes {dimension_semantics = [#tpu.dimension_semantics<parallel>, #tpu.dimension_semantics<arbitrary>], iteration_bounds = array<i64: 2, 1>, scalar_prefetch = 0 : i64, scratch_operands = 1 : i64, tpu.core_type = #tpu.core_type<tc>, window_params = [{transform_indices = @transform_0, window_bounds = array<i64: 1, 18, 18, 8>}, {transform_indices = @transform_1, window_bounds = array<i64: 3, 3, 8, 128>}, {transform_indices = @transform_2, window_bounds = array<i64: 1, 256, 128>}, {transform_indices = @transform_3, window_bounds = array<i64: 1, 2, 128>}]} {
    %c0_i32 = arith.constant 0 : i32
    %0 = arith.cmpi eq, %arg1, %c0_i32 : i32
    %1 = arith.extui %0 : i1 to i32
    %c0_i32_0 = arith.constant 0 : i32
    %2 = arith.cmpi ne, %1, %c0_i32_0 : i32
    scf.if %2 {
      %cst_84 = arith.constant 0.000000e+00 : f32
      %71 = vector.broadcast %cst_84 : f32 to vector<256x128xf32>
      %c0_85 = arith.constant 0 : index
      %c0_86 = arith.constant 0 : index
      %72 = vector.load %arg6[%c0_85, %c0_86] : memref<256x128xf32, #tpu.memory_space<vmem>>, vector<256x128xf32>
      tpu.vector_store %arg6[%c0_85, %c0_86], %71 {strides = array<i32>} : memref<256x128xf32, #tpu.memory_space<vmem>>, vector<256x128xf32>,
    } else {
    }
    %c0 = arith.constant 0 : index
    %c0_1 = arith.constant 0 : index
    %3 = vector.load %arg6[%c0, %c0_1] : memref<256x128xf32, #tpu.memory_space<vmem>>, vector<256x128xf32>
    %c0_2 = arith.constant 0 : index
    %c0_3 = arith.constant 0 : index
    %c0_4 = arith.constant 0 : index
    %c0_5 = arith.constant 0 : index
    %4 = vector.load %arg2[%c0_2, %c0_3, %c0_4, %c0_5] : memref<1x18x18x8xf32, #tpu.memory_space<vmem>>, vector<1x16x16x8xf32>
    %5 = vector.shape_cast %4 : vector<1x16x16x8xf32> to vector<16x16x8xf32>
    %6 = vector.shape_cast %5 : vector<16x16x8xf32> to vector<256x8xf32>
    %c0_6 = arith.constant 0 : index
    %c0_7 = arith.constant 0 : index
    %c0_8 = arith.constant 0 : index
    %c0_9 = arith.constant 0 : index
    %7 = vector.load %arg3[%c0_6, %c0_7, %c0_8, %c0_9] : memref<3x3x8x128xf32, #tpu.memory_space<vmem>>, vector<1x1x8x128xf32>
    %8 = vector.shape_cast %7 : vector<1x1x8x128xf32> to vector<8x128xf32>
    %cst = arith.constant dense<0.000000e+00> : vector<256x128xf32>
    %9 = tpu.matmul %6, %8, %cst {dimension_numbers = #tpu.dot_dimension_numbers<[1], [0], [0], [1], [0, 0, 1, 1], [], []>} : vector<256x8xf32>, vector<8x128xf32>, vector<256x128xf32> -> vector<256x128xf32>
    %10 = arith.addf %3, %9 : vector<256x128xf32>
    %c0_10 = arith.constant 0 : index
    %c0_11 = arith.constant 0 : index
    %c1 = arith.constant 1 : index
    %c0_12 = arith.constant 0 : index
    %11 = vector.load %arg2[%c0_10, %c0_11, %c1, %c0_12] : memref<1x18x18x8xf32, #tpu.memory_space<vmem>>, vector<1x16x16x8xf32>
    %12 = vector.shape_cast %11 : vector<1x16x16x8xf32> to vector<16x16x8xf32>
    %13 = vector.shape_cast %12 : vector<16x16x8xf32> to vector<256x8xf32>
    %c0_13 = arith.constant 0 : index
    %c1_14 = arith.constant 1 : index
    %c0_15 = arith.constant 0 : index
    %c0_16 = arith.constant 0 : index
    %14 = vector.load %arg3[%c0_13, %c1_14, %c0_15, %c0_16] : memref<3x3x8x128xf32, #tpu.memory_space<vmem>>, vector<1x1x8x128xf32>
    %15 = vector.shape_cast %14 : vector<1x1x8x128xf32> to vector<8x128xf32>
    %cst_17 = arith.constant dense<0.000000e+00> : vector<256x128xf32>
    %16 = tpu.matmul %13, %15, %cst_17 {dimension_numbers = #tpu.dot_dimension_numbers<[1], [0], [0], [1], [0, 0, 1, 1], [], []>} : vector<256x8xf32>, vector<8x128xf32>, vector<256x128xf32> -> vector<256x128xf32>
    %17 = arith.addf %10, %16 : vector<256x128xf32>
    %c0_18 = arith.constant 0 : index
    %c0_19 = arith.constant 0 : index
    %c2 = arith.constant 2 : index
    %c0_20 = arith.constant 0 : index
    %18 = vector.load %arg2[%c0_18, %c0_19, %c2, %c0_20] : memref<1x18x18x8xf32, #tpu.memory_space<vmem>>, vector<1x16x16x8xf32>
    %19 = vector.shape_cast %18 : vector<1x16x16x8xf32> to vector<16x16x8xf32>
    %20 = vector.shape_cast %19 : vector<16x16x8xf32> to vector<256x8xf32>
    %c0_21 = arith.constant 0 : index
    %c2_22 = arith.constant 2 : index
    %c0_23 = arith.constant 0 : index
    %c0_24 = arith.constant 0 : index
    %21 = vector.load %arg3[%c0_21, %c2_22, %c0_23, %c0_24] : memref<3x3x8x128xf32, #tpu.memory_space<vmem>>, vector<1x1x8x128xf32>
    %22 = vector.shape_cast %21 : vector<1x1x8x128xf32> to vector<8x128xf32>
    %cst_25 = arith.constant dense<0.000000e+00> : vector<256x128xf32>
    %23 = tpu.matmul %20, %22, %cst_25 {dimension_numbers = #tpu.dot_dimension_numbers<[1], [0], [0], [1], [0, 0, 1, 1], [], []>} : vector<256x8xf32>, vector<8x128xf32>, vector<256x128xf32> -> vector<256x128xf32>
    %24 = arith.addf %17, %23 : vector<256x128xf32>
    %c0_26 = arith.constant 0 : index
    %c1_27 = arith.constant 1 : index
    %c0_28 = arith.constant 0 : index
    %c0_29 = arith.constant 0 : index
    %25 = vector.load %arg2[%c0_26, %c1_27, %c0_28, %c0_29] : memref<1x18x18x8xf32, #tpu.memory_space<vmem>>, vector<1x16x16x8xf32>
    %26 = vector.shape_cast %25 : vector<1x16x16x8xf32> to vector<16x16x8xf32>
    %27 = vector.shape_cast %26 : vector<16x16x8xf32> to vector<256x8xf32>
    %c1_30 = arith.constant 1 : index
    %c0_31 = arith.constant 0 : index
    %c0_32 = arith.constant 0 : index
    %c0_33 = arith.constant 0 : index
    %28 = vector.load %arg3[%c1_30, %c0_31, %c0_32, %c0_33] : memref<3x3x8x128xf32, #tpu.memory_space<vmem>>, vector<1x1x8x128xf32>
    %29 = vector.shape_cast %28 : vector<1x1x8x128xf32> to vector<8x128xf32>
    %cst_34 = arith.constant dense<0.000000e+00> : vector<256x128xf32>
    %30 = tpu.matmul %27, %29, %cst_34 {dimension_numbers = #tpu.dot_dimension_numbers<[1], [0], [0], [1], [0, 0, 1, 1], [], []>} : vector<256x8xf32>, vector<8x128xf32>, vector<256x128xf32> -> vector<256x128xf32>
    %31 = arith.addf %24, %30 : vector<256x128xf32>
    %c0_35 = arith.constant 0 : index
    %c1_36 = arith.constant 1 : index
    %c1_37 = arith.constant 1 : index
    %c0_38 = arith.constant 0 : index
    %32 = vector.load %arg2[%c0_35, %c1_36, %c1_37, %c0_38] : memref<1x18x18x8xf32, #tpu.memory_space<vmem>>, vector<1x16x16x8xf32>
    %33 = vector.shape_cast %32 : vector<1x16x16x8xf32> to vector<16x16x8xf32>
    %34 = vector.shape_cast %33 : vector<16x16x8xf32> to vector<256x8xf32>
    %c1_39 = arith.constant 1 : index
    %c1_40 = arith.constant 1 : index
    %c0_41 = arith.constant 0 : index
    %c0_42 = arith.constant 0 : index
    %35 = vector.load %arg3[%c1_39, %c1_40, %c0_41, %c0_42] : memref<3x3x8x128xf32, #tpu.memory_space<vmem>>, vector<1x1x8x128xf32>
    %36 = vector.shape_cast %35 : vector<1x1x8x128xf32> to vector<8x128xf32>
    %cst_43 = arith.constant dense<0.000000e+00> : vector<256x128xf32>
    %37 = tpu.matmul %34, %36, %cst_43 {dimension_numbers = #tpu.dot_dimension_numbers<[1], [0], [0], [1], [0, 0, 1, 1], [], []>} : vector<256x8xf32>, vector<8x128xf32>, vector<256x128xf32> -> vector<256x128xf32>
    %38 = arith.addf %31, %37 : vector<256x128xf32>
    %c0_44 = arith.constant 0 : index
    %c1_45 = arith.constant 1 : index
    %c2_46 = arith.constant 2 : index
    %c0_47 = arith.constant 0 : index
    %39 = vector.load %arg2[%c0_44, %c1_45, %c2_46, %c0_47] : memref<1x18x18x8xf32, #tpu.memory_space<vmem>>, vector<1x16x16x8xf32>
    %40 = vector.shape_cast %39 : vector<1x16x16x8xf32> to vector<16x16x8xf32>
    %41 = vector.shape_cast %40 : vector<16x16x8xf32> to vector<256x8xf32>
    %c1_48 = arith.constant 1 : index
    %c2_49 = arith.constant 2 : index
    %c0_50 = arith.constant 0 : index
    %c0_51 = arith.constant 0 : index
    %42 = vector.load %arg3[%c1_48, %c2_49, %c0_50, %c0_51] : memref<3x3x8x128xf32, #tpu.memory_space<vmem>>, vector<1x1x8x128xf32>
    %43 = vector.shape_cast %42 : vector<1x1x8x128xf32> to vector<8x128xf32>
    %cst_52 = arith.constant dense<0.000000e+00> : vector<256x128xf32>
    %44 = tpu.matmul %41, %43, %cst_52 {dimension_numbers = #tpu.dot_dimension_numbers<[1], [0], [0], [1], [0, 0, 1, 1], [], []>} : vector<256x8xf32>, vector<8x128xf32>, vector<256x128xf32> -> vector<256x128xf32>
    %45 = arith.addf %38, %44 : vector<256x128xf32>
    %c0_53 = arith.constant 0 : index
    %c2_54 = arith.constant 2 : index
    %c0_55 = arith.constant 0 : index
    %c0_56 = arith.constant 0 : index
    %46 = vector.load %arg2[%c0_53, %c2_54, %c0_55, %c0_56] : memref<1x18x18x8xf32, #tpu.memory_space<vmem>>, vector<1x16x16x8xf32>
    %47 = vector.shape_cast %46 : vector<1x16x16x8xf32> to vector<16x16x8xf32>
    %48 = vector.shape_cast %47 : vector<16x16x8xf32> to vector<256x8xf32>
    %c2_57 = arith.constant 2 : index
    %c0_58 = arith.constant 0 : index
    %c0_59 = arith.constant 0 : index
    %c0_60 = arith.constant 0 : index
    %49 = vector.load %arg3[%c2_57, %c0_58, %c0_59, %c0_60] : memref<3x3x8x128xf32, #tpu.memory_space<vmem>>, vector<1x1x8x128xf32>
    %50 = vector.shape_cast %49 : vector<1x1x8x128xf32> to vector<8x128xf32>
    %cst_61 = arith.constant dense<0.000000e+00> : vector<256x128xf32>
    %51 = tpu.matmul %48, %50, %cst_61 {dimension_numbers = #tpu.dot_dimension_numbers<[1], [0], [0], [1], [0, 0, 1, 1], [], []>} : vector<256x8xf32>, vector<8x128xf32>, vector<256x128xf32> -> vector<256x128xf32>
    %52 = arith.addf %45, %51 : vector<256x128xf32>
    %c0_62 = arith.constant 0 : index
    %c2_63 = arith.constant 2 : index
    %c1_64 = arith.constant 1 : index
    %c0_65 = arith.constant 0 : index
    %53 = vector.load %arg2[%c0_62, %c2_63, %c1_64, %c0_65] : memref<1x18x18x8xf32, #tpu.memory_space<vmem>>, vector<1x16x16x8xf32>
    %54 = vector.shape_cast %53 : vector<1x16x16x8xf32> to vector<16x16x8xf32>
    %55 = vector.shape_cast %54 : vector<16x16x8xf32> to vector<256x8xf32>
    %c2_66 = arith.constant 2 : index
    %c1_67 = arith.constant 1 : index
    %c0_68 = arith.constant 0 : index
    %c0_69 = arith.constant 0 : index
    %56 = vector.load %arg3[%c2_66, %c1_67, %c0_68, %c0_69] : memref<3x3x8x128xf32, #tpu.memory_space<vmem>>, vector<1x1x8x128xf32>
    %57 = vector.shape_cast %56 : vector<1x1x8x128xf32> to vector<8x128xf32>
    %cst_70 = arith.constant dense<0.000000e+00> : vector<256x128xf32>
    %58 = tpu.matmul %55, %57, %cst_70 {dimension_numbers = #tpu.dot_dimension_numbers<[1], [0], [0], [1], [0, 0, 1, 1], [], []>} : vector<256x8xf32>, vector<8x128xf32>, vector<256x128xf32> -> vector<256x128xf32>
    %59 = arith.addf %52, %58 : vector<256x128xf32>
    %c0_71 = arith.constant 0 : index
    %c2_72 = arith.constant 2 : index
    %c2_73 = arith.constant 2 : index
    %c0_74 = arith.constant 0 : index
    %60 = vector.load %arg2[%c0_71, %c2_72, %c2_73, %c0_74] : memref<1x18x18x8xf32, #tpu.memory_space<vmem>>, vector<1x16x16x8xf32>
    %61 = vector.shape_cast %60 : vector<1x16x16x8xf32> to vector<16x16x8xf32>
    %62 = vector.shape_cast %61 : vector<16x16x8xf32> to vector<256x8xf32>
    %c2_75 = arith.constant 2 : index
    %c2_76 = arith.constant 2 : index
    %c0_77 = arith.constant 0 : index
    %c0_78 = arith.constant 0 : index
    %63 = vector.load %arg3[%c2_75, %c2_76, %c0_77, %c0_78] : memref<3x3x8x128xf32, #tpu.memory_space<vmem>>, vector<1x1x8x128xf32>
    %64 = vector.shape_cast %63 : vector<1x1x8x128xf32> to vector<8x128xf32>
    %cst_79 = arith.constant dense<0.000000e+00> : vector<256x128xf32>
    %65 = tpu.matmul %62, %64, %cst_79 {dimension_numbers = #tpu.dot_dimension_numbers<[1], [0], [0], [1], [0, 0, 1, 1], [], []>} : vector<256x8xf32>, vector<8x128xf32>, vector<256x128xf32> -> vector<256x128xf32>
    %66 = arith.addf %59, %65 : vector<256x128xf32>
    %c0_80 = arith.constant 0 : index
    %c0_81 = arith.constant 0 : index
    %67 = vector.load %arg6[%c0_80, %c0_81] : memref<256x128xf32, #tpu.memory_space<vmem>>, vector<256x128xf32>
    tpu.vector_store %arg6[%c0_80, %c0_81], %66 {strides = array<i32>} : memref<256x128xf32, #tpu.memory_space<vmem>>, vector<256x128xf32>,
    %c0_i32_82 = arith.constant 0 : i32
    %68 = arith.cmpi eq, %arg1, %c0_i32_82 : i32
    %69 = arith.extui %68 : i1 to i32
    %c0_i32_83 = arith.constant 0 : i32
    %70 = arith.cmpi ne, %69, %c0_i32_83 : i32
    scf.if %70 {
      %c0_84 = arith.constant 0 : index
      %c0_85 = arith.constant 0 : index
      %71 = vector.load %arg6[%c0_84, %c0_85] : memref<256x128xf32, #tpu.memory_space<vmem>>, vector<256x128xf32>
      %c0_86 = arith.constant 0 : index
      %c0_87 = arith.constant 0 : index
      %c0_88 = arith.constant 0 : index
      %72 = vector.load %arg4[%c0_86, %c0_87, %c0_88] : memref<1x256x128xf32, #tpu.memory_space<vmem>>, vector<1x256x128xf32>
      %73 = vector.shape_cast %72 : vector<1x256x128xf32> to vector<256x128xf32>
      %74 = vector.shape_cast %71 : vector<256x128xf32> to vector<1x256x128xf32>
      tpu.vector_store %arg4[%c0_86, %c0_87, %c0_88], %74 {strides = array<i32>} : memref<1x256x128xf32, #tpu.memory_space<vmem>>, vector<1x256x128xf32>,
      %cst_89 = arith.constant dense<0.000000e+00> : vector<128xf32>
      %75 = vector.multi_reduction <add>, %71, %cst_89 [0] : vector<256x128xf32> to vector<128xf32>
      %76 = vector.shape_cast %75 : vector<128xf32> to vector<1x128xf32>
      %cst_90 = arith.constant 3.906250e-03 : f32
      %77 = vector.broadcast %cst_90 : f32 to vector<1x128xf32>
      %78 = arith.mulf %76, %77 : vector<1x128xf32>
      %79 = vector.broadcast %78 : vector<1x128xf32> to vector<256x128xf32>
      %80 = arith.subf %71, %79 : vector<256x128xf32>
      %81 = arith.mulf %80, %80 : vector<256x128xf32>
      %cst_91 = arith.constant dense<0.000000e+00> : vector<128xf32>
      %82 = vector.multi_reduction <add>, %81, %cst_91 [0] : vector<256x128xf32> to vector<128xf32>
      %83 = vector.shape_cast %82 : vector<128xf32> to vector<1x128xf32>
      %84 = tpu.concatenate %78, %83 in 0 : vector<1x128xf32>, vector<1x128xf32> -> vector<2x128xf32>
      %c0_92 = arith.constant 0 : index
      %c0_93 = arith.constant 0 : index
      %c0_94 = arith.constant 0 : index
      %85 = vector.load %arg5[%c0_92, %c0_93, %c0_94] : memref<1x2x128xf32, #tpu.memory_space<vmem>>, vector<1x2x128xf32>
      %86 = vector.shape_cast %85 : vector<1x2x128xf32> to vector<2x128xf32>
      %87 = vector.shape_cast %84 : vector<2x128xf32> to vector<1x2x128xf32>
      tpu.vector_store %arg5[%c0_92, %c0_93, %c0_94], %87 {strides = array<i32>} : memref<1x2x128xf32, #tpu.memory_space<vmem>>, vector<1x2x128xf32>,
    } else {
    }
    return
  }
  func.func @transform_0(%arg0: i32, %arg1: i32) -> (i32, i32, i32, i32) {
    %c0_i32 = arith.constant 0 : i32
    %c0_i32_0 = arith.constant 0 : i32
    %c0_i32_1 = arith.constant 0 : i32
    return %arg0, %c0_i32, %c0_i32_0, %arg1 : i32, i32, i32, i32
  }
  func.func @transform_1(%arg0: i32, %arg1: i32) -> (i32, i32, i32, i32) {
    %c0_i32 = arith.constant 0 : i32
    %c0_i32_0 = arith.constant 0 : i32
    %c0_i32_1 = arith.constant 0 : i32
    %c0_i32_2 = arith.constant 0 : i32
    return %c0_i32, %c0_i32_0, %arg1, %c0_i32_1 : i32, i32, i32, i32
  }
  func.func @transform_2(%arg0: i32, %arg1: i32) -> (i32, i32, i32) {
    %c0_i32 = arith.constant 0 : i32
    %c0_i32_0 = arith.constant 0 : i32
    %c0_i32_1 = arith.constant 0 : i32
    return %arg0, %c0_i32, %c0_i32_0 : i32, i32, i32
  }
  func.func @transform_3(%arg0: i32, %arg1: i32) -> (i32, i32, i32) {
    %c0_i32 = arith.constant 0 : i32
    %c0_i32_0 = arith.constant 0 : i32
    %c0_i32_1 = arith.constant 0 : i32
    return %arg0, %c0_i32, %c0_i32_0 : i32, i32, i32
  }
}

module attributes {stable_mosaic.version = 11 : i64} {
  func.func @bn_relu_kernel(%arg0: i32, %arg1: memref<512x128xf32, #tpu.memory_space<vmem>>, %arg2: memref<1x128xf32, #tpu.memory_space<vmem>>, %arg3: memref<1x128xf32, #tpu.memory_space<vmem>>, %arg4: memref<512x128xf32, #tpu.memory_space<vmem>>) attributes {dimension_semantics = [#tpu.dimension_semantics<parallel>], iteration_bounds = array<i64: 1>, scalar_prefetch = 0 : i64, scratch_operands = 0 : i64, tpu.core_type = #tpu.core_type<tc>, window_params = [{transform_indices = @transform_0, window_bounds = array<i64: 512, 128>}, {pipeline_mode = #tpu.pipeline_mode<synchronous>, transform_indices = @transform_1, window_bounds = array<i64: 1, 128>}, {pipeline_mode = #tpu.pipeline_mode<synchronous>, transform_indices = @transform_2, window_bounds = array<i64: 1, 128>}, {transform_indices = @transform_3, window_bounds = array<i64: 512, 128>}]} {
    %c0 = arith.constant 0 : index
    %c0_0 = arith.constant 0 : index
    %0 = vector.load %arg1[%c0, %c0_0] : memref<512x128xf32, #tpu.memory_space<vmem>>, vector<512x128xf32>
    %c0_1 = arith.constant 0 : index
    %c0_2 = arith.constant 0 : index
    %1 = vector.load %arg2[%c0_1, %c0_2] : memref<1x128xf32, #tpu.memory_space<vmem>>, vector<1x128xf32>
    %2 = vector.broadcast %1 : vector<1x128xf32> to vector<512x128xf32>
    %3 = arith.mulf %0, %2 : vector<512x128xf32>
    %c0_3 = arith.constant 0 : index
    %c0_4 = arith.constant 0 : index
    %4 = vector.load %arg3[%c0_3, %c0_4] : memref<1x128xf32, #tpu.memory_space<vmem>>, vector<1x128xf32>
    %5 = vector.broadcast %4 : vector<1x128xf32> to vector<512x128xf32>
    %6 = arith.addf %3, %5 : vector<512x128xf32>
    %cst = arith.constant 0.000000e+00 : f32
    %7 = vector.broadcast %cst : f32 to vector<512x128xf32>
    %8 = arith.maximumf %6, %7 : vector<512x128xf32>
    %c0_5 = arith.constant 0 : index
    %c0_6 = arith.constant 0 : index
    %9 = vector.load %arg4[%c0_5, %c0_6] : memref<512x128xf32, #tpu.memory_space<vmem>>, vector<512x128xf32>
    tpu.vector_store %arg4[%c0_5, %c0_6], %8 {strides = array<i32>} : memref<512x128xf32, #tpu.memory_space<vmem>>, vector<512x128xf32>,
    return
  }
  func.func @transform_0(%arg0: i32) -> (i32, i32) {
    %c0_i32 = arith.constant 0 : i32
    %c0_i32_0 = arith.constant 0 : i32
    return %arg0, %c0_i32 : i32, i32
  }
  func.func @transform_1(%arg0: i32) -> (i32, i32) {
    %c0_i32 = arith.constant 0 : i32
    %c0_i32_0 = arith.constant 0 : i32
    %c0_i32_1 = arith.constant 0 : i32
    return %c0_i32, %c0_i32_0 : i32, i32
  }
  func.func @transform_2(%arg0: i32) -> (i32, i32) {
    %c0_i32 = arith.constant 0 : i32
    %c0_i32_0 = arith.constant 0 : i32
    %c0_i32_1 = arith.constant 0 : i32
    return %c0_i32, %c0_i32_0 : i32, i32
  }
  func.func @transform_3(%arg0: i32) -> (i32, i32) {
    %c0_i32 = arith.constant 0 : i32
    %c0_i32_0 = arith.constant 0 : i32
    return %arg0, %c0_i32 : i32, i32
  }
}

module attributes {stable_mosaic.version = 11 : i64} {
  func.func @conv_stats_kernel(%arg0: i32, %arg1: i32, %arg2: memref<1x18x18x128xf32, #tpu.memory_space<vmem>>, %arg3: memref<3x3x128x128xf32, #tpu.memory_space<vmem>>, %arg4: memref<1x256x128xf32, #tpu.memory_space<vmem>>, %arg5: memref<1x2x128xf32, #tpu.memory_space<vmem>>, %arg6: memref<256x128xf32, #tpu.memory_space<vmem>>) attributes {dimension_semantics = [#tpu.dimension_semantics<parallel>, #tpu.dimension_semantics<arbitrary>], iteration_bounds = array<i64: 2, 1>, scalar_prefetch = 0 : i64, scratch_operands = 1 : i64, tpu.core_type = #tpu.core_type<tc>, window_params = [{transform_indices = @transform_0, window_bounds = array<i64: 1, 18, 18, 128>}, {transform_indices = @transform_1, window_bounds = array<i64: 3, 3, 128, 128>}, {transform_indices = @transform_2, window_bounds = array<i64: 1, 256, 128>}, {transform_indices = @transform_3, window_bounds = array<i64: 1, 2, 128>}]} {
    %c0_i32 = arith.constant 0 : i32
    %0 = arith.cmpi eq, %arg1, %c0_i32 : i32
    %1 = arith.extui %0 : i1 to i32
    %c0_i32_0 = arith.constant 0 : i32
    %2 = arith.cmpi ne, %1, %c0_i32_0 : i32
    scf.if %2 {
      %cst_84 = arith.constant 0.000000e+00 : f32
      %71 = vector.broadcast %cst_84 : f32 to vector<256x128xf32>
      %c0_85 = arith.constant 0 : index
      %c0_86 = arith.constant 0 : index
      %72 = vector.load %arg6[%c0_85, %c0_86] : memref<256x128xf32, #tpu.memory_space<vmem>>, vector<256x128xf32>
      tpu.vector_store %arg6[%c0_85, %c0_86], %71 {strides = array<i32>} : memref<256x128xf32, #tpu.memory_space<vmem>>, vector<256x128xf32>,
    } else {
    }
    %c0 = arith.constant 0 : index
    %c0_1 = arith.constant 0 : index
    %3 = vector.load %arg6[%c0, %c0_1] : memref<256x128xf32, #tpu.memory_space<vmem>>, vector<256x128xf32>
    %c0_2 = arith.constant 0 : index
    %c0_3 = arith.constant 0 : index
    %c0_4 = arith.constant 0 : index
    %c0_5 = arith.constant 0 : index
    %4 = vector.load %arg2[%c0_2, %c0_3, %c0_4, %c0_5] : memref<1x18x18x128xf32, #tpu.memory_space<vmem>>, vector<1x16x16x128xf32>
    %5 = vector.shape_cast %4 : vector<1x16x16x128xf32> to vector<16x16x128xf32>
    %6 = vector.shape_cast %5 : vector<16x16x128xf32> to vector<256x128xf32>
    %c0_6 = arith.constant 0 : index
    %c0_7 = arith.constant 0 : index
    %c0_8 = arith.constant 0 : index
    %c0_9 = arith.constant 0 : index
    %7 = vector.load %arg3[%c0_6, %c0_7, %c0_8, %c0_9] : memref<3x3x128x128xf32, #tpu.memory_space<vmem>>, vector<1x1x128x128xf32>
    %8 = vector.shape_cast %7 : vector<1x1x128x128xf32> to vector<128x128xf32>
    %cst = arith.constant dense<0.000000e+00> : vector<256x128xf32>
    %9 = tpu.matmul %6, %8, %cst {dimension_numbers = #tpu.dot_dimension_numbers<[1], [0], [0], [1], [0, 0, 1, 1], [], []>} : vector<256x128xf32>, vector<128x128xf32>, vector<256x128xf32> -> vector<256x128xf32>
    %10 = arith.addf %3, %9 : vector<256x128xf32>
    %c0_10 = arith.constant 0 : index
    %c0_11 = arith.constant 0 : index
    %c1 = arith.constant 1 : index
    %c0_12 = arith.constant 0 : index
    %11 = vector.load %arg2[%c0_10, %c0_11, %c1, %c0_12] : memref<1x18x18x128xf32, #tpu.memory_space<vmem>>, vector<1x16x16x128xf32>
    %12 = vector.shape_cast %11 : vector<1x16x16x128xf32> to vector<16x16x128xf32>
    %13 = vector.shape_cast %12 : vector<16x16x128xf32> to vector<256x128xf32>
    %c0_13 = arith.constant 0 : index
    %c1_14 = arith.constant 1 : index
    %c0_15 = arith.constant 0 : index
    %c0_16 = arith.constant 0 : index
    %14 = vector.load %arg3[%c0_13, %c1_14, %c0_15, %c0_16] : memref<3x3x128x128xf32, #tpu.memory_space<vmem>>, vector<1x1x128x128xf32>
    %15 = vector.shape_cast %14 : vector<1x1x128x128xf32> to vector<128x128xf32>
    %cst_17 = arith.constant dense<0.000000e+00> : vector<256x128xf32>
    %16 = tpu.matmul %13, %15, %cst_17 {dimension_numbers = #tpu.dot_dimension_numbers<[1], [0], [0], [1], [0, 0, 1, 1], [], []>} : vector<256x128xf32>, vector<128x128xf32>, vector<256x128xf32> -> vector<256x128xf32>
    %17 = arith.addf %10, %16 : vector<256x128xf32>
    %c0_18 = arith.constant 0 : index
    %c0_19 = arith.constant 0 : index
    %c2 = arith.constant 2 : index
    %c0_20 = arith.constant 0 : index
    %18 = vector.load %arg2[%c0_18, %c0_19, %c2, %c0_20] : memref<1x18x18x128xf32, #tpu.memory_space<vmem>>, vector<1x16x16x128xf32>
    %19 = vector.shape_cast %18 : vector<1x16x16x128xf32> to vector<16x16x128xf32>
    %20 = vector.shape_cast %19 : vector<16x16x128xf32> to vector<256x128xf32>
    %c0_21 = arith.constant 0 : index
    %c2_22 = arith.constant 2 : index
    %c0_23 = arith.constant 0 : index
    %c0_24 = arith.constant 0 : index
    %21 = vector.load %arg3[%c0_21, %c2_22, %c0_23, %c0_24] : memref<3x3x128x128xf32, #tpu.memory_space<vmem>>, vector<1x1x128x128xf32>
    %22 = vector.shape_cast %21 : vector<1x1x128x128xf32> to vector<128x128xf32>
    %cst_25 = arith.constant dense<0.000000e+00> : vector<256x128xf32>
    %23 = tpu.matmul %20, %22, %cst_25 {dimension_numbers = #tpu.dot_dimension_numbers<[1], [0], [0], [1], [0, 0, 1, 1], [], []>} : vector<256x128xf32>, vector<128x128xf32>, vector<256x128xf32> -> vector<256x128xf32>
    %24 = arith.addf %17, %23 : vector<256x128xf32>
    %c0_26 = arith.constant 0 : index
    %c1_27 = arith.constant 1 : index
    %c0_28 = arith.constant 0 : index
    %c0_29 = arith.constant 0 : index
    %25 = vector.load %arg2[%c0_26, %c1_27, %c0_28, %c0_29] : memref<1x18x18x128xf32, #tpu.memory_space<vmem>>, vector<1x16x16x128xf32>
    %26 = vector.shape_cast %25 : vector<1x16x16x128xf32> to vector<16x16x128xf32>
    %27 = vector.shape_cast %26 : vector<16x16x128xf32> to vector<256x128xf32>
    %c1_30 = arith.constant 1 : index
    %c0_31 = arith.constant 0 : index
    %c0_32 = arith.constant 0 : index
    %c0_33 = arith.constant 0 : index
    %28 = vector.load %arg3[%c1_30, %c0_31, %c0_32, %c0_33] : memref<3x3x128x128xf32, #tpu.memory_space<vmem>>, vector<1x1x128x128xf32>
    %29 = vector.shape_cast %28 : vector<1x1x128x128xf32> to vector<128x128xf32>
    %cst_34 = arith.constant dense<0.000000e+00> : vector<256x128xf32>
    %30 = tpu.matmul %27, %29, %cst_34 {dimension_numbers = #tpu.dot_dimension_numbers<[1], [0], [0], [1], [0, 0, 1, 1], [], []>} : vector<256x128xf32>, vector<128x128xf32>, vector<256x128xf32> -> vector<256x128xf32>
    %31 = arith.addf %24, %30 : vector<256x128xf32>
    %c0_35 = arith.constant 0 : index
    %c1_36 = arith.constant 1 : index
    %c1_37 = arith.constant 1 : index
    %c0_38 = arith.constant 0 : index
    %32 = vector.load %arg2[%c0_35, %c1_36, %c1_37, %c0_38] : memref<1x18x18x128xf32, #tpu.memory_space<vmem>>, vector<1x16x16x128xf32>
    %33 = vector.shape_cast %32 : vector<1x16x16x128xf32> to vector<16x16x128xf32>
    %34 = vector.shape_cast %33 : vector<16x16x128xf32> to vector<256x128xf32>
    %c1_39 = arith.constant 1 : index
    %c1_40 = arith.constant 1 : index
    %c0_41 = arith.constant 0 : index
    %c0_42 = arith.constant 0 : index
    %35 = vector.load %arg3[%c1_39, %c1_40, %c0_41, %c0_42] : memref<3x3x128x128xf32, #tpu.memory_space<vmem>>, vector<1x1x128x128xf32>
    %36 = vector.shape_cast %35 : vector<1x1x128x128xf32> to vector<128x128xf32>
    %cst_43 = arith.constant dense<0.000000e+00> : vector<256x128xf32>
    %37 = tpu.matmul %34, %36, %cst_43 {dimension_numbers = #tpu.dot_dimension_numbers<[1], [0], [0], [1], [0, 0, 1, 1], [], []>} : vector<256x128xf32>, vector<128x128xf32>, vector<256x128xf32> -> vector<256x128xf32>
    %38 = arith.addf %31, %37 : vector<256x128xf32>
    %c0_44 = arith.constant 0 : index
    %c1_45 = arith.constant 1 : index
    %c2_46 = arith.constant 2 : index
    %c0_47 = arith.constant 0 : index
    %39 = vector.load %arg2[%c0_44, %c1_45, %c2_46, %c0_47] : memref<1x18x18x128xf32, #tpu.memory_space<vmem>>, vector<1x16x16x128xf32>
    %40 = vector.shape_cast %39 : vector<1x16x16x128xf32> to vector<16x16x128xf32>
    %41 = vector.shape_cast %40 : vector<16x16x128xf32> to vector<256x128xf32>
    %c1_48 = arith.constant 1 : index
    %c2_49 = arith.constant 2 : index
    %c0_50 = arith.constant 0 : index
    %c0_51 = arith.constant 0 : index
    %42 = vector.load %arg3[%c1_48, %c2_49, %c0_50, %c0_51] : memref<3x3x128x128xf32, #tpu.memory_space<vmem>>, vector<1x1x128x128xf32>
    %43 = vector.shape_cast %42 : vector<1x1x128x128xf32> to vector<128x128xf32>
    %cst_52 = arith.constant dense<0.000000e+00> : vector<256x128xf32>
    %44 = tpu.matmul %41, %43, %cst_52 {dimension_numbers = #tpu.dot_dimension_numbers<[1], [0], [0], [1], [0, 0, 1, 1], [], []>} : vector<256x128xf32>, vector<128x128xf32>, vector<256x128xf32> -> vector<256x128xf32>
    %45 = arith.addf %38, %44 : vector<256x128xf32>
    %c0_53 = arith.constant 0 : index
    %c2_54 = arith.constant 2 : index
    %c0_55 = arith.constant 0 : index
    %c0_56 = arith.constant 0 : index
    %46 = vector.load %arg2[%c0_53, %c2_54, %c0_55, %c0_56] : memref<1x18x18x128xf32, #tpu.memory_space<vmem>>, vector<1x16x16x128xf32>
    %47 = vector.shape_cast %46 : vector<1x16x16x128xf32> to vector<16x16x128xf32>
    %48 = vector.shape_cast %47 : vector<16x16x128xf32> to vector<256x128xf32>
    %c2_57 = arith.constant 2 : index
    %c0_58 = arith.constant 0 : index
    %c0_59 = arith.constant 0 : index
    %c0_60 = arith.constant 0 : index
    %49 = vector.load %arg3[%c2_57, %c0_58, %c0_59, %c0_60] : memref<3x3x128x128xf32, #tpu.memory_space<vmem>>, vector<1x1x128x128xf32>
    %50 = vector.shape_cast %49 : vector<1x1x128x128xf32> to vector<128x128xf32>
    %cst_61 = arith.constant dense<0.000000e+00> : vector<256x128xf32>
    %51 = tpu.matmul %48, %50, %cst_61 {dimension_numbers = #tpu.dot_dimension_numbers<[1], [0], [0], [1], [0, 0, 1, 1], [], []>} : vector<256x128xf32>, vector<128x128xf32>, vector<256x128xf32> -> vector<256x128xf32>
    %52 = arith.addf %45, %51 : vector<256x128xf32>
    %c0_62 = arith.constant 0 : index
    %c2_63 = arith.constant 2 : index
    %c1_64 = arith.constant 1 : index
    %c0_65 = arith.constant 0 : index
    %53 = vector.load %arg2[%c0_62, %c2_63, %c1_64, %c0_65] : memref<1x18x18x128xf32, #tpu.memory_space<vmem>>, vector<1x16x16x128xf32>
    %54 = vector.shape_cast %53 : vector<1x16x16x128xf32> to vector<16x16x128xf32>
    %55 = vector.shape_cast %54 : vector<16x16x128xf32> to vector<256x128xf32>
    %c2_66 = arith.constant 2 : index
    %c1_67 = arith.constant 1 : index
    %c0_68 = arith.constant 0 : index
    %c0_69 = arith.constant 0 : index
    %56 = vector.load %arg3[%c2_66, %c1_67, %c0_68, %c0_69] : memref<3x3x128x128xf32, #tpu.memory_space<vmem>>, vector<1x1x128x128xf32>
    %57 = vector.shape_cast %56 : vector<1x1x128x128xf32> to vector<128x128xf32>
    %cst_70 = arith.constant dense<0.000000e+00> : vector<256x128xf32>
    %58 = tpu.matmul %55, %57, %cst_70 {dimension_numbers = #tpu.dot_dimension_numbers<[1], [0], [0], [1], [0, 0, 1, 1], [], []>} : vector<256x128xf32>, vector<128x128xf32>, vector<256x128xf32> -> vector<256x128xf32>
    %59 = arith.addf %52, %58 : vector<256x128xf32>
    %c0_71 = arith.constant 0 : index
    %c2_72 = arith.constant 2 : index
    %c2_73 = arith.constant 2 : index
    %c0_74 = arith.constant 0 : index
    %60 = vector.load %arg2[%c0_71, %c2_72, %c2_73, %c0_74] : memref<1x18x18x128xf32, #tpu.memory_space<vmem>>, vector<1x16x16x128xf32>
    %61 = vector.shape_cast %60 : vector<1x16x16x128xf32> to vector<16x16x128xf32>
    %62 = vector.shape_cast %61 : vector<16x16x128xf32> to vector<256x128xf32>
    %c2_75 = arith.constant 2 : index
    %c2_76 = arith.constant 2 : index
    %c0_77 = arith.constant 0 : index
    %c0_78 = arith.constant 0 : index
    %63 = vector.load %arg3[%c2_75, %c2_76, %c0_77, %c0_78] : memref<3x3x128x128xf32, #tpu.memory_space<vmem>>, vector<1x1x128x128xf32>
    %64 = vector.shape_cast %63 : vector<1x1x128x128xf32> to vector<128x128xf32>
    %cst_79 = arith.constant dense<0.000000e+00> : vector<256x128xf32>
    %65 = tpu.matmul %62, %64, %cst_79 {dimension_numbers = #tpu.dot_dimension_numbers<[1], [0], [0], [1], [0, 0, 1, 1], [], []>} : vector<256x128xf32>, vector<128x128xf32>, vector<256x128xf32> -> vector<256x128xf32>
    %66 = arith.addf %59, %65 : vector<256x128xf32>
    %c0_80 = arith.constant 0 : index
    %c0_81 = arith.constant 0 : index
    %67 = vector.load %arg6[%c0_80, %c0_81] : memref<256x128xf32, #tpu.memory_space<vmem>>, vector<256x128xf32>
    tpu.vector_store %arg6[%c0_80, %c0_81], %66 {strides = array<i32>} : memref<256x128xf32, #tpu.memory_space<vmem>>, vector<256x128xf32>,
    %c0_i32_82 = arith.constant 0 : i32
    %68 = arith.cmpi eq, %arg1, %c0_i32_82 : i32
    %69 = arith.extui %68 : i1 to i32
    %c0_i32_83 = arith.constant 0 : i32
    %70 = arith.cmpi ne, %69, %c0_i32_83 : i32
    scf.if %70 {
      %c0_84 = arith.constant 0 : index
      %c0_85 = arith.constant 0 : index
      %71 = vector.load %arg6[%c0_84, %c0_85] : memref<256x128xf32, #tpu.memory_space<vmem>>, vector<256x128xf32>
      %c0_86 = arith.constant 0 : index
      %c0_87 = arith.constant 0 : index
      %c0_88 = arith.constant 0 : index
      %72 = vector.load %arg4[%c0_86, %c0_87, %c0_88] : memref<1x256x128xf32, #tpu.memory_space<vmem>>, vector<1x256x128xf32>
      %73 = vector.shape_cast %72 : vector<1x256x128xf32> to vector<256x128xf32>
      %74 = vector.shape_cast %71 : vector<256x128xf32> to vector<1x256x128xf32>
      tpu.vector_store %arg4[%c0_86, %c0_87, %c0_88], %74 {strides = array<i32>} : memref<1x256x128xf32, #tpu.memory_space<vmem>>, vector<1x256x128xf32>,
      %cst_89 = arith.constant dense<0.000000e+00> : vector<128xf32>
      %75 = vector.multi_reduction <add>, %71, %cst_89 [0] : vector<256x128xf32> to vector<128xf32>
      %76 = vector.shape_cast %75 : vector<128xf32> to vector<1x128xf32>
      %cst_90 = arith.constant 3.906250e-03 : f32
      %77 = vector.broadcast %cst_90 : f32 to vector<1x128xf32>
      %78 = arith.mulf %76, %77 : vector<1x128xf32>
      %79 = vector.broadcast %78 : vector<1x128xf32> to vector<256x128xf32>
      %80 = arith.subf %71, %79 : vector<256x128xf32>
      %81 = arith.mulf %80, %80 : vector<256x128xf32>
      %cst_91 = arith.constant dense<0.000000e+00> : vector<128xf32>
      %82 = vector.multi_reduction <add>, %81, %cst_91 [0] : vector<256x128xf32> to vector<128xf32>
      %83 = vector.shape_cast %82 : vector<128xf32> to vector<1x128xf32>
      %84 = tpu.concatenate %78, %83 in 0 : vector<1x128xf32>, vector<1x128xf32> -> vector<2x128xf32>
      %c0_92 = arith.constant 0 : index
      %c0_93 = arith.constant 0 : index
      %c0_94 = arith.constant 0 : index
      %85 = vector.load %arg5[%c0_92, %c0_93, %c0_94] : memref<1x2x128xf32, #tpu.memory_space<vmem>>, vector<1x2x128xf32>
      %86 = vector.shape_cast %85 : vector<1x2x128xf32> to vector<2x128xf32>
      %87 = vector.shape_cast %84 : vector<2x128xf32> to vector<1x2x128xf32>
      tpu.vector_store %arg5[%c0_92, %c0_93, %c0_94], %87 {strides = array<i32>} : memref<1x2x128xf32, #tpu.memory_space<vmem>>, vector<1x2x128xf32>,
    } else {
    }
    return
  }
  func.func @transform_0(%arg0: i32, %arg1: i32) -> (i32, i32, i32, i32) {
    %c0_i32 = arith.constant 0 : i32
    %c0_i32_0 = arith.constant 0 : i32
    %c0_i32_1 = arith.constant 0 : i32
    return %arg0, %c0_i32, %c0_i32_0, %arg1 : i32, i32, i32, i32
  }
  func.func @transform_1(%arg0: i32, %arg1: i32) -> (i32, i32, i32, i32) {
    %c0_i32 = arith.constant 0 : i32
    %c0_i32_0 = arith.constant 0 : i32
    %c0_i32_1 = arith.constant 0 : i32
    %c0_i32_2 = arith.constant 0 : i32
    return %c0_i32, %c0_i32_0, %arg1, %c0_i32_1 : i32, i32, i32, i32
  }
  func.func @transform_2(%arg0: i32, %arg1: i32) -> (i32, i32, i32) {
    %c0_i32 = arith.constant 0 : i32
    %c0_i32_0 = arith.constant 0 : i32
    %c0_i32_1 = arith.constant 0 : i32
    return %arg0, %c0_i32, %c0_i32_0 : i32, i32, i32
  }
  func.func @transform_3(%arg0: i32, %arg1: i32) -> (i32, i32, i32) {
    %c0_i32 = arith.constant 0 : i32
    %c0_i32_0 = arith.constant 0 : i32
    %c0_i32_1 = arith.constant 0 : i32
    return %arg0, %c0_i32, %c0_i32_0 : i32, i32, i32
  }
}

</mosaic_0001>

<bundles_post_ra>
// kernel: bridge_forward.5
= control target key start
LH: loop header
LB: loop body
LE: loop exit
PB: predicated region body
PF: predicated region fallthrough
CT: control target
= control target key end

     0   :  { %s896_s0 = inlined_call_operand.vmem [shape: f32[512,128], index: 0, kind: input, shape index: {}]   ;;  %s897_s1 = inlined_call_operand.vmem [shape: f32[1,128], index: 1, kind: input, shape index: {}]   ;;  %s898_s2 = inlined_call_operand.vmem [shape: f32[1,128], index: 2, kind: input, shape index: {}]   ;;  %s899_s3 = inlined_call_operand.vmem [shape: f32[512,128], index: 3, kind: output, shape index: {}]  }
   0x1   :  { %v14_v0 = vld [vmem:[%s896_s0] sm:$0xff]  ;;  %v15_v4 = vld [vmem:[%s896_s0 + $0x8] sm:$0xff]  ;;  %v16_v5 = vld [vmem:[%s896_s0 + $0x10] sm:$0xff] }
   0x2   :  { %v380_v1 = vld [vmem:[%s897_s1] ss:$0 sm:$0xff]  ;;  %v17_v6 = vld [vmem:[%s896_s0 + $0x18] sm:$0xff]  ;;  %v19_v11 = vld [vmem:[%s896_s0 + $0x28] sm:$0xff] }
   0x3   :  { %v385_v2 = vld [vmem:[%s898_s2] ss:$0 sm:$0xff]  ;;  %v85_v3 = vmul.f32 %v380_v1, %v14_v0  ;;  %v86_v7 = vmul.f32 %v380_v1, %v15_v4  ;;  %v87_v8 = vmul.f32 %v380_v1, %v16_v5  ;;  %v88_v9 = vmul.f32 %v380_v1, %v17_v6  ;;  %v20_v12 = vld [vmem:[%s896_s0 + $0x30] sm:$0xff]  ;;  %v21_v17 = vld [vmem:[%s896_s0 + $0x38] sm:$0xff] }
   0x4   :  { %v18_v10 = vld [vmem:[%s896_s0 + $0x20] sm:$0xff]  ;;  %v90_v15 = vmul.f32 %v380_v1, %v19_v11  ;;  %v91_v16 = vmul.f32 %v380_v1, %v20_v12  ;;  %v92_v21 = vmul.f32 %v380_v1, %v21_v17  ;;  %v23_v27 = vld [vmem:[%s896_s0 + $0x48] sm:$0xff]  ;;  %v24_v28 = vld [vmem:[%s896_s0 + $0x50] sm:$0xff] }
   0x5   :  { %v156_v13 = vadd.f32 %v385_v2, %v85_v3  ;;  %v89_v14 = vmul.f32 %v380_v1, %v18_v10  ;;  %v157_v18 = vadd.f32 %v385_v2, %v86_v7  ;;  %v158_v19 = vadd.f32 %v385_v2, %v87_v8  ;;  %v22_v22 = vld [vmem:[%s896_s0 + $0x40] sm:$0xff]  ;;  %v25_v29 = vld [vmem:[%s896_s0 + $0x58] sm:$0xff]  ;;  %v27_v35 = vld [vmem:[%s896_s0 + $0x68] sm:$0xff] }
   0x6   :  { %v159_v20 = vadd.f32 %v385_v2, %v88_v9  ;;  %v161_v25 = vadd.f32 %v385_v2, %v90_v15  ;;  %v162_v26 = vadd.f32 %v385_v2, %v91_v16  ;;  %v163_v33 = vadd.f32 %v385_v2, %v92_v21  ;;  %v26_v34 = vld [vmem:[%s896_s0 + $0x60] sm:$0xff]  ;;  %v28_v36 = vld [vmem:[%s896_s0 + $0x70] sm:$0xff]  ;;  %v29_v41 = vld [vmem:[%s896_s0 + $0x78] sm:$0xff] }
   0x7   :  { %v220_v23 = vmax.f32 %v156_v13, 0.0  ;;  %v160_v24 = vadd.f32 %v385_v2, %v89_v14  ;;  %v221_v30 = vmax.f32 %v157_v18, 0.0  ;;  %v222_v31 = vmax.f32 %v158_v19, 0.0  ;;  %v30_v54 = vld [vmem:[%s896_s0 + $0x80] sm:$0xff]  ;;  %v31_v59 = vld [vmem:[%s896_s0 + $0x88] sm:$0xff]  ;;  %v32_v60 = vld [vmem:[%s896_s0 + $0x90] sm:$0xff] }
   0x8   :  { %v223_v32 = vmax.f32 %v159_v20, 0.0  ;;  %v225_v38 = vmax.f32 %v161_v25, 0.0  ;;  %v226_v39 = vmax.f32 %v162_v26, 0.0  ;;  %v93_v40 = vmul.f32 %v380_v1, %v22_v22  ;;  %v33_v61 = vld [vmem:[%s896_s0 + $0x98] sm:$0xff]  ;;  %v34_v4 = vld [vmem:[%s896_s0 + $0xa0] sm:$0xff]  ;;  %v35_v5 = vld [vmem:[%s896_s0 + $0xa8] sm:$0xff] }
   0x9   :  { %284 = vst [vmem:[%s899_s3] sm:$0xff] %v220_v23  ;;  %v224_v37 = vmax.f32 %v160_v24, 0.0  ;;  %285 = vst [vmem:[%s899_s3 + $0x8] sm:$0xff] %v221_v30  ;;  %v227_v42 = vmax.f32 %v163_v33, 0.0  ;;  %v94_v43 = vmul.f32 %v380_v1, %v23_v27  ;;  %v95_v44 = vmul.f32 %v380_v1, %v24_v28  ;;  %v36_v6 = vld [vmem:[%s896_s0 + $0xb0] sm:$0xff]  ;;  %v37_v11 = vld [vmem:[%s896_s0 + $0xb8] sm:$0xff] }
   0xa   :  { %286 = vst [vmem:[%s899_s3 + $0x10] sm:$0xff] %v222_v31  ;;  %287 = vst [vmem:[%s899_s3 + $0x18] sm:$0xff] %v223_v32  ;;  %v96_v45 = vmul.f32 %v380_v1, %v25_v29  ;;  %v164_v46 = vadd.f32 %v385_v2, %v93_v40  ;;  %v97_v47 = vmul.f32 %v380_v1, %v26_v34  ;;  %v38_v24 = vld [vmem:[%s896_s0 + $0xc0] sm:$0xff]  ;;  %v39_v29 = vld [vmem:[%s896_s0 + $0xc8] sm:$0xff] }
   0xb   :  { %288 = vst [vmem:[%s899_s3 + $0x20] sm:$0xff] %v224_v37  ;;  %289 = vst [vmem:[%s899_s3 + $0x28] sm:$0xff] %v225_v38  ;;  %v98_v48 = vmul.f32 %v380_v1, %v27_v35  ;;  %v99_v49 = vmul.f32 %v380_v1, %v28_v36  ;;  %v165_v50 = vadd.f32 %v385_v2, %v94_v43  ;;  %v40_v30 = vld [vmem:[%s896_s0 + $0xd0] sm:$0xff]  ;;  %v41_v31 = vld [vmem:[%s896_s0 + $0xd8] sm:$0xff] }
   0xc   :  { %290 = vst [vmem:[%s899_s3 + $0x30] sm:$0xff] %v226_v39  ;;  %291 = vst [vmem:[%s899_s3 + $0x38] sm:$0xff] %v227_v42  ;;  %v166_v51 = vadd.f32 %v385_v2, %v95_v44  ;;  %v167_v52 = vadd.f32 %v385_v2, %v96_v45  ;;  %v100_v53 = vmul.f32 %v380_v1, %v29_v41  ;;  %v228_v55 = vmax.f32 %v164_v46, 0.0  ;;  %v42_v36 = vld [vmem:[%s896_s0 + $0xe0] sm:$0xff]  ;;  %v43_v37 = vld [vmem:[%s896_s0 + $0xe8] sm:$0xff] }
   0xd   :  { %v168_v56 = vadd.f32 %v385_v2, %v97_v47  ;;  %v169_v57 = vadd.f32 %v385_v2, %v98_v48  ;;  %v170_v58 = vadd.f32 %v385_v2, %v99_v49  ;;  %v229_v62 = vmax.f32 %v165_v50, 0.0  ;;  %v44_v38 = vld [vmem:[%s896_s0 + $0xf0] sm:$0xff]  ;;  %v45_v43 = vld [vmem:[%s896_s0 + $0xf8] sm:$0xff] }
   0xe   :  { %v230_v63 = vmax.f32 %v166_v51, 0.0  ;;  %v231_v0 = vmax.f32 %v167_v52, 0.0  ;;  %v171_v3 = vadd.f32 %v385_v2, %v100_v53  ;;  %292 = vst [vmem:[%s899_s3 + $0x40] sm:$0xff] %v228_v55  ;;  %v101_v10 = vmul.f32 %v380_v1, %v30_v54 }
   0xf   :  { %v232_v7 = vmax.f32 %v168_v56, 0.0  ;;  %v233_v8 = vmax.f32 %v169_v57, 0.0  ;;  %v234_v9 = vmax.f32 %v170_v58, 0.0  ;;  %293 = vst [vmem:[%s899_s3 + $0x48] sm:$0xff] %v229_v62  ;;  %v102_v13 = vmul.f32 %v380_v1, %v31_v59  ;;  %v46_v56 = vld [vmem:[%s896_s0 + $0x100] sm:$0xff]  ;;  %v48_v62 = vld [vmem:[%s896_s0 + $0x110] sm:$0xff] }
  0x10   :  { %294 = vst [vmem:[%s899_s3 + $0x50] sm:$0xff] %v230_v63  ;;  %295 = vst [vmem:[%s899_s3 + $0x58] sm:$0xff] %v231_v0  ;;  %v235_v12 = vmax.f32 %v171_v3, 0.0  ;;  %v103_v14 = vmul.f32 %v380_v1, %v32_v60  ;;  %v104_v15 = vmul.f32 %v380_v1, %v33_v61  ;;  %v172_v16 = vadd.f32 %v385_v2, %v101_v10  ;;  %v47_v61 = vld [vmem:[%s896_s0 + $0x108] sm:$0xff]  ;;  %v49_v63 = vld [vmem:[%s896_s0 + $0x118] sm:$0xff] }
  0x11   :  { %296 = vst [vmem:[%s899_s3 + $0x60] sm:$0xff] %v232_v7  ;;  %297 = vst [vmem:[%s899_s3 + $0x68] sm:$0xff] %v233_v8  ;;  %v105_v17 = vmul.f32 %v380_v1, %v34_v4  ;;  %v106_v18 = vmul.f32 %v380_v1, %v35_v5  ;;  %v107_v19 = vmul.f32 %v380_v1, %v36_v6  ;;  %v50_v6 = vld [vmem:[%s896_s0 + $0x120] sm:$0xff]  ;;  %v51_v7 = vld [vmem:[%s896_s0 + $0x128] sm:$0xff] }
  0x12   :  { %298 = vst [vmem:[%s899_s3 + $0x70] sm:$0xff] %v234_v9  ;;  %299 = vst [vmem:[%s899_s3 + $0x78] sm:$0xff] %v235_v12  ;;  %v173_v20 = vadd.f32 %v385_v2, %v102_v13  ;;  %v174_v21 = vadd.f32 %v385_v2, %v103_v14  ;;  %v175_v22 = vadd.f32 %v385_v2, %v104_v15  ;;  %v236_v25 = vmax.f32 %v172_v16, 0.0  ;;  %v52_v8 = vld [vmem:[%s896_s0 + $0x130] sm:$0xff]  ;;  %v53_v13 = vld [vmem:[%s896_s0 + $0x138] sm:$0xff] }
  0x13   :  { %v108_v23 = vmul.f32 %v380_v1, %v37_v11  ;;  %v176_v26 = vadd.f32 %v385_v2, %v105_v17  ;;  %v177_v27 = vadd.f32 %v385_v2, %v106_v18  ;;  %v178_v28 = vadd.f32 %v385_v2, %v107_v19 }
  0x14   :  { %v237_v32 = vmax.f32 %v173_v20, 0.0  ;;  %v238_v33 = vmax.f32 %v174_v21, 0.0  ;;  %v239_v34 = vmax.f32 %v175_v22, 0.0  ;;  %300 = vst [vmem:[%s899_s3 + $0x80] sm:$0xff] %v236_v25  ;;  %v109_v42 = vmul.f32 %v380_v1, %v38_v24 }
  0x15   :  { %v179_v35 = vadd.f32 %v385_v2, %v108_v23  ;;  %v240_v39 = vmax.f32 %v176_v26, 0.0  ;;  %v241_v40 = vmax.f32 %v177_v27, 0.0  ;;  %v242_v41 = vmax.f32 %v178_v28, 0.0  ;;  %v54_v26 = vld [vmem:[%s896_s0 + $0x140] sm:$0xff] }
  0x16   :  { %301 = vst [vmem:[%s899_s3 + $0x88] sm:$0xff] %v237_v32  ;;  %302 = vst [vmem:[%s899_s3 + $0x90] sm:$0xff] %v238_v33  ;;  %v110_v45 = vmul.f32 %v380_v1, %v39_v29  ;;  %v111_v46 = vmul.f32 %v380_v1, %v40_v30  ;;  %v112_v47 = vmul.f32 %v380_v1, %v41_v31  ;;  %v55_v31 = vld [vmem:[%s896_s0 + $0x148] sm:$0xff]  ;;  %v56_v32 = vld [vmem:[%s896_s0 + $0x150] sm:$0xff] }
  0x17   :  { %303 = vst [vmem:[%s899_s3 + $0x98] sm:$0xff] %v239_v34  ;;  %v243_v44 = vmax.f32 %v179_v35, 0.0  ;;  %304 = vst [vmem:[%s899_s3 + $0xa0] sm:$0xff] %v240_v39  ;;  %v180_v48 = vadd.f32 %v385_v2, %v109_v42  ;;  %v113_v49 = vmul.f32 %v380_v1, %v42_v36  ;;  %v114_v50 = vmul.f32 %v380_v1, %v43_v37  ;;  %v57_v33 = vld [vmem:[%s896_s0 + $0x158] sm:$0xff]  ;;  %v59_v39 = vld [vmem:[%s896_s0 + $0x168] sm:$0xff] }
  0x18   :  { %305 = vst [vmem:[%s899_s3 + $0xa8] sm:$0xff] %v241_v40  ;;  %306 = vst [vmem:[%s899_s3 + $0xb0] sm:$0xff] %v242_v41  ;;  %v115_v51 = vmul.f32 %v380_v1, %v44_v38  ;;  %v181_v52 = vadd.f32 %v385_v2, %v110_v45  ;;  %v182_v53 = vadd.f32 %v385_v2, %v111_v46  ;;  %v58_v38 = vld [vmem:[%s896_s0 + $0x160] sm:$0xff]  ;;  %v60_v40 = vld [vmem:[%s896_s0 + $0x170] sm:$0xff] }
  0x19   :  { %307 = vst [vmem:[%s899_s3 + $0xb8] sm:$0xff] %v243_v44  ;;  %v183_v54 = vadd.f32 %v385_v2, %v112_v47  ;;  %v116_v55 = vmul.f32 %v380_v1, %v45_v43  ;;  %v244_v57 = vmax.f32 %v180_v48, 0.0  ;;  %v184_v58 = vadd.f32 %v385_v2, %v113_v49  ;;  %v61_v45 = vld [vmem:[%s896_s0 + $0x178] sm:$0xff] }
  0x1a   :  { %v185_v59 = vadd.f32 %v385_v2, %v114_v50  ;;  %v186_v60 = vadd.f32 %v385_v2, %v115_v51  ;;  %v245_v0 = vmax.f32 %v181_v52, 0.0  ;;  %v246_v3 = vmax.f32 %v182_v53, 0.0 }
  0x1b   :  { %v247_v4 = vmax.f32 %v183_v54, 0.0  ;;  %v187_v5 = vadd.f32 %v385_v2, %v116_v55  ;;  %308 = vst [vmem:[%s899_s3 + $0xc0] sm:$0xff] %v244_v57  ;;  %v248_v9 = vmax.f32 %v184_v58, 0.0  ;;  %v117_v12 = vmul.f32 %v380_v1, %v46_v56  ;;  %v62_v58 = vld [vmem:[%s896_s0 + $0x180] sm:$0xff] }
  0x1c   :  { %v249_v10 = vmax.f32 %v185_v59, 0.0  ;;  %v250_v11 = vmax.f32 %v186_v60, 0.0  ;;  %309 = vst [vmem:[%s899_s3 + $0xc8] sm:$0xff] %v245_v0  ;;  %310 = vst [vmem:[%s899_s3 + $0xd0] sm:$0xff] %v246_v3  ;;  %v118_v15 = vmul.f32 %v380_v1, %v47_v61  ;;  %v119_v16 = vmul.f32 %v380_v1, %v48_v62  ;;  %v64_v0 = vld [vmem:[%s896_s0 + $0x190] sm:$0xff]  ;;  %v65_v3 = vld [vmem:[%s896_s0 + $0x198] sm:$0xff] }
  0x1d   :  { %311 = vst [vmem:[%s899_s3 + $0xd8] sm:$0xff] %v247_v4  ;;  %v251_v14 = vmax.f32 %v187_v5, 0.0  ;;  %v120_v17 = vmul.f32 %v380_v1, %v49_v63  ;;  %312 = vst [vmem:[%s899_s3 + $0xe0] sm:$0xff] %v248_v9  ;;  %v188_v18 = vadd.f32 %v385_v2, %v117_v12  ;;  %v121_v19 = vmul.f32 %v380_v1, %v50_v6  ;;  %v63_v63 = vld [vmem:[%s896_s0 + $0x188] sm:$0xff] }
  0x1e   :  { %313 = vst [vmem:[%s899_s3 + $0xe8] sm:$0xff] %v249_v10  ;;  %314 = vst [vmem:[%s899_s3 + $0xf0] sm:$0xff] %v250_v11  ;;  %v122_v20 = vmul.f32 %v380_v1, %v51_v7  ;;  %v123_v21 = vmul.f32 %v380_v1, %v52_v8  ;;  %v189_v22 = vadd.f32 %v385_v2, %v118_v15  ;;  %v66_v8 = vld [vmem:[%s896_s0 + $0x1a0] sm:$0xff]  ;;  %v67_v9 = vld [vmem:[%s896_s0 + $0x1a8] sm:$0xff] }
  0x1f   :  { %315 = vst [vmem:[%s899_s3 + $0xf8] sm:$0xff] %v251_v14  ;;  %v190_v23 = vadd.f32 %v385_v2, %v119_v16  ;;  %v191_v24 = vadd.f32 %v385_v2, %v120_v17  ;;  %v124_v25 = vmul.f32 %v380_v1, %v53_v13  ;;  %v252_v27 = vmax.f32 %v188_v18, 0.0  ;;  %v68_v10 = vld [vmem:[%s896_s0 + $0x1b0] sm:$0xff]  ;;  %v69_v15 = vld [vmem:[%s896_s0 + $0x1b8] sm:$0xff] }
  0x20   :  { %v192_v28 = vadd.f32 %v385_v2, %v121_v19  ;;  %v193_v29 = vadd.f32 %v385_v2, %v122_v20  ;;  %v194_v30 = vadd.f32 %v385_v2, %v123_v21  ;;  %v253_v34 = vmax.f32 %v189_v22, 0.0 }
  0x21   :  { %v254_v35 = vmax.f32 %v190_v23, 0.0  ;;  %v255_v36 = vmax.f32 %v191_v24, 0.0  ;;  %v195_v37 = vadd.f32 %v385_v2, %v124_v25  ;;  %316 = vst [vmem:[%s899_s3 + $0x100] sm:$0xff] %v252_v27  ;;  %v125_v44 = vmul.f32 %v380_v1, %v54_v26 }
  0x22   :  { %v256_v41 = vmax.f32 %v192_v28, 0.0  ;;  %v257_v42 = vmax.f32 %v193_v29, 0.0  ;;  %v258_v43 = vmax.f32 %v194_v30, 0.0  ;;  %317 = vst [vmem:[%s899_s3 + $0x108] sm:$0xff] %v253_v34  ;;  %v126_v47 = vmul.f32 %v380_v1, %v55_v31  ;;  %v70_v28 = vld [vmem:[%s896_s0 + $0x1c0] sm:$0xff]  ;;  %v72_v34 = vld [vmem:[%s896_s0 + $0x1d0] sm:$0xff] }
  0x23   :  { %318 = vst [vmem:[%s899_s3 + $0x110] sm:$0xff] %v254_v35  ;;  %319 = vst [vmem:[%s899_s3 + $0x118] sm:$0xff] %v255_v36  ;;  %v259_v46 = vmax.f32 %v195_v37, 0.0  ;;  %v127_v48 = vmul.f32 %v380_v1, %v56_v32  ;;  %v128_v49 = vmul.f32 %v380_v1, %v57_v33  ;;  %v196_v50 = vadd.f32 %v385_v2, %v125_v44  ;;  %v71_v33 = vld [vmem:[%s896_s0 + $0x1c8] sm:$0xff]  ;;  %v73_v35 = vld [vmem:[%s896_s0 + $0x1d8] sm:$0xff] }
  0x24   :  { %320 = vst [vmem:[%s899_s3 + $0x120] sm:$0xff] %v256_v41  ;;  %321 = vst [vmem:[%s899_s3 + $0x128] sm:$0xff] %v257_v42  ;;  %v129_v51 = vmul.f32 %v380_v1, %v58_v38  ;;  %v130_v52 = vmul.f32 %v380_v1, %v59_v39  ;;  %v131_v53 = vmul.f32 %v380_v1, %v60_v40  ;;  %v74_v40 = vld [vmem:[%s896_s0 + $0x1e0] sm:$0xff]  ;;  %v75_v41 = vld [vmem:[%s896_s0 + $0x1e8] sm:$0xff] }
  0x25   :  { %322 = vst [vmem:[%s899_s3 + $0x130] sm:$0xff] %v258_v43  ;;  %323 = vst [vmem:[%s899_s3 + $0x138] sm:$0xff] %v259_v46  ;;  %v197_v54 = vadd.f32 %v385_v2, %v126_v47  ;;  %v198_v55 = vadd.f32 %v385_v2, %v127_v48  ;;  %v199_v56 = vadd.f32 %v385_v2, %v128_v49  ;;  %v260_v59 = vmax.f32 %v196_v50, 0.0  ;;  %v76_v42 = vld [vmem:[%s896_s0 + $0x1f0] sm:$0xff]  ;;  %v77_v47 = vld [vmem:[%s896_s0 + $0x1f8] sm:$0xff] }
  0x26   :  { %v132_v57 = vmul.f32 %v380_v1, %v61_v45  ;;  %v200_v60 = vadd.f32 %v385_v2, %v129_v51  ;;  %v201_v61 = vadd.f32 %v385_v2, %v130_v52  ;;  %v202_v62 = vadd.f32 %v385_v2, %v131_v53 }
  0x27   :  { %v261_v4 = vmax.f32 %v197_v54, 0.0  ;;  %v262_v5 = vmax.f32 %v198_v55, 0.0  ;;  %v263_v6 = vmax.f32 %v199_v56, 0.0  ;;  %324 = vst [vmem:[%s899_s3 + $0x140] sm:$0xff] %v260_v59  ;;  %v133_v14 = vmul.f32 %v380_v1, %v62_v58 }
  0x28   :  { %v203_v7 = vadd.f32 %v385_v2, %v132_v57  ;;  %v264_v11 = vmax.f32 %v200_v60, 0.0  ;;  %v265_v12 = vmax.f32 %v201_v61, 0.0  ;;  %v266_v13 = vmax.f32 %v202_v62, 0.0 }
  0x29   :  { %325 = vst [vmem:[%s899_s3 + $0x148] sm:$0xff] %v261_v4  ;;  %326 = vst [vmem:[%s899_s3 + $0x150] sm:$0xff] %v262_v5  ;;  %v134_v17 = vmul.f32 %v380_v1, %v63_v63  ;;  %v135_v18 = vmul.f32 %v380_v1, %v64_v0  ;;  %v136_v19 = vmul.f32 %v380_v1, %v65_v3 }
  0x2a   :  { %327 = vst [vmem:[%s899_s3 + $0x158] sm:$0xff] %v263_v6  ;;  %v267_v16 = vmax.f32 %v203_v7, 0.0  ;;  %328 = vst [vmem:[%s899_s3 + $0x160] sm:$0xff] %v264_v11  ;;  %v204_v20 = vadd.f32 %v385_v2, %v133_v14  ;;  %v137_v21 = vmul.f32 %v380_v1, %v66_v8  ;;  %v138_v22 = vmul.f32 %v380_v1, %v67_v9 }
  0x2b   :  { %329 = vst [vmem:[%s899_s3 + $0x168] sm:$0xff] %v265_v12  ;;  %330 = vst [vmem:[%s899_s3 + $0x170] sm:$0xff] %v266_v13  ;;  %v139_v23 = vmul.f32 %v380_v1, %v68_v10  ;;  %v205_v24 = vadd.f32 %v385_v2, %v134_v17  ;;  %v206_v25 = vadd.f32 %v385_v2, %v135_v18 }
  0x2c   :  { %331 = vst [vmem:[%s899_s3 + $0x178] sm:$0xff] %v267_v16  ;;  %v207_v26 = vadd.f32 %v385_v2, %v136_v19  ;;  %v140_v27 = vmul.f32 %v380_v1, %v69_v15  ;;  %v268_v29 = vmax.f32 %v204_v20, 0.0  ;;  %v208_v30 = vadd.f32 %v385_v2, %v137_v21 }
  0x2d   :  { %v209_v31 = vadd.f32 %v385_v2, %v138_v22  ;;  %v210_v32 = vadd.f32 %v385_v2, %v139_v23  ;;  %v269_v36 = vmax.f32 %v205_v24, 0.0  ;;  %v270_v37 = vmax.f32 %v206_v25, 0.0 }
  0x2e   :  { %v271_v38 = vmax.f32 %v207_v26, 0.0  ;;  %v211_v39 = vadd.f32 %v385_v2, %v140_v27  ;;  %332 = vst [vmem:[%s899_s3 + $0x180] sm:$0xff] %v268_v29  ;;  %v272_v43 = vmax.f32 %v208_v30, 0.0  ;;  %v141_v46 = vmul.f32 %v380_v1, %v70_v28 }
  0x2f   :  { %v273_v44 = vmax.f32 %v209_v31, 0.0  ;;  %v274_v45 = vmax.f32 %v210_v32, 0.0  ;;  %333 = vst [vmem:[%s899_s3 + $0x188] sm:$0xff] %v269_v36  ;;  %334 = vst [vmem:[%s899_s3 + $0x190] sm:$0xff] %v270_v37  ;;  %v142_v49 = vmul.f32 %v380_v1, %v71_v33  ;;  %v143_v50 = vmul.f32 %v380_v1, %v72_v34 }
  0x30   :  { %335 = vst [vmem:[%s899_s3 + $0x198] sm:$0xff] %v271_v38  ;;  %v275_v48 = vmax.f32 %v211_v39, 0.0  ;;  %v144_v51 = vmul.f32 %v380_v1, %v73_v35  ;;  %336 = vst [vmem:[%s899_s3 + $0x1a0] sm:$0xff] %v272_v43  ;;  %v212_v52 = vadd.f32 %v385_v2, %v141_v46  ;;  %v145_v53 = vmul.f32 %v380_v1, %v74_v40 }
  0x31   :  { %337 = vst [vmem:[%s899_s3 + $0x1a8] sm:$0xff] %v273_v44  ;;  %338 = vst [vmem:[%s899_s3 + $0x1b0] sm:$0xff] %v274_v45  ;;  %v146_v54 = vmul.f32 %v380_v1, %v75_v41  ;;  %v147_v55 = vmul.f32 %v380_v1, %v76_v42  ;;  %v213_v56 = vadd.f32 %v385_v2, %v142_v49 }
  0x32   :  { %339 = vst [vmem:[%s899_s3 + $0x1b8] sm:$0xff] %v275_v48  ;;  %v214_v57 = vadd.f32 %v385_v2, %v143_v50  ;;  %v215_v58 = vadd.f32 %v385_v2, %v144_v51  ;;  %v148_v59 = vmul.f32 %v380_v1, %v77_v47  ;;  %v276_v60 = vmax.f32 %v212_v52, 0.0 }
  0x33   :  { %v216_v61 = vadd.f32 %v385_v2, %v145_v53  ;;  %v217_v62 = vadd.f32 %v385_v2, %v146_v54  ;;  %v218_v63 = vadd.f32 %v385_v2, %v147_v55  ;;  %v277_v0 = vmax.f32 %v213_v56, 0.0 }
  0x34   :  { %v278_v3 = vmax.f32 %v214_v57, 0.0  ;;  %v279_v4 = vmax.f32 %v215_v58, 0.0  ;;  %v219_v5 = vadd.f32 %v385_v2, %v148_v59  ;;  %340 = vst [vmem:[%s899_s3 + $0x1c0] sm:$0xff] %v276_v60 }
  0x35   :  { %v280_v6 = vmax.f32 %v216_v61, 0.0  ;;  %v281_v7 = vmax.f32 %v217_v62, 0.0  ;;  %v282_v8 = vmax.f32 %v218_v63, 0.0  ;;  %341 = vst [vmem:[%s899_s3 + $0x1c8] sm:$0xff] %v277_v0 }
  0x36   :  { %342 = vst [vmem:[%s899_s3 + $0x1d0] sm:$0xff] %v278_v3  ;;  %343 = vst [vmem:[%s899_s3 + $0x1d8] sm:$0xff] %v279_v4  ;;  %v283_v1 = vmax.f32 %v219_v5, 0.0 }
  0x37   :  { %344 = vst [vmem:[%s899_s3 + $0x1e0] sm:$0xff] %v280_v6  ;;  %345 = vst [vmem:[%s899_s3 + $0x1e8] sm:$0xff] %v281_v7 }
  0x38   :  { %346 = vst [vmem:[%s899_s3 + $0x1f0] sm:$0xff] %v282_v8  ;;  %347 = vst [vmem:[%s899_s3 + $0x1f8] sm:$0xff] %v283_v1 }

// kernel: bridge_forward.4
= control target key start
LH: loop header
LB: loop body
LE: loop exit
PB: predicated region body
PF: predicated region fallthrough
CT: control target
= control target key end

     0   :  { %s5451_s12 = smov 0   ;;  %s5453_s13 = smov 0   ;;  %s7112_s0 = inlined_call_operand.vmem [shape: f32[2,18,18,8], index: 0, kind: input, shape index: {}]   ;;  %s7113_s1 = inlined_call_operand.vmem [shape: f32[3,3,8,128], index: 1, kind: input, shape index: {}]   ;;  %s7114_s2 = inlined_call_operand.vmem [shape: f32[2,256,128], index: 2, kind: output, shape index: {0}]   ;;  %s7115_s3 = inlined_call_operand.vmem [shape: f32[2,2,128], index: 3, kind: output, shape index: {1}]  }
   0x1   :  { %s5455_s14 = smov 0  }
   0x2 LB: > { %s26_s15 = sadd.s32 1, %s5425_s13  ;;  %p4137_p0 = scmp.ge.s32.totalorder %s5429_s14, 1  ;;  %s5429_s14 = sphi %s5455_s14, %s14_s14   ;;  %s5425_s13 = sphi %s5453_s13, %s7378_s13   ;;  %s5421_s12 = sphi %s5451_s12, %s7377_s12  }
   0x3   : > { %p28_p1 = scmp.ge.s32.totalorder %s26_s15, 2  ;;  %p166_p2 = scmp.lt.s32.totalorder %s5429_s14, 3 }
   0x5   : > { %s7380_s15 = smov (%p28_p1, %s26_s15), 0  ;;  %p167_p3 = pnand %p4137_p0, %p166_p2 }
   0x7   : > { %170 = sbr.rel (%p167_p3) target bundleno = 602 (0x25a), region = 28 }
   0xc   : > { %v322_v0 = vld [vmem:[%s7113_s1] sm:$0xff]  ;;  %p201_p4 = scmp.lt.s32.totalorder %s5421_s12, 1  ;;  %v4174_v1 = vld [vmem:[%s7113_s1 + $0x8] sm:$0xff]  ;;  %v4207_v2 = vld [vmem:[%s7113_s1 + $0x10] sm:$0xff]  ;;  %vm323_vm0 = vcmask 64512   ;;  %vm4013_vm1 = vcmask 1040384  }
   0xd   : > { %5380 = vmatprep.subr.mxu1 %v322_v0  ;;  %4930 = vmatprep.subr.mxu0 %v322_v0  ;;  %v5509_v9 = vld [vmem:[%s7113_s1 + $0x18] sm:$0xff]  ;;  %v5514_v10 = vld [vmem:[%s7113_s1 + $0x20] sm:$0xff]  ;;  %v5669_v43 = vld [vmem:[%s7113_s1 + $0x28] sm:$0xff] }
   0xe   : > { %5381 = vmatpush3.msra.mxu1 %v322_v0  ;;  %4931 = vmatpush3.msra.mxu0 %v322_v0  ;;  %s7382_s12 = smov (!%p201_p4, %s5421_s12), 1  ;;  %v5674_v44 = vld [vmem:[%s7113_s1 + $0x30] sm:$0xff] }
   0xf   : > { %4980 = vmatprep.subr.mxu1 %v4174_v1  ;;  %5030 = vmatprep.subr.mxu0 %v4207_v2  ;;  %s5382_s22 = smul.u32 432, %s7382_s12  ;;  %s4632_s11 = sshll.u32 %s7382_s12, 8 }
  0x10   : > { %s6784_s18 = scalar_lea.vmem %s7114_s2, %s4632_s11  ;;  %s4141_s19 = sshll.u32 %s7382_s12, 1 }
  0x11   : > { %s5484_s25 = scalar_lea.vmem %s7112_s0, %s5382_s22  ;;  %s221_s22 = scalar_lea.vmem %s7115_s3, %s4141_s19 }
  0x12   : > { %v290_v3 = vld [vmem:[%s5484_s25] sm:$0xff]  ;;  %v291_v5 = vld [vmem:[%s5484_s25 + $0x8] sm:$0xff]  ;;  %v5498_v7 = vld [vmem:[%s5484_s25 + $0x18] sm:$0xff] }
  0x13   : > { %v5488_v4 = vld [vmem:[%s5484_s25 + $0xc0] sm:$0xff]  ;;  %4932 = vmatprep.mubr.msk.f32.mxu0 %vm323_vm0, %v290_v3  ;;  %v5495_v6 = vld [vmem:[%s5484_s25 + $0xc8] sm:$0xff]  ;;  %v5501_v8 = vld [vmem:[%s5484_s25 + $0xd8] sm:$0xff] }
  0x14   : > { %4956 = vmatprep.mubr.msk.f32.mxu1 %vm323_vm0, %v5488_v4  ;;  %4933 = vmatmul.mubr.msk.f32.vlgmr.msra.gmra.mxu0 %vm323_vm0, %v291_v5  ;;  %v5517_v11 = vld [vmem:[%s5484_s25 + $0x20] sm:$0xff]  ;;  %v5527_v13 = vld [vmem:[%s5484_s25 + $0x30] sm:$0xff]  ;;  %v5543_v15 = vld [vmem:[%s5484_s25 + $0x38] sm:$0xff] }
  0x15   : > { %4957 = vmatmul.mubr.msk.f32.vlgmr.msra.gmra.mxu1 %vm323_vm0, %v5495_v6  ;;  %5031 = vmatpush3.msra.mxu0 %v4207_v2  ;;  %v5520_v12 = vld [vmem:[%s5484_s25 + $0xe0] sm:$0xff]  ;;  %v5530_v14 = vld [vmem:[%s5484_s25 + $0xf0] sm:$0xff]  ;;  %v5546_v16 = vld [vmem:[%s5484_s25 + $0xf8] sm:$0xff] }
  0x16   : > { %4981 = vmatpush3.msra.mxu1 %v4174_v1  ;;  %4935 = vmatprep.mubr.msk.f32.mxu0 %vm323_vm0, %v5498_v7  ;;  %v5549_v17 = vld [vmem:[%s5484_s25 + $0x48] sm:$0xff]  ;;  %v5563_v19 = vld [vmem:[%s5484_s25 + $0x50] sm:$0xff]  ;;  %v5569_v21 = vld [vmem:[%s5484_s25 + $0x60] sm:$0xff] }
  0x17   : > { %4959 = vmatprep.mubr.msk.f32.mxu1 %vm323_vm0, %v5501_v8  ;;  %5080 = vmatprep.subr.mxu1 %v5509_v9  ;;  %v5552_v18 = vld [vmem:[%s5484_s25 + $0x108] sm:$0xff]  ;;  %v5566_v20 = vld [vmem:[%s5484_s25 + $0x110] sm:$0xff]  ;;  %v5572_v22 = vld [vmem:[%s5484_s25 + $0x120] sm:$0xff] }
  0x18   : > { %5130 = vmatprep.subr.mxu0 %v5514_v10  ;;  %4936 = vmatmul.mubr.msk.f32.gmra.mxu0 %vm323_vm0, %v5517_v11  ;;  %v5583_v23 = vld [vmem:[%s5484_s25 + $0x68] sm:$0xff]  ;;  %v5589_v25 = vld [vmem:[%s5484_s25 + $0x78] sm:$0xff]  ;;  %v5603_v27 = vld [vmem:[%s5484_s25 + $0x80] sm:$0xff] }
  0x19   : > { %4960 = vmatmul.mubr.msk.f32.gmra.mxu1 %vm323_vm0, %v5520_v12  ;;  %4938 = vmatprep.mubr.msk.f32.mxu0 %vm323_vm0, %v5527_v13  ;;  %v5586_v24 = vld [vmem:[%s5484_s25 + $0x128] sm:$0xff]  ;;  %v5592_v26 = vld [vmem:[%s5484_s25 + $0x138] sm:$0xff]  ;;  %v5606_v28 = vld [vmem:[%s5484_s25 + $0x140] sm:$0xff] }
  0x1a   : > { %4962 = vmatprep.mubr.msk.f32.mxu1 %vm323_vm0, %v5530_v14  ;;  %v5609_v29 = vld [vmem:[%s5484_s25 + $0x90] sm:$0xff]  ;;  %v5623_v31 = vld [vmem:[%s5484_s25 + $0x98] sm:$0xff]  ;;  %v5629_v33 = vld [vmem:[%s5484_s25 + $0xa8] sm:$0xff] }
  0x1b   : > { %v5612_v30 = vld [vmem:[%s5484_s25 + $0x150] sm:$0xff]  ;;  %v5626_v32 = vld [vmem:[%s5484_s25 + $0x158] sm:$0xff]  ;;  %v5632_v34 = vld [vmem:[%s5484_s25 + $0x168] sm:$0xff] }
  0x1c   : > { %4939 = vmatmul.mubr.msk.f32.gmra.mxu0 %vm323_vm0, %v5543_v15  ;;  %v5643_v35 = vld [vmem:[%s5484_s25 + $0xb0] sm:$0xff]  ;;  %v677_v37 = vld [vmem:[%s5484_s25 + $0x1] sm:$0xff]  ;;  %v5659_v41 = vld [vmem:[%s5484_s25 + $0x19] sm:$0xff] }
  0x1d   : > { %4963 = vmatmul.mubr.msk.f32.gmra.mxu1 %vm323_vm0, %v5546_v16  ;;  %4941 = vmatprep.mubr.msk.f32.mxu0 %vm323_vm0, %v5549_v17  ;;  %v5646_v36 = vld [vmem:[%s5484_s25 + $0x170] sm:$0xff]  ;;  %v1064_v38 = vld [vmem:[%s5484_s25 + $0x2] sm:$0xff]  ;;  %v5662_v42 = vld [vmem:[%s5484_s25 + $0x1a] sm:$0xff] }
  0x1e   : > { %4965 = vmatprep.mubr.msk.f32.mxu1 %vm323_vm0, %v5552_v18  ;;  %7183 = vst [vmem:[#allocation3_spill] sm:$0xff] %v5646_v36  ;;  %v678_v39 = vld [vmem:[%s5484_s25 + $0x9] sm:$0xff]  ;;  %7184 = vst [vmem:[#allocation4_spill] sm:$0xff] %v5662_v42  ;;  %v5679_v45 = vld [vmem:[%s5484_s25 + $0x21] sm:$0xff] }
  0x1f   : > { %v1065_v40 = vld [vmem:[%s5484_s25 + $0xa] sm:$0xff]  ;;  %v5682_v46 = vld [vmem:[%s5484_s25 + $0x22] sm:$0xff]  ;;  %v5692_v48 = vld [vmem:[%s5484_s25 + $0x32] sm:$0xff] }
  0x20   : > { %4942 = vmatmul.mubr.msk.f32.gmra.mxu0 %vm323_vm0, %v5563_v19  ;;  %7185 = vst [vmem:[#allocation5_spill] sm:$0xff] %v5682_v46  ;;  %v5689_v47 = vld [vmem:[%s5484_s25 + $0x31] sm:$0xff]  ;;  %7186 = vst [vmem:[#allocation6_spill] sm:$0xff] %v5692_v48  ;;  %v5705_v49 = vld [vmem:[%s5484_s25 + $0x39] sm:$0xff] }
  0x21   : > { %4966 = vmatmul.mubr.msk.f32.gmra.mxu1 %vm323_vm0, %v5566_v20  ;;  %4944 = vmatprep.mubr.msk.f32.mxu0 %vm323_vm0, %v5569_v21  ;;  %v5708_v50 = vld [vmem:[%s5484_s25 + $0x3a] sm:$0xff]  ;;  %v5711_v51 = vld [vmem:[%s5484_s25 + $0x49] sm:$0xff]  ;;  %v5725_v53 = vld [vmem:[%s5484_s25 + $0x51] sm:$0xff] }
  0x22   : > { %4968 = vmatprep.mubr.msk.f32.mxu1 %vm323_vm0, %v5572_v22  ;;  %7187 = vst [vmem:[#allocation7_spill] sm:$0xff] %v5708_v50  ;;  %v5714_v52 = vld [vmem:[%s5484_s25 + $0x4a] sm:$0xff]  ;;  %v5728_v54 = vld [vmem:[%s5484_s25 + $0x52] sm:$0xff]  ;;  %v5731_v55 = vld [vmem:[%s5484_s25 + $0x61] sm:$0xff] }
  0x23   : > { %7188 = vst [vmem:[#allocation8_spill] sm:$0xff] %v5714_v52  ;;  %7189 = vst [vmem:[#allocation9_spill] sm:$0xff] %v5728_v54  ;;  %v5734_v56 = vld [vmem:[%s5484_s25 + $0x62] sm:$0xff]  ;;  %v5748_v58 = vld [vmem:[%s5484_s25 + $0x6a] sm:$0xff] }
  0x24   : > { %4945 = vmatmul.mubr.msk.f32.gmra.mxu0 %vm323_vm0, %v5583_v23  ;;  %7190 = vst [vmem:[#allocation10_spill] sm:$0xff] %v5734_v56  ;;  %v5745_v57 = vld [vmem:[%s5484_s25 + $0x69] sm:$0xff]  ;;  %7191 = vst [vmem:[#allocation11_spill] sm:$0xff] %v5748_v58  ;;  %v5751_v59 = vld [vmem:[%s5484_s25 + $0x79] sm:$0xff] }
  0x25   : > { %4969 = vmatmul.mubr.msk.f32.gmra.mxu1 %vm323_vm0, %v5586_v24  ;;  %4947 = vmatprep.mubr.msk.f32.mxu0 %vm323_vm0, %v5589_v25  ;;  %v5754_v60 = vld [vmem:[%s5484_s25 + $0x7a] sm:$0xff]  ;;  %v5768_v62 = vld [vmem:[%s5484_s25 + $0x82] sm:$0xff]  ;;  %v5771_v63 = vld [vmem:[%s5484_s25 + $0x91] sm:$0xff] }
  0x26   : > { %4971 = vmatprep.mubr.msk.f32.mxu1 %vm323_vm0, %v5592_v26  ;;  %7192 = vst [vmem:[#allocation12_spill] sm:$0xff] %v5754_v60  ;;  %v5765_v61 = vld [vmem:[%s5484_s25 + $0x81] sm:$0xff]  ;;  %7193 = vst [vmem:[#allocation13_spill] sm:$0xff] %v5768_v62  ;;  %v5774_v0 = vld [vmem:[%s5484_s25 + $0x92] sm:$0xff] }
  0x27   : > { %7194 = vst [vmem:[#allocation14_spill] sm:$0xff] %v5774_v0  ;;  %v5785_v1 = vld [vmem:[%s5484_s25 + $0x99] sm:$0xff]  ;;  %v5791_v3 = vld [vmem:[%s5484_s25 + $0xa9] sm:$0xff] }
  0x28   : > { %4948 = vmatmul.mubr.msk.f32.gmra.mxu0 %vm323_vm0, %v5603_v27  ;;  %v5788_v2 = vld [vmem:[%s5484_s25 + $0x9a] sm:$0xff]  ;;  %v5794_v5 = vld [vmem:[%s5484_s25 + $0xaa] sm:$0xff] }
  0x29   : > { %4972 = vmatmul.mubr.msk.f32.gmra.mxu1 %vm323_vm0, %v5606_v28  ;;  %4950 = vmatprep.mubr.msk.f32.mxu0 %vm323_vm0, %v5609_v29  ;;  %7195 = vst [vmem:[#allocation15_spill] sm:$0xff] %v5788_v2  ;;  %7196 = vst [vmem:[#allocation16_spill] sm:$0xff] %v5794_v5 }
  0x2a   : > { %4974 = vmatprep.mubr.msk.f32.mxu1 %vm323_vm0, %v5612_v30 }
  0x2c   : > { %4951 = vmatmul.mubr.msk.f32.gmra.mxu0 %vm323_vm0, %v5623_v31 }
  0x2d   : > { %4975 = vmatmul.mubr.msk.f32.gmra.mxu1 %vm323_vm0, %v5626_v32  ;;  %4953 = vmatprep.mubr.msk.f32.mxu0 %vm323_vm0, %v5629_v33 }
  0x2e   : > { %4977 = vmatprep.mubr.msk.f32.mxu1 %vm323_vm0, %v5632_v34 }
  0x30   : > { %4954 = vmatmul.mubr.msk.f32.gmra.mxu0 %vm323_vm0, %v5643_v35 }
  0x31   : > { %4978 = vmatmul.mubr.msk.f32.gmra.mxu1 %vm323_vm0, %v5646_v36  ;;  %5032 = vmatprep.mubr.msk.f32.mxu0 %vm323_vm0, %v1064_v38  ;;  %v5814_v38 = vld [vmem:[%s5484_s25 + $0xc2] sm:$0xff]  ;;  %v5954_v36 = vld [vmem:[%s5484_s25 + $0x16a] sm:$0xff] }
  0x32   : > { %4982 = vmatprep.mubr.msk.f32.mxu1 %vm323_vm0, %v677_v37  ;;  %v5811_v37 = vld [vmem:[%s5484_s25 + $0xc1] sm:$0xff]  ;;  %7198 = vst [vmem:[#allocation18_spill] sm:$0xff] %v5814_v38  ;;  %7218 = vst [vmem:[#allocation38_spill] sm:$0xff] %v5954_v36 }
  0x34   : > { %5033 = vmatmul.mubr.msk.f32.vlgmr.msra.gmra.mxu0 %vm323_vm0, %v1065_v40  ;;  %v5828_v40 = vld [vmem:[%s5484_s25 + $0xca] sm:$0xff] }
  0x35   : > { %4983 = vmatmul.mubr.msk.f32.vlgmr.msra.gmra.mxu1 %vm323_vm0, %v678_v39  ;;  %5131 = vmatpush3.msra.mxu0 %v5514_v10  ;;  %v5808_v10 = vld [vmem:[%s5484_s25 + $0xb2] sm:$0xff]  ;;  %v5825_v39 = vld [vmem:[%s5484_s25 + $0xc9] sm:$0xff]  ;;  %7199 = vst [vmem:[#allocation19_spill] sm:$0xff] %v5828_v40 }
  0x36   : > { %5081 = vmatpush3.msra.mxu1 %v5509_v9  ;;  %4985 = vmatprep.mubr.msk.f32.mxu1 %vm323_vm0, %v5659_v41  ;;  %v5805_v9 = vld [vmem:[%s5484_s25 + $0xb1] sm:$0xff]  ;;  %7197 = vst [vmem:[#allocation17_spill] sm:$0xff] %v5808_v10 }
  0x37   : > { %5035 = vmatprep.mubr.msk.f32.mxu0 %vm323_vm0, %v5662_v42  ;;  %5180 = vmatprep.subr.mxu1 %v5669_v43  ;;  %v5951_v42 = vld [vmem:[%s5484_s25 + $0x169] sm:$0xff] }
  0x38   : > { %5230 = vmatprep.subr.mxu0 %v5674_v44  ;;  %5036 = vmatmul.mubr.msk.f32.gmra.mxu0 %vm323_vm0, %v5682_v46  ;;  %v5934_v46 = vld [vmem:[%s5484_s25 + $0x152] sm:$0xff] }
  0x39   : > { %4986 = vmatmul.mubr.msk.f32.gmra.mxu1 %vm323_vm0, %v5679_v45  ;;  %5038 = vmatprep.mubr.msk.f32.mxu0 %vm323_vm0, %v5692_v48  ;;  %v5931_v48 = vld [vmem:[%s5484_s25 + $0x151] sm:$0xff]  ;;  %7215 = vst [vmem:[#allocation35_spill] sm:$0xff] %v5934_v46 }
  0x3a   : > { %4988 = vmatprep.mubr.msk.f32.mxu1 %vm323_vm0, %v5689_v47  ;;  %7214 = vst [vmem:[#allocation34_spill] sm:$0xff] %v5931_v48 }
  0x3c   : > { %5039 = vmatmul.mubr.msk.f32.gmra.mxu0 %vm323_vm0, %v5708_v50  ;;  %v5914_v50 = vld [vmem:[%s5484_s25 + $0x13a] sm:$0xff] }
  0x3d   : > { %4989 = vmatmul.mubr.msk.f32.gmra.mxu1 %vm323_vm0, %v5705_v49  ;;  %5041 = vmatprep.mubr.msk.f32.mxu0 %vm323_vm0, %v5714_v52  ;;  %v5911_v52 = vld [vmem:[%s5484_s25 + $0x139] sm:$0xff]  ;;  %7211 = vst [vmem:[#allocation31_spill] sm:$0xff] %v5914_v50 }
  0x3e   : > { %4991 = vmatprep.mubr.msk.f32.mxu1 %vm323_vm0, %v5711_v51  ;;  %7210 = vst [vmem:[#allocation30_spill] sm:$0xff] %v5911_v52 }
  0x40   : > { %5042 = vmatmul.mubr.msk.f32.gmra.mxu0 %vm323_vm0, %v5728_v54  ;;  %v5894_v54 = vld [vmem:[%s5484_s25 + $0x122] sm:$0xff] }
  0x41   : > { %4992 = vmatmul.mubr.msk.f32.gmra.mxu1 %vm323_vm0, %v5725_v53  ;;  %5044 = vmatprep.mubr.msk.f32.mxu0 %vm323_vm0, %v5734_v56  ;;  %v5891_v56 = vld [vmem:[%s5484_s25 + $0x121] sm:$0xff]  ;;  %7207 = vst [vmem:[#allocation27_spill] sm:$0xff] %v5894_v54 }
  0x42   : > { %4994 = vmatprep.mubr.msk.f32.mxu1 %vm323_vm0, %v5731_v55  ;;  %7206 = vst [vmem:[#allocation26_spill] sm:$0xff] %v5891_v56 }
  0x44   : > { %5045 = vmatmul.mubr.msk.f32.gmra.mxu0 %vm323_vm0, %v5748_v58  ;;  %v5874_v58 = vld [vmem:[%s5484_s25 + $0x10a] sm:$0xff] }
  0x45   : > { %4995 = vmatmul.mubr.msk.f32.gmra.mxu1 %vm323_vm0, %v5745_v57  ;;  %5047 = vmatprep.mubr.msk.f32.mxu0 %vm323_vm0, %v5754_v60  ;;  %v5871_v60 = vld [vmem:[%s5484_s25 + $0x109] sm:$0xff]  ;;  %7204 = vst [vmem:[#allocation24_spill] sm:$0xff] %v5874_v58 }
  0x46   : > { %4997 = vmatprep.mubr.msk.f32.mxu1 %vm323_vm0, %v5751_v59 }
  0x48   : > { %5048 = vmatmul.mubr.msk.f32.gmra.mxu0 %vm323_vm0, %v5768_v62  ;;  %v5854_v62 = vld [vmem:[%s5484_s25 + $0xf2] sm:$0xff] }
  0x49   : > { %4998 = vmatmul.mubr.msk.f32.gmra.mxu1 %vm323_vm0, %v5765_v61  ;;  %5050 = vmatprep.mubr.msk.f32.mxu0 %vm323_vm0, %v5774_v0  ;;  %v5851_v0 = vld [vmem:[%s5484_s25 + $0xf1] sm:$0xff]  ;;  %7202 = vst [vmem:[#allocation22_spill] sm:$0xff] %v5854_v62 }
  0x4a   : > { %5000 = vmatprep.mubr.msk.f32.mxu1 %vm323_vm0, %v5771_v63 }
  0x4c   : > { %5051 = vmatmul.mubr.msk.f32.gmra.mxu0 %vm323_vm0, %v5788_v2  ;;  %v5834_v2 = vld [vmem:[%s5484_s25 + $0xda] sm:$0xff] }
  0x4d   : > { %5001 = vmatmul.mubr.msk.f32.gmra.mxu1 %vm323_vm0, %v5785_v1  ;;  %5053 = vmatprep.mubr.msk.f32.mxu0 %vm323_vm0, %v5794_v5  ;;  %v5831_v5 = vld [vmem:[%s5484_s25 + $0xd9] sm:$0xff]  ;;  %7200 = vst [vmem:[#allocation20_spill] sm:$0xff] %v5834_v2 }
  0x4e   : > { %5003 = vmatprep.mubr.msk.f32.mxu1 %vm323_vm0, %v5791_v3 }
  0x50   : > { %5054 = vmatmul.mubr.msk.f32.gmra.mxu0 %vm323_vm0, %v5808_v10  ;;  %v5848_v10 = vld [vmem:[%s5484_s25 + $0xe2] sm:$0xff] }
  0x51   : > { %5004 = vmatmul.mubr.msk.f32.gmra.mxu1 %vm323_vm0, %v5805_v9  ;;  %5056 = vmatprep.mubr.msk.f32.mxu0 %vm323_vm0, %v5814_v38  ;;  %v5845_v38 = vld [vmem:[%s5484_s25 + $0xe1] sm:$0xff]  ;;  %7201 = vst [vmem:[#allocation21_spill] sm:$0xff] %v5848_v10 }
  0x52   : > { %5006 = vmatprep.mubr.msk.f32.mxu1 %vm323_vm0, %v5811_v37 }
  0x54   : > { %5057 = vmatmul.mubr.msk.f32.gmra.mxu0 %vm323_vm0, %v5828_v40  ;;  %v5868_v40 = vld [vmem:[%s5484_s25 + $0xfa] sm:$0xff] }
  0x55   : > { %5007 = vmatmul.mubr.msk.f32.gmra.mxu1 %vm323_vm0, %v5825_v39  ;;  %5059 = vmatprep.mubr.msk.f32.mxu0 %vm323_vm0, %v5834_v2  ;;  %v5865_v2 = vld [vmem:[%s5484_s25 + $0xf9] sm:$0xff]  ;;  %7203 = vst [vmem:[#allocation23_spill] sm:$0xff] %v5868_v40 }
  0x56   : > { %5009 = vmatprep.mubr.msk.f32.mxu1 %vm323_vm0, %v5831_v5 }
  0x58   : > { %5060 = vmatmul.mubr.msk.f32.gmra.mxu0 %vm323_vm0, %v5848_v10  ;;  %v5888_v10 = vld [vmem:[%s5484_s25 + $0x112] sm:$0xff] }
  0x59   : > { %5010 = vmatmul.mubr.msk.f32.gmra.mxu1 %vm323_vm0, %v5845_v38  ;;  %5062 = vmatprep.mubr.msk.f32.mxu0 %vm323_vm0, %v5854_v62  ;;  %v5885_v62 = vld [vmem:[%s5484_s25 + $0x111] sm:$0xff]  ;;  %7205 = vst [vmem:[#allocation25_spill] sm:$0xff] %v5888_v10 }
  0x5a   : > { %5012 = vmatprep.mubr.msk.f32.mxu1 %vm323_vm0, %v5851_v0 }
  0x5c   : > { %5063 = vmatmul.mubr.msk.f32.gmra.mxu0 %vm323_vm0, %v5868_v40  ;;  %v5908_v40 = vld [vmem:[%s5484_s25 + $0x12a] sm:$0xff] }
  0x5d   : > { %5013 = vmatmul.mubr.msk.f32.gmra.mxu1 %vm323_vm0, %v5865_v2  ;;  %5065 = vmatprep.mubr.msk.f32.mxu0 %vm323_vm0, %v5874_v58  ;;  %v5905_v58 = vld [vmem:[%s5484_s25 + $0x129] sm:$0xff]  ;;  %7209 = vst [vmem:[#allocation29_spill] sm:$0xff] %v5908_v40 }
  0x5e   : > { %5015 = vmatprep.mubr.msk.f32.mxu1 %vm323_vm0, %v5871_v60  ;;  %7208 = vst [vmem:[#allocation28_spill] sm:$0xff] %v5905_v58 }
  0x60   : > { %5066 = vmatmul.mubr.msk.f32.gmra.mxu0 %vm323_vm0, %v5888_v10  ;;  %v5928_v10 = vld [vmem:[%s5484_s25 + $0x142] sm:$0xff] }
  0x61   : > { %5016 = vmatmul.mubr.msk.f32.gmra.mxu1 %vm323_vm0, %v5885_v62  ;;  %5068 = vmatprep.mubr.msk.f32.mxu0 %vm323_vm0, %v5894_v54  ;;  %v5925_v54 = vld [vmem:[%s5484_s25 + $0x141] sm:$0xff]  ;;  %7213 = vst [vmem:[#allocation33_spill] sm:$0xff] %v5928_v10 }
  0x62   : > { %5018 = vmatprep.mubr.msk.f32.mxu1 %vm323_vm0, %v5891_v56  ;;  %7212 = vst [vmem:[#allocation32_spill] sm:$0xff] %v5925_v54 }
  0x64   : > { %5069 = vmatmul.mubr.msk.f32.gmra.mxu0 %vm323_vm0, %v5908_v40  ;;  %v5948_v40 = vld [vmem:[%s5484_s25 + $0x15a] sm:$0xff] }
  0x65   : > { %5019 = vmatmul.mubr.msk.f32.gmra.mxu1 %vm323_vm0, %v5905_v58  ;;  %5071 = vmatprep.mubr.msk.f32.mxu0 %vm323_vm0, %v5914_v50  ;;  %v5945_v50 = vld [vmem:[%s5484_s25 + $0x159] sm:$0xff]  ;;  %7217 = vst [vmem:[#allocation37_spill] sm:$0xff] %v5948_v40 }
  0x66   : > { %5021 = vmatprep.mubr.msk.f32.mxu1 %vm323_vm0, %v5911_v52  ;;  %7216 = vst [vmem:[#allocation36_spill] sm:$0xff] %v5945_v50 }
  0x68   : > { %5072 = vmatmul.mubr.msk.f32.gmra.mxu0 %vm323_vm0, %v5928_v10  ;;  %v5968_v10 = vld [vmem:[%s5484_s25 + $0x172] sm:$0xff] }
  0x69   : > { %5022 = vmatmul.mubr.msk.f32.gmra.mxu1 %vm323_vm0, %v5925_v54  ;;  %5074 = vmatprep.mubr.msk.f32.mxu0 %vm323_vm0, %v5934_v46  ;;  %v5965_v46 = vld [vmem:[%s5484_s25 + $0x171] sm:$0xff]  ;;  %7219 = vst [vmem:[#allocation39_spill] sm:$0xff] %v5968_v10 }
  0x6a   : > { %5024 = vmatprep.mubr.msk.f32.mxu1 %vm323_vm0, %v5931_v48 }
  0x6c   : > { %5075 = vmatmul.mubr.msk.f32.gmra.mxu0 %vm323_vm0, %v5948_v40 }
  0x6d   : > { %5025 = vmatmul.mubr.msk.f32.gmra.mxu1 %vm323_vm0, %v5945_v50  ;;  %5077 = vmatprep.mubr.msk.f32.mxu0 %vm323_vm0, %v5954_v36  ;;  %v5985_v36 = vld [vmem:[%s7113_s1 + $0x38] sm:$0xff] }
  0x6e   : > { %5027 = vmatprep.mubr.msk.f32.mxu1 %vm323_vm0, %v5951_v42 }
  0x70   : > { %5078 = vmatmul.mubr.msk.f32.gmra.mxu0 %vm323_vm0, %v5968_v10  ;;  %v5990_v10 = vld [vmem:[%s7113_s1 + $0x40] sm:$0xff] }
  0x71   : > { %5028 = vmatmul.mubr.msk.f32.gmra.mxu1 %vm323_vm0, %v5965_v46  ;;  %5132 = vmatprep.mubr.msk.f32.mxu0 %vm323_vm0, %v5659_v41  ;;  %v7221_v41 = vld [vmem:[#allocation3_spill] sm:$0xff] }
  0x72   : > { %5082 = vmatprep.mubr.msk.f32.mxu1 %vm323_vm0, %v5498_v7  ;;  %v6105_v7 = vld [vmem:[%s5484_s25 + $0x180] sm:$0xff] }
  0x74   : > { %5133 = vmatmul.mubr.msk.f32.vlgmr.msra.gmra.mxu0 %vm323_vm0, %v5679_v45  ;;  %v7224_v45 = vld [vmem:[#allocation5_spill] sm:$0xff] }
  0x75   : > { %5083 = vmatmul.mubr.msk.f32.vlgmr.msra.gmra.mxu1 %vm323_vm0, %v5517_v11  ;;  %5231 = vmatpush3.msra.mxu0 %v5674_v44  ;;  %v6108_v11 = vld [vmem:[%s5484_s25 + $0x181] sm:$0xff]  ;;  %v6122_v44 = vld [vmem:[%s5484_s25 + $0x189] sm:$0xff] }
  0x76   : > { %5181 = vmatpush3.msra.mxu1 %v5669_v43  ;;  %5085 = vmatprep.mubr.msk.f32.mxu1 %vm323_vm0, %v5527_v13  ;;  %7220 = vst [vmem:[#allocation40_spill] sm:$0xff] %v6108_v11  ;;  %v6119_v43 = vld [vmem:[%s5484_s25 + $0x188] sm:$0xff]  ;;  %7222 = vst [vmem:[#allocation3_spill] sm:$0xff] %v6122_v44 }
  0x77   : > { %5135 = vmatprep.mubr.msk.f32.mxu0 %vm323_vm0, %v5689_v47  ;;  %5280 = vmatprep.subr.mxu1 %v5985_v36 }
  0x78   : > { %5330 = vmatprep.subr.mxu0 %v5990_v10  ;;  %5136 = vmatmul.mubr.msk.f32.gmra.mxu0 %vm323_vm0, %v5705_v49 }
  0x79   : > { %5086 = vmatmul.mubr.msk.f32.gmra.mxu1 %vm323_vm0, %v5543_v15  ;;  %5138 = vmatprep.mubr.msk.f32.mxu0 %vm323_vm0, %v5711_v51 }
  0x7a   : > { %5088 = vmatprep.mubr.msk.f32.mxu1 %vm323_vm0, %v5549_v17 }
  0x7c   : > { %5139 = vmatmul.mubr.msk.f32.gmra.mxu0 %vm323_vm0, %v5725_v53 }
  0x7d   : > { %5089 = vmatmul.mubr.msk.f32.gmra.mxu1 %vm323_vm0, %v5563_v19  ;;  %5141 = vmatprep.mubr.msk.f32.mxu0 %vm323_vm0, %v5731_v55 }
  0x7e   : > { %5091 = vmatprep.mubr.msk.f32.mxu1 %vm323_vm0, %v5569_v21 }
  0x80   : > { %5142 = vmatmul.mubr.msk.f32.gmra.mxu0 %vm323_vm0, %v5745_v57 }
  0x81   : > { %5092 = vmatmul.mubr.msk.f32.gmra.mxu1 %vm323_vm0, %v5583_v23  ;;  %5144 = vmatprep.mubr.msk.f32.mxu0 %vm323_vm0, %v5751_v59 }
  0x82   : > { %5094 = vmatprep.mubr.msk.f32.mxu1 %vm323_vm0, %v5589_v25 }
  0x84   : > { %5145 = vmatmul.mubr.msk.f32.gmra.mxu0 %vm323_vm0, %v5765_v61 }
  0x85   : > { %5095 = vmatmul.mubr.msk.f32.gmra.mxu1 %vm323_vm0, %v5603_v27  ;;  %5147 = vmatprep.mubr.msk.f32.mxu0 %vm323_vm0, %v5771_v63 }
  0x86   : > { %5097 = vmatprep.mubr.msk.f32.mxu1 %vm323_vm0, %v5609_v29 }
  0x88   : > { %5148 = vmatmul.mubr.msk.f32.gmra.mxu0 %vm323_vm0, %v5785_v1 }
  0x89   : > { %5098 = vmatmul.mubr.msk.f32.gmra.mxu1 %vm323_vm0, %v5623_v31  ;;  %5150 = vmatprep.mubr.msk.f32.mxu0 %vm323_vm0, %v5791_v3 }
  0x8a   : > { %5100 = vmatprep.mubr.msk.f32.mxu1 %vm323_vm0, %v5629_v33 }
  0x8c   : > { %5151 = vmatmul.mubr.msk.f32.gmra.mxu0 %vm323_vm0, %v5805_v9 }
  0x8d   : > { %5101 = vmatmul.mubr.msk.f32.gmra.mxu1 %vm323_vm0, %v5643_v35  ;;  %5153 = vmatprep.mubr.msk.f32.mxu0 %vm323_vm0, %v5811_v37 }
  0x8e   : > { %5103 = vmatprep.mubr.msk.f32.mxu1 %vm323_vm0, %v5488_v4 }
  0x90   : > { %5154 = vmatmul.mubr.msk.f32.gmra.mxu0 %vm323_vm0, %v5825_v39 }
  0x91   : > { %5104 = vmatmul.mubr.msk.f32.gmra.mxu1 %vm323_vm0, %v5495_v6  ;;  %5156 = vmatprep.mubr.msk.f32.mxu0 %vm323_vm0, %v5831_v5 }
  0x92   : > { %5106 = vmatprep.mubr.msk.f32.mxu1 %vm323_vm0, %v5501_v8 }
  0x94   : > { %5157 = vmatmul.mubr.msk.f32.gmra.mxu0 %vm323_vm0, %v5845_v38 }
  0x95   : > { %5107 = vmatmul.mubr.msk.f32.gmra.mxu1 %vm323_vm0, %v5520_v12  ;;  %5159 = vmatprep.mubr.msk.f32.mxu0 %vm323_vm0, %v5851_v0 }
  0x96   : > { %5109 = vmatprep.mubr.msk.f32.mxu1 %vm323_vm0, %v5530_v14 }
  0x98   : > { %5160 = vmatmul.mubr.msk.f32.gmra.mxu0 %vm323_vm0, %v5865_v2 }
  0x99   : > { %5110 = vmatmul.mubr.msk.f32.gmra.mxu1 %vm323_vm0, %v5546_v16  ;;  %5162 = vmatprep.mubr.msk.f32.mxu0 %vm323_vm0, %v5871_v60 }
  0x9a   : > { %5112 = vmatprep.mubr.msk.f32.mxu1 %vm323_vm0, %v5552_v18 }
  0x9c   : > { %5163 = vmatmul.mubr.msk.f32.gmra.mxu0 %vm323_vm0, %v5885_v62 }
  0x9d   : > { %5113 = vmatmul.mubr.msk.f32.gmra.mxu1 %vm323_vm0, %v5566_v20  ;;  %5165 = vmatprep.mubr.msk.f32.mxu0 %vm323_vm0, %v5891_v56 }
  0x9e   : > { %5115 = vmatprep.mubr.msk.f32.mxu1 %vm323_vm0, %v5572_v22 }
  0xa0   : > { %5166 = vmatmul.mubr.msk.f32.gmra.mxu0 %vm323_vm0, %v5905_v58 }
  0xa1   : > { %5116 = vmatmul.mubr.msk.f32.gmra.mxu1 %vm323_vm0, %v5586_v24  ;;  %5168 = vmatprep.mubr.msk.f32.mxu0 %vm323_vm0, %v5911_v52  ;;  %v7247_v52 = vld [vmem:[#allocation25_spill] sm:$0xff] }
  0xa2   : > { %5118 = vmatprep.mubr.msk.f32.mxu1 %vm323_vm0, %v5592_v26 }
  0xa4   : > { %5169 = vmatmul.mubr.msk.f32.gmra.mxu0 %vm323_vm0, %v5925_v54 }
  0xa5   : > { %5119 = vmatmul.mubr.msk.f32.gmra.mxu1 %vm323_vm0, %v5606_v28  ;;  %5171 = vmatprep.mubr.msk.f32.mxu0 %vm323_vm0, %v5931_v48 }
  0xa6   : > { %5121 = vmatprep.mubr.msk.f32.mxu1 %vm323_vm0, %v5612_v30 }
  0xa8   : > { %5172 = vmatmul.mubr.msk.f32.gmra.mxu0 %vm323_vm0, %v5945_v50 }
  0xa9   : > { %5122 = vmatmul.mubr.msk.f32.gmra.mxu1 %vm323_vm0, %v5626_v32  ;;  %5174 = vmatprep.mubr.msk.f32.mxu0 %vm323_vm0, %v5951_v42  ;;  %v7223_v42 = vld [vmem:[#allocation4_spill] sm:$0xff] }
  0xaa   : > { %5124 = vmatprep.mubr.msk.f32.mxu1 %vm323_vm0, %v5632_v34 }
  0xac   : > { %5175 = vmatmul.mubr.msk.f32.gmra.mxu0 %vm323_vm0, %v5965_v46  ;;  %v7225_v46 = vld [vmem:[#allocation6_spill] sm:$0xff] }
  0xad   : > { %5125 = vmatmul.mubr.msk.f32.gmra.mxu1 %vm323_vm0, %v7221_v41  ;;  %5177 = vmatprep.mubr.msk.f32.mxu0 %vm323_vm0, %v6108_v11  ;;  %v7243_v11 = vld [vmem:[#allocation23_spill] sm:$0xff] }
  0xae   : > { %5127 = vmatprep.mubr.msk.f32.mxu1 %vm323_vm0, %v6105_v7 }
  0xb0   : > { %5178 = vmatmul.mubr.msk.f32.gmra.mxu0 %vm323_vm0, %v6122_v44 }
  0xb1   : > { %5128 = vmatmul.mubr.msk.f32.gmra.mxu1 %vm323_vm0, %v6119_v43  ;;  %5232 = vmatprep.mubr.msk.f32.mxu0 %vm323_vm0, %v5527_v13  ;;  %v7227_v13 = vld [vmem:[#allocation8_spill] sm:$0xff] }
  0xb2   : > { %5182 = vmatprep.mubr.msk.f32.mxu1 %vm323_vm0, %v7223_v42  ;;  %v7226_v42 = vld [vmem:[#allocation7_spill] sm:$0xff] }
  0xb4   : > { %5233 = vmatmul.mubr.msk.f32.vlgmr.msra.gmra.mxu0 %vm323_vm0, %v5543_v15  ;;  %v7228_v15 = vld [vmem:[#allocation9_spill] sm:$0xff] }
  0xb5   : > { %5183 = vmatmul.mubr.msk.f32.vlgmr.msra.gmra.mxu1 %vm323_vm0, %v7224_v45  ;;  %5331 = vmatpush3.msra.mxu0 %v5990_v10  ;;  %v7240_v10 = vld [vmem:[#allocation21_spill] sm:$0xff] }
  0xb6   : > { %5281 = vmatpush3.msra.mxu1 %v5985_v36  ;;  %5185 = vmatprep.mubr.msk.f32.mxu1 %vm323_vm0, %v7225_v46  ;;  %v7229_v36 = vld [vmem:[#allocation10_spill] sm:$0xff] }
  0xb7   : > { %5235 = vmatprep.mubr.msk.f32.mxu0 %vm323_vm0, %v5549_v17  ;;  %v7230_v17 = vld [vmem:[#allocation11_spill] sm:$0xff] }
  0xb8   : > { %5236 = vmatmul.mubr.msk.f32.gmra.mxu0 %vm323_vm0, %v5563_v19  ;;  %v7231_v19 = vld [vmem:[#allocation12_spill] sm:$0xff] }
  0xb9   : > { %5186 = vmatmul.mubr.msk.f32.gmra.mxu1 %vm323_vm0, %v7226_v42  ;;  %5238 = vmatprep.mubr.msk.f32.mxu0 %vm323_vm0, %v5569_v21  ;;  %v7232_v21 = vld [vmem:[#allocation13_spill] sm:$0xff] }
  0xba   : > { %5188 = vmatprep.mubr.msk.f32.mxu1 %vm323_vm0, %v7227_v13 }
  0xbc   : > { %5239 = vmatmul.mubr.msk.f32.gmra.mxu0 %vm323_vm0, %v5583_v23  ;;  %v7233_v23 = vld [vmem:[#allocation14_spill] sm:$0xff] }
  0xbd   : > { %5189 = vmatmul.mubr.msk.f32.gmra.mxu1 %vm323_vm0, %v7228_v15  ;;  %5241 = vmatprep.mubr.msk.f32.mxu0 %vm323_vm0, %v5589_v25  ;;  %v7234_v25 = vld [vmem:[#allocation15_spill] sm:$0xff] }
  0xbe   : > { %5191 = vmatprep.mubr.msk.f32.mxu1 %vm323_vm0, %v7229_v36 }
  0xc0   : > { %5242 = vmatmul.mubr.msk.f32.gmra.mxu0 %vm323_vm0, %v5603_v27  ;;  %v7235_v27 = vld [vmem:[#allocation16_spill] sm:$0xff] }
  0xc1   : > { %5192 = vmatmul.mubr.msk.f32.gmra.mxu1 %vm323_vm0, %v7230_v17  ;;  %5244 = vmatprep.mubr.msk.f32.mxu0 %vm323_vm0, %v5609_v29  ;;  %v7236_v29 = vld [vmem:[#allocation17_spill] sm:$0xff] }
  0xc2   : > { %5194 = vmatprep.mubr.msk.f32.mxu1 %vm323_vm0, %v7231_v19 }
  0xc4   : > { %5245 = vmatmul.mubr.msk.f32.gmra.mxu0 %vm323_vm0, %v5623_v31  ;;  %v7237_v31 = vld [vmem:[#allocation18_spill] sm:$0xff] }
  0xc5   : > { %5195 = vmatmul.mubr.msk.f32.gmra.mxu1 %vm323_vm0, %v7232_v21  ;;  %5247 = vmatprep.mubr.msk.f32.mxu0 %vm323_vm0, %v5629_v33  ;;  %v7238_v33 = vld [vmem:[#allocation19_spill] sm:$0xff] }
  0xc6   : > { %5197 = vmatprep.mubr.msk.f32.mxu1 %vm323_vm0, %v7233_v23 }
  0xc8   : > { %5248 = vmatmul.mubr.msk.f32.gmra.mxu0 %vm323_vm0, %v5643_v35  ;;  %v7239_v35 = vld [vmem:[#allocation20_spill] sm:$0xff] }
  0xc9   : > { %5198 = vmatmul.mubr.msk.f32.gmra.mxu1 %vm323_vm0, %v7234_v25  ;;  %5250 = vmatprep.mubr.msk.f32.mxu0 %vm323_vm0, %v5488_v4 }
  0xca   : > { %5200 = vmatprep.mubr.msk.f32.mxu1 %vm323_vm0, %v7235_v27 }
  0xcc   : > { %5251 = vmatmul.mubr.msk.f32.gmra.mxu0 %vm323_vm0, %v5495_v6 }
  0xcd   : > { %5201 = vmatmul.mubr.msk.f32.gmra.mxu1 %vm323_vm0, %v7236_v29  ;;  %5253 = vmatprep.mubr.msk.f32.mxu0 %vm323_vm0, %v5501_v8  ;;  %v7241_v8 = vld [vmem:[#allocation22_spill] sm:$0xff] }
  0xce   : > { %5203 = vmatprep.mubr.msk.f32.mxu1 %vm323_vm0, %v7237_v31 }
  0xd0   : > { %5254 = vmatmul.mubr.msk.f32.gmra.mxu0 %vm323_vm0, %v5520_v12 }
  0xd1   : > { %5204 = vmatmul.mubr.msk.f32.gmra.mxu1 %vm323_vm0, %v7238_v33  ;;  %5256 = vmatprep.mubr.msk.f32.mxu0 %vm323_vm0, %v5530_v14 }
  0xd2   : > { %5206 = vmatprep.mubr.msk.f32.mxu1 %vm323_vm0, %v7239_v35 }
  0xd4   : > { %v6198_v4 = vpop.f32.mrf.mxu0  ;;  %5257 = vmatmul.mubr.msk.f32.gmra.mxu0 %vm323_vm0, %v5546_v16  ;;  %v7244_v16 = vld [vmem:[#allocation24_spill] sm:$0xff] }
  0xd5   : > { %v6200_v6 = vpop.f32.mrf.mxu1  ;;  %5207 = vmatmul.mubr.msk.f32.gmra.mxu1 %vm323_vm0, %v7240_v10  ;;  %5259 = vmatprep.mubr.msk.f32.mxu0 %vm323_vm0, %v5552_v18 }
  0xd6   : > { %5209 = vmatprep.mubr.msk.f32.mxu1 %vm323_vm0, %v7241_v8  ;;  %v6210_v12 = vpop.f32.mrf.mxu0 }
  0xd7   : > { %v6212_v45 = vpop.f32.mrf.mxu1 }
  0xd8   : > { %v6214_v14 = vpop.f32.mrf.mxu0  ;;  %5260 = vmatmul.mubr.msk.f32.gmra.mxu0 %vm323_vm0, %v5566_v20  ;;  %v7248_v20 = vld [vmem:[#allocation27_spill] sm:$0xff] }
  0xd9   : > { %v6216_v44 = vpop.f32.mrf.mxu1  ;;  %5210 = vmatmul.mubr.msk.f32.gmra.mxu1 %vm323_vm0, %v7243_v11  ;;  %5262 = vmatprep.mubr.msk.f32.mxu0 %vm323_vm0, %v5572_v22 }
  0xda   : > { %7242 = vst [vmem:[#allocation4_spill] sm:$0xff] %v6216_v44  ;;  %5212 = vmatprep.mubr.msk.f32.mxu1 %vm323_vm0, %v7244_v16  ;;  %v6226_v18 = vpop.f32.mrf.mxu0  ;;  %v7255_v44 = vld [vmem:[#allocation33_spill] sm:$0xff] }
  0xdb   : > { %v6228_v50 = vpop.f32.mrf.mxu1 }
  0xdc   : > { %7245 = vst [vmem:[#allocation5_spill] sm:$0xff] %v6228_v50  ;;  %v6230_v48 = vpop.f32.mrf.mxu0  ;;  %5263 = vmatmul.mubr.msk.f32.gmra.mxu0 %vm323_vm0, %v5586_v24  ;;  %v7252_v24 = vld [vmem:[#allocation31_spill] sm:$0xff] }
  0xdd   : > { %v6232_v54 = vpop.f32.mrf.mxu1  ;;  %5213 = vmatmul.mubr.msk.f32.gmra.mxu1 %vm323_vm0, %v7247_v52  ;;  %5265 = vmatprep.mubr.msk.f32.mxu0 %vm323_vm0, %v5592_v26 }
  0xde   : > { %7246 = vst [vmem:[#allocation6_spill] sm:$0xff] %v6232_v54  ;;  %5215 = vmatprep.mubr.msk.f32.mxu1 %vm323_vm0, %v7248_v20  ;;  %v6242_v22 = vpop.f32.mrf.mxu0  ;;  %v7251_v54 = vld [vmem:[#allocation29_spill] sm:$0xff] }
  0xdf   : > { %v6244_v58 = vpop.f32.mrf.mxu1 }
  0xe0   : > { %7249 = vst [vmem:[#allocation7_spill] sm:$0xff] %v6244_v58  ;;  %v6246_v50 = vpop.f32.mrf.mxu0  ;;  %5266 = vmatmul.mubr.msk.f32.gmra.mxu0 %vm323_vm0, %v5606_v28  ;;  %v7256_v28 = vld [vmem:[#allocation35_spill] sm:$0xff] }
  0xe1   : > { %v6248_v56 = vpop.f32.mrf.mxu1  ;;  %5216 = vmatmul.mubr.msk.f32.gmra.mxu1 %vm323_vm0, %v7251_v54  ;;  %5268 = vmatprep.mubr.msk.f32.mxu0 %vm323_vm0, %v5612_v30 }
  0xe2   : > { %7250 = vst [vmem:[#allocation8_spill] sm:$0xff] %v6248_v56  ;;  %5218 = vmatprep.mubr.msk.f32.mxu1 %vm323_vm0, %v7252_v24  ;;  %v6258_v26 = vpop.f32.mrf.mxu0 }
  0xe3   : > { %v6260_v20 = vpop.f32.mrf.mxu1 }
  0xe4   : > { %7253 = vst [vmem:[#allocation9_spill] sm:$0xff] %v6260_v20  ;;  %v6262_v58 = vpop.f32.mrf.mxu0  ;;  %5269 = vmatmul.mubr.msk.f32.gmra.mxu0 %vm323_vm0, %v5626_v32  ;;  %v7259_v32 = vld [vmem:[#allocation38_spill] sm:$0xff] }
  0xe5   : > { %v6264_v56 = vpop.f32.mrf.mxu1  ;;  %5219 = vmatmul.mubr.msk.f32.gmra.mxu1 %vm323_vm0, %v7255_v44  ;;  %5271 = vmatprep.mubr.msk.f32.mxu0 %vm323_vm0, %v5632_v34 }
  0xe6   : > { %7254 = vst [vmem:[#allocation10_spill] sm:$0xff] %v6264_v56  ;;  %5221 = vmatprep.mubr.msk.f32.mxu1 %vm323_vm0, %v7256_v28  ;;  %v6274_v30 = vpop.f32.mrf.mxu0  ;;  %v6295_v28 = vld [vmem:[%s5484_s25 + $0x182] sm:$0xff] }
  0xe7   : > { %v6276_v20 = vpop.f32.mrf.mxu1  ;;  %7261 = vst [vmem:[#allocation14_spill] sm:$0xff] %v6295_v28 }
  0xe8   : > { %7257 = vst [vmem:[#allocation11_spill] sm:$0xff] %v6276_v20  ;;  %v6278_v24 = vpop.f32.mrf.mxu0  ;;  %5272 = vmatmul.mubr.msk.f32.gmra.mxu0 %vm323_vm0, %v7221_v41  ;;  %v4466_v41 = vld [vmem:[%s5484_s25 + $0x1a0] sm:$0xff] }
  0xe9   : > { %v6280_v56 = vpop.f32.mrf.mxu1  ;;  %5222 = vmatmul.mubr.msk.f32.gmra.mxu1 %vm323_vm0, %v5948_v40  ;;  %5274 = vmatprep.mubr.msk.f32.mxu0 %vm323_vm0, %v6105_v7  ;;  %v7263_v40 = vld [vmem:[#allocation39_spill] sm:$0xff]  ;;  %v6310_v7 = vld [vmem:[%s5484_s25 + $0x18a] sm:$0xff] }
  0xea   : > { %7258 = vst [vmem:[#allocation12_spill] sm:$0xff] %v6280_v56  ;;  %5224 = vmatprep.mubr.msk.f32.mxu1 %vm323_vm0, %v7259_v32  ;;  %v6290_v34 = vpop.f32.mrf.mxu0  ;;  %v4465_v56 = vld [vmem:[%s5484_s25 + $0x198] sm:$0xff]  ;;  %7264 = vst [vmem:[#allocation16_spill] sm:$0xff] %v6310_v7 }
  0xeb   : > { %v6292_v20 = vpop.f32.mrf.mxu1 }
  0xec   : > { %7260 = vst [vmem:[#allocation13_spill] sm:$0xff] %v6292_v20  ;;  %v6298_v44 = vpop.f32.mrf.mxu0  ;;  %5275 = vmatmul.mubr.msk.f32.gmra.mxu0 %vm323_vm0, %v6119_v43 }
  0xed   : > { %v6300_v54 = vpop.f32.mrf.mxu1  ;;  %5225 = vmatmul.mubr.msk.f32.gmra.mxu1 %vm323_vm0, %v7263_v40  ;;  %5277 = vmatprep.mubr.msk.f32.mxu0 %vm323_vm0, %v4465_v56 }
  0xee   : > { %7262 = vst [vmem:[#allocation15_spill] sm:$0xff] %v6300_v54  ;;  %5227 = vmatprep.mubr.msk.f32.mxu1 %vm323_vm0, %v6295_v28  ;;  %v6313_v32 = vpop.f32.mrf.mxu0 }
  0xef   : > { %v6315_v20 = vpop.f32.mrf.mxu1 }
  0xf0   : > { %7265 = vst [vmem:[#allocation17_spill] sm:$0xff] %v6315_v20  ;;  %v6317_v52 = vpop.f32.mrf.mxu0  ;;  %5278 = vmatmul.mubr.msk.f32.gmra.mxu0 %vm323_vm0, %v4466_v41 }
  0xf1   : > { %v6319_v54 = vpop.f32.mrf.mxu1  ;;  %5228 = vmatmul.mubr.msk.f32.gmra.mxu1 %vm323_vm0, %v6310_v7  ;;  %5332 = vmatprep.mubr.msk.f32.mxu0 %vm323_vm0, %v7225_v46 }
  0xf2   : > { %7266 = vst [vmem:[#allocation18_spill] sm:$0xff] %v6319_v54  ;;  %5282 = vmatprep.mubr.msk.f32.mxu1 %vm323_vm0, %v5689_v47  ;;  %v6328_v56 = vpop.f32.mrf.mxu0 }
  0xf3   : > { %v6330_v40 = vpop.f32.mrf.mxu1 }
  0xf4   : > { %7267 = vst [vmem:[#allocation19_spill] sm:$0xff] %v6330_v40  ;;  %v5034_v20 = vpop.f32.mrf.mxu0  ;;  %5333 = vmatmul.mubr.msk.f32.vlgmr.msra.gmra.mxu0 %vm323_vm0, %v7226_v42 }
  0xf5   : > { %v4984_v43 = vpop.f32.mrf.mxu1  ;;  %5283 = vmatmul.mubr.msk.f32.vlgmr.msra.gmra.mxu1 %vm323_vm0, %v5705_v49  ;;  %5335 = vmatprep.mubr.msk.f32.mxu0 %vm323_vm0, %v7227_v13 }
  0xf6   : > { %v1033_v41 = vadd.f32 %v4984_v43, %v6198_v4  ;;  %5285 = vmatprep.mubr.msk.f32.mxu1 %vm323_vm0, %v5711_v51  ;;  %v1260_v46 = vpop.f32.mrf.mxu0 }
  0xf7   : > { %v873_v47 = vpop.f32.mrf.mxu1 }
  0xf8   : > { %v6341_v54 = vadd.f32 %v5034_v20, %v1033_v41  ;;  %v1032_v40 = vadd.f32 %v873_v47, %v6210_v12  ;;  %v5037_v28 = vpop.f32.mrf.mxu0  ;;  %5336 = vmatmul.mubr.msk.f32.gmra.mxu0 %vm323_vm0, %v7228_v15 }
  0xf9   : > { %v4987_v7 = vpop.f32.mrf.mxu1  ;;  %5286 = vmatmul.mubr.msk.f32.gmra.mxu1 %vm323_vm0, %v5725_v53  ;;  %5338 = vmatprep.mubr.msk.f32.mxu0 %vm323_vm0, %v7229_v36 }
  0xfa   : > { %v6348_v49 = vadd.f32 %v1260_v46, %v1032_v40  ;;  %v1035_v51 = vadd.f32 %v4987_v7, %v6214_v14  ;;  %5288 = vmatprep.mubr.msk.f32.mxu1 %vm323_vm0, %v5731_v55  ;;  %v1270_v13 = vpop.f32.mrf.mxu0 }
  0xfb   : > { %v883_v42 = vpop.f32.mrf.mxu1 }
  0xfc   : > { %v6355_v4 = vadd.f32 %v5037_v28, %v1035_v51  ;;  %v1034_v12 = vadd.f32 %v883_v42, %v6226_v18  ;;  %v5040_v20 = vpop.f32.mrf.mxu0  ;;  %5339 = vmatmul.mubr.msk.f32.gmra.mxu0 %vm323_vm0, %v7230_v17 }
  0xfd   : > { %v4990_v53 = vpop.f32.mrf.mxu1  ;;  %5289 = vmatmul.mubr.msk.f32.gmra.mxu1 %vm323_vm0, %v5745_v57  ;;  %5341 = vmatprep.mubr.msk.f32.mxu0 %vm323_vm0, %v7231_v19 }
  0xfe   : > { %v6362_v15 = vadd.f32 %v1270_v13, %v1034_v12  ;;  %v1037_v55 = vadd.f32 %v4990_v53, %v6230_v48  ;;  %5291 = vmatprep.mubr.msk.f32.mxu1 %vm323_vm0, %v5751_v59  ;;  %v1280_v14 = vpop.f32.mrf.mxu0 }
  0xff   : > { %v893_v36 = vpop.f32.mrf.mxu1 }
 0x100   : > { %v6369_v18 = vadd.f32 %v5040_v20, %v1037_v55  ;;  %v1036_v28 = vadd.f32 %v893_v36, %v6242_v22  ;;  %v5043_v7 = vpop.f32.mrf.mxu0  ;;  %5342 = vmatmul.mubr.msk.f32.gmra.mxu0 %vm323_vm0, %v7232_v21 }
 0x101   : > { %v4993_v57 = vpop.f32.mrf.mxu1  ;;  %5292 = vmatmul.mubr.msk.f32.gmra.mxu1 %vm323_vm0, %v5765_v61  ;;  %5344 = vmatprep.mubr.msk.f32.mxu0 %vm323_vm0, %v7233_v23 }
 0x102   : > { %v6376_v48 = vadd.f32 %v1280_v14, %v1036_v28  ;;  %v1039_v59 = vadd.f32 %v4993_v57, %v6246_v50  ;;  %5294 = vmatprep.mubr.msk.f32.mxu1 %vm323_vm0, %v5771_v63  ;;  %v1290_v19 = vpop.f32.mrf.mxu0  ;;  %v7270_v14 = vld [vmem:[#allocation26_spill] sm:$0xff] }
 0x103   : > { %v903_v17 = vpop.f32.mrf.mxu1 }
 0x104   : > { %v6383_v22 = vadd.f32 %v5043_v7, %v1039_v59  ;;  %v1038_v40 = vadd.f32 %v903_v17, %v6258_v26  ;;  %v5046_v43 = vpop.f32.mrf.mxu0  ;;  %5345 = vmatmul.mubr.msk.f32.gmra.mxu0 %vm323_vm0, %v7234_v25  ;;  %v7272_v7 = vld [vmem:[#allocation5_spill] sm:$0xff] }
 0x105   : > { %v4996_v61 = vpop.f32.mrf.mxu1  ;;  %5295 = vmatmul.mubr.msk.f32.gmra.mxu1 %vm323_vm0, %v5785_v1  ;;  %5347 = vmatprep.mubr.msk.f32.mxu0 %vm323_vm0, %v7235_v27 }
 0x106   : > { %v6390_v50 = vadd.f32 %v1290_v19, %v1038_v40  ;;  %v1041_v63 = vadd.f32 %v4996_v61, %v6262_v58  ;;  %5297 = vmatprep.mubr.msk.f32.mxu1 %vm323_vm0, %v5791_v3  ;;  %v1300_v23 = vpop.f32.mrf.mxu0  ;;  %v7273_v19 = vld [vmem:[#allocation28_spill] sm:$0xff]  ;;  %v7274_v40 = vld [vmem:[#allocation29_spill] sm:$0xff] }
 0x107   : > { %v913_v21 = vpop.f32.mrf.mxu1 }
 0x108   : > { %v6397_v26 = vadd.f32 %v5046_v43, %v1041_v63  ;;  %v1040_v41 = vadd.f32 %v913_v21, %v6274_v30  ;;  %v5049_v47 = vpop.f32.mrf.mxu0  ;;  %5348 = vmatmul.mubr.msk.f32.gmra.mxu0 %vm323_vm0, %v7236_v29  ;;  %v7275_v43 = vld [vmem:[#allocation6_spill] sm:$0xff] }
 0x109   : > { %v4999_v1 = vpop.f32.mrf.mxu1  ;;  %5298 = vmatmul.mubr.msk.f32.gmra.mxu1 %vm323_vm0, %v5805_v9  ;;  %5350 = vmatprep.mubr.msk.f32.mxu0 %vm323_vm0, %v7237_v31  ;;  %v7276_v21 = vld [vmem:[#allocation30_spill] sm:$0xff] }
 0x10a   : > { %v6404_v58 = vadd.f32 %v1300_v23, %v1040_v41  ;;  %v1043_v3 = vadd.f32 %v4999_v1, %v6278_v24  ;;  %5300 = vmatprep.mubr.msk.f32.mxu1 %vm323_vm0, %v5811_v37  ;;  %v1310_v27 = vpop.f32.mrf.mxu0  ;;  %v7277_v23 = vld [vmem:[#allocation31_spill] sm:$0xff] }
 0x10b   : > { %v923_v25 = vpop.f32.mrf.mxu1 }
 0x10c   : > { %v6411_v30 = vadd.f32 %v5049_v47, %v1043_v3  ;;  %v1042_v46 = vadd.f32 %v923_v25, %v6290_v34  ;;  %v5052_v51 = vpop.f32.mrf.mxu0  ;;  %5351 = vmatmul.mubr.msk.f32.gmra.mxu0 %vm323_vm0, %v7238_v33  ;;  %v7278_v3 = vld [vmem:[#allocation7_spill] sm:$0xff] }
 0x10d   : > { %v5002_v9 = vpop.f32.mrf.mxu1  ;;  %5301 = vmatmul.mubr.msk.f32.gmra.mxu1 %vm323_vm0, %v5825_v39  ;;  %5353 = vmatprep.mubr.msk.f32.mxu0 %vm323_vm0, %v7239_v35 }
 0x10e   : > { %v6418_v29 = vadd.f32 %v1310_v27, %v1042_v46  ;;  %v1045_v37 = vadd.f32 %v5002_v9, %v6298_v44  ;;  %5303 = vmatprep.mubr.msk.f32.mxu1 %vm323_vm0, %v5831_v5  ;;  %v1320_v24 = vpop.f32.mrf.mxu0  ;;  %v7279_v9 = vld [vmem:[#allocation32_spill] sm:$0xff] }
 0x10f   : > { %v933_v31 = vpop.f32.mrf.mxu1 }
 0x110   : > { %v6425_v34 = vadd.f32 %v5052_v51, %v1045_v37  ;;  %v1044_v42 = vadd.f32 %v933_v31, %v6313_v32  ;;  %v5055_v13 = vpop.f32.mrf.mxu0  ;;  %5354 = vmatmul.mubr.msk.f32.gmra.mxu0 %vm323_vm0, %v7240_v10  ;;  %v7280_v51 = vld [vmem:[#allocation33_spill] sm:$0xff]  ;;  %v7281_v31 = vld [vmem:[#allocation8_spill] sm:$0xff] }
 0x111   : > { %v5005_v39 = vpop.f32.mrf.mxu1  ;;  %5304 = vmatmul.mubr.msk.f32.gmra.mxu1 %vm323_vm0, %v5845_v38  ;;  %5356 = vmatprep.mubr.msk.f32.mxu0 %vm323_vm0, %v7241_v8 }
 0x112   : > { %v6432_v44 = vadd.f32 %v1320_v24, %v1044_v42  ;;  %v1047_v5 = vadd.f32 %v5005_v39, %v6317_v52  ;;  %5306 = vmatprep.mubr.msk.f32.mxu1 %vm323_vm0, %v5851_v0  ;;  %v1330_v35 = vpop.f32.mrf.mxu0  ;;  %v7282_v42 = vld [vmem:[#allocation34_spill] sm:$0xff]  ;;  %v7283_v39 = vld [vmem:[#allocation35_spill] sm:$0xff] }
 0x113   : > { %v943_v33 = vpop.f32.mrf.mxu1 }
 0x114   : > { %v6439_v32 = vadd.f32 %v5055_v13, %v1047_v5  ;;  %v1046_v12 = vadd.f32 %v943_v33, %v6328_v56  ;;  %v5058_v53 = vpop.f32.mrf.mxu0  ;;  %5357 = vmatmul.mubr.msk.f32.gmra.mxu0 %vm323_vm0, %v7243_v11  ;;  %v7268_v11 = vld [vmem:[#allocation25_spill] sm:$0xff] }
 0x115   : > { %v5008_v38 = vpop.f32.mrf.mxu1  ;;  %5307 = vmatmul.mubr.msk.f32.gmra.mxu1 %vm323_vm0, %v5865_v2  ;;  %5359 = vmatprep.mubr.msk.f32.mxu0 %vm323_vm0, %v7244_v16  ;;  %v7271_v16 = vld [vmem:[#allocation27_spill] sm:$0xff]  ;;  %v4526_v33 = vld [vmem:[%s5484_s25 + $0x169] sm:$0xff] }
 0x116   : > { %v6446_v52 = vadd.f32 %v1330_v35, %v1046_v12  ;;  %v1049_v0 = vadd.f32 %v5008_v38, %v6200_v6  ;;  %5309 = vmatprep.mubr.msk.f32.mxu1 %vm323_vm0, %v5871_v60  ;;  %v1340_v8 = vpop.f32.mrf.mxu0  ;;  %v7269_v60 = vld [vmem:[#allocation4_spill] sm:$0xff]  ;;  %v7284_v38 = vld [vmem:[#allocation9_spill] sm:$0xff] }
 0x117   : > { %v953_v10 = vpop.f32.mrf.mxu1  ;;  %v4591_v35 = vld [vmem:[%s5484_s25 + $0x16a] sm:$0xff] }
 0x118   : > { %v6453_v56 = vadd.f32 %v5058_v53, %v1049_v0  ;;  %v1048_v20 = vadd.f32 %v953_v10, %v6212_v45  ;;  %v5061_v55 = vpop.f32.mrf.mxu0  ;;  %5360 = vmatmul.mubr.msk.f32.gmra.mxu0 %vm323_vm0, %v7268_v11 }
 0x119   : > { %v5011_v2 = vpop.f32.mrf.mxu1  ;;  %5310 = vmatmul.mubr.msk.f32.gmra.mxu1 %vm323_vm0, %v5885_v62  ;;  %5362 = vmatprep.mubr.msk.f32.mxu0 %vm323_vm0, %v7271_v16 }
 0x11a   : > { %v6460_v6 = vadd.f32 %v1340_v8, %v1048_v20  ;;  %v1051_v36 = vadd.f32 %v5011_v2, %v7269_v60  ;;  %5312 = vmatprep.mubr.msk.f32.mxu1 %vm323_vm0, %v7270_v14  ;;  %v1350_v45 = vpop.f32.mrf.mxu0  ;;  %v7285_v8 = vld [vmem:[#allocation36_spill] sm:$0xff]  ;;  %v7286_v20 = vld [vmem:[#allocation37_spill] sm:$0xff] }
 0x11b   : > { %v963_v28 = vpop.f32.mrf.mxu1  ;;  %v4527_v60 = vld [vmem:[%s5484_s25 + $0x171] sm:$0xff] }
 0x11c   : > { %v6467_v57 = vadd.f32 %v5061_v55, %v1051_v36  ;;  %v1050_v59 = vadd.f32 %v963_v28, %v7272_v7  ;;  %v5064_v17 = vpop.f32.mrf.mxu0  ;;  %5363 = vmatmul.mubr.msk.f32.gmra.mxu0 %vm323_vm0, %v7274_v40  ;;  %v7287_v55 = vld [vmem:[#allocation10_spill] sm:$0xff] }
 0x11d   : > { %v5014_v62 = vpop.f32.mrf.mxu1  ;;  %5313 = vmatmul.mubr.msk.f32.gmra.mxu1 %vm323_vm0, %v7273_v19  ;;  %5365 = vmatprep.mubr.msk.f32.mxu0 %vm323_vm0, %v7277_v23  ;;  %v4592_v36 = vld [vmem:[%s5484_s25 + $0x172] sm:$0xff]  ;;  %v7289_v19 = vld [vmem:[#allocation12_spill] sm:$0xff] }
 0x11e   : > { %v6474_v61 = vadd.f32 %v1350_v45, %v1050_v59  ;;  %v1053_v63 = vadd.f32 %v5014_v62, %v7275_v43  ;;  %5315 = vmatprep.mubr.msk.f32.mxu1 %vm323_vm0, %v7276_v21  ;;  %v1360_v1 = vpop.f32.mrf.mxu0  ;;  %v7288_v45 = vld [vmem:[#allocation11_spill] sm:$0xff]  ;;  %v7290_v43 = vld [vmem:[#allocation40_spill] sm:$0xff] }
 0x11f   : > { %v973_v41 = vpop.f32.mrf.mxu1 }
 0x120   : > { %v6481_v47 = vadd.f32 %v5064_v17, %v1053_v63  ;;  %v1052_v25 = vadd.f32 %v973_v41, %v7278_v3  ;;  %v5067_v46 = vpop.f32.mrf.mxu0  ;;  %5366 = vmatmul.mubr.msk.f32.gmra.mxu0 %vm323_vm0, %v7280_v51  ;;  %v7291_v63 = vld [vmem:[#allocation14_spill] sm:$0xff]  ;;  %v7293_v51 = vld [vmem:[#allocation3_spill] sm:$0xff] }
 0x121   : > { %v5017_v27 = vpop.f32.mrf.mxu1  ;;  %5316 = vmatmul.mubr.msk.f32.gmra.mxu1 %vm323_vm0, %v7279_v9  ;;  %5368 = vmatprep.mubr.msk.f32.mxu0 %vm323_vm0, %v7283_v39  ;;  %v4530_v41 = vld [vmem:[%s5484_s25 + $0x199] sm:$0xff] }
 0x122   : > { %v6488_v37 = vadd.f32 %v1360_v1, %v1052_v25  ;;  %v1055_v24 = vadd.f32 %v5017_v27, %v7281_v31  ;;  %5318 = vmatprep.mubr.msk.f32.mxu1 %vm323_vm0, %v7282_v42  ;;  %v1370_v5 = vpop.f32.mrf.mxu0  ;;  %v4595_v1 = vld [vmem:[%s5484_s25 + $0x19a] sm:$0xff]  ;;  %v7292_v25 = vld [vmem:[#allocation13_spill] sm:$0xff]  ;;  %v7294_v31 = vld [vmem:[#allocation16_spill] sm:$0xff] }
 0x123   : > { %v983_v13 = vpop.f32.mrf.mxu1  ;;  %v7295_v42 = vld [vmem:[#allocation15_spill] sm:$0xff] }
 0x124   : > { %v6497_v12 = vadd.f32 %v5067_v46, %v1055_v24  ;;  %v1054_v53 = vadd.f32 %v983_v13, %v7284_v38  ;;  %v5070_v10 = vpop.f32.mrf.mxu0  ;;  %5369 = vmatmul.mubr.msk.f32.gmra.mxu0 %vm323_vm0, %v7286_v20  ;;  %v4531_v13 = vld [vmem:[%s5484_s25 + $0x1a1] sm:$0xff] }
 0x125   : > { %v5020_v0 = vpop.f32.mrf.mxu1  ;;  %5319 = vmatmul.mubr.msk.f32.gmra.mxu1 %vm323_vm0, %v7285_v8  ;;  %5371 = vmatprep.mubr.msk.f32.mxu0 %vm323_vm0, %v4591_v35 }
 0x126   : > { %v6504_v2 = vadd.f32 %v1370_v5, %v1054_v53  ;;  %v1057_v11 = vadd.f32 %v5020_v0, %v7287_v55  ;;  %5321 = vmatprep.mubr.msk.f32.mxu1 %vm323_vm0, %v4526_v33  ;;  %v1380_v16 = vpop.f32.mrf.mxu0  ;;  %v4596_v5 = vld [vmem:[%s5484_s25 + $0x1a2] sm:$0xff]  ;;  %v7296_v53 = vld [vmem:[#allocation17_spill] sm:$0xff]  ;;  %v7297_v55 = vld [vmem:[#allocation18_spill] sm:$0xff] }
 0x127   : > { %v993_v14 = vpop.f32.mrf.mxu1 }
 0x128   : > { %v6511_v28 = vadd.f32 %v5070_v10, %v1057_v11  ;;  %v1056_v7 = vadd.f32 %v993_v14, %v7288_v45  ;;  %v5073_v62 = vpop.f32.mrf.mxu0  ;;  %5372 = vmatmul.mubr.msk.f32.gmra.mxu0 %vm323_vm0, %v4592_v36 }
 0x129   : > { %v5023_v59 = vpop.f32.mrf.mxu1  ;;  %5322 = vmatmul.mubr.msk.f32.gmra.mxu1 %vm323_vm0, %v4527_v60  ;;  %5374 = vmatprep.mubr.msk.f32.mxu0 %vm323_vm0, %v7291_v63 }
 0x12a   : > { %v6516_v17 = vadd.f32 %v1380_v16, %v1056_v7  ;;  %v1059_v40 = vadd.f32 %v5023_v59, %v7289_v19  ;;  %5324 = vmatprep.mubr.msk.f32.mxu1 %vm323_vm0, %v7290_v43  ;;  %v1390_v23 = vpop.f32.mrf.mxu0  ;;  %v7298_v16 = vld [vmem:[#allocation19_spill] sm:$0xff] }
 0x12b   : > { %v1003_v21 = vpop.f32.mrf.mxu1 }
 0x12c   : > { %v6525_v3 = vadd.f32 %v5073_v62, %v1059_v40  ;;  %v1058_v27 = vadd.f32 %v1003_v21, %v7292_v25  ;;  %v5076_v9 = vpop.f32.mrf.mxu0  ;;  %5375 = vmatmul.mubr.msk.f32.gmra.mxu0 %vm323_vm0, %v7294_v31 }
 0x12d   : > { %v5026_v46 = vpop.f32.mrf.mxu1  ;;  %5325 = vmatmul.mubr.msk.f32.gmra.mxu1 %vm323_vm0, %v7293_v51  ;;  %5377 = vmatprep.mubr.msk.f32.mxu0 %vm323_vm0, %v4595_v1 }
 0x12e   : > { %v6532_v24 = vadd.f32 %v1390_v23, %v1058_v27  ;;  %v1061_v39 = vadd.f32 %v5026_v46, %v7295_v42  ;;  %5327 = vmatprep.mubr.msk.f32.mxu1 %vm323_vm0, %v4530_v41  ;;  %v1400_v35 = vpop.f32.mrf.mxu0 }
 0x12f   : > { %v1013_v33 = vpop.f32.mrf.mxu1 }
 0x130   : > { %v6539_v38 = vadd.f32 %v5076_v9, %v1061_v39  ;;  %v1060_v0 = vadd.f32 %v1013_v33, %v7296_v53  ;;  %v5079_v8 = vpop.f32.mrf.mxu0  ;;  %5378 = vmatmul.mubr.msk.f32.gmra.mxu0 %vm323_vm0, %v4596_v5 }
 0x131   : > { %v5029_v10 = vpop.f32.mrf.mxu1  ;;  %5328 = vmatmul.mubr.msk.f32.gmra.mxu1 %vm323_vm0, %v4531_v13 }
 0x132   : > { %v6544_v20 = vadd.f32 %v1400_v35, %v1060_v0  ;;  %v1063_v11 = vadd.f32 %v5029_v10, %v7297_v55  ;;  %v1410_v36 = vpop.f32.mrf.mxu0 }
 0x133   : > { %v1023_v60 = vpop.f32.mrf.mxu1 }
 0x134   : > { %v6547_v14 = vadd.f32 %v5079_v8, %v1063_v11  ;;  %v1062_v45 = vadd.f32 %v1023_v60, %v7298_v16  ;;  %v5134_v59 = vpop.f32.mrf.mxu0 }
 0x135   : > { %v5084_v7 = vpop.f32.mrf.mxu1 }
 0x136   : > { %v6550_v62 = vadd.f32 %v1410_v36, %v1062_v45  ;;  %v1808_v19 = vadd.f32 %v5084_v7, %v6341_v54  ;;  %v2035_v43 = vpop.f32.mrf.mxu0 }
 0x137   : > { %v1648_v40 = vpop.f32.mrf.mxu1 }
 0x138   : > { %v6553_v63 = vadd.f32 %v5134_v59, %v1808_v19  ;;  %v1807_v21 = vadd.f32 %v1648_v40, %v6348_v49  ;;  %v5137_v41 = vpop.f32.mrf.mxu0 }
 0x139   : > { %v5087_v23 = vpop.f32.mrf.mxu1 }
 0x13a   : > { %v6556_v1 = vadd.f32 %v2035_v43, %v1807_v21  ;;  %v1810_v25 = vadd.f32 %v5087_v23, %v6355_v4  ;;  %v2045_v46 = vpop.f32.mrf.mxu0 }
 0x13b   : > { %v1658_v27 = vpop.f32.mrf.mxu1 }
 0x13c   : > { %v6559_v9 = vadd.f32 %v5137_v41, %v1810_v25  ;;  %v1809_v51 = vadd.f32 %v1658_v27, %v6362_v15  ;;  %v5140_v54 = vpop.f32.mrf.mxu0 }
 0x13d   : > { %v5090_v31 = vpop.f32.mrf.mxu1 }
 0x13e   : > { %v6562_v42 = vadd.f32 %v2045_v46, %v1809_v51  ;;  %v1812_v39 = vadd.f32 %v5090_v31, %v6369_v18  ;;  %v2055_v49 = vpop.f32.mrf.mxu0 }
 0x13f   : > { %v1668_v13 = vpop.f32.mrf.mxu1 }
 0x140   : > { %v6565_v5 = vadd.f32 %v5140_v54, %v1812_v39  ;;  %v1811_v33 = vadd.f32 %v1668_v13, %v6376_v48  ;;  %v5143_v4 = vpop.f32.mrf.mxu0 }
 0x141   : > { %v5093_v35 = vpop.f32.mrf.mxu1 }
 0x142   : > { %v6568_v53 = vadd.f32 %v2055_v49, %v1811_v33  ;;  %v1814_v0 = vadd.f32 %v5093_v35, %v6383_v22  ;;  %v2065_v15 = vpop.f32.mrf.mxu0 }
 0x143   : > { %v1678_v10 = vpop.f32.mrf.mxu1 }
 0x144   : > { %v6571_v8 = vadd.f32 %v5143_v4, %v1814_v0  ;;  %v1813_v55 = vadd.f32 %v1678_v10, %v6390_v50  ;;  %v5146_v18 = vpop.f32.mrf.mxu0 }
 0x145   : > { %v5096_v11 = vpop.f32.mrf.mxu1 }
 0x146   : > { %v6574_v60 = vadd.f32 %v2065_v15, %v1813_v55  ;;  %v1816_v36 = vadd.f32 %v5096_v11, %v6397_v26  ;;  %v2075_v48 = vpop.f32.mrf.mxu0 }
 0x147   : > { %v1688_v16 = vpop.f32.mrf.mxu1 }
 0x148   : > { %v6577_v45 = vadd.f32 %v5146_v18, %v1816_v36  ;;  %v1815_v7 = vadd.f32 %v1688_v16, %v6404_v58  ;;  %v5149_v22 = vpop.f32.mrf.mxu0 }
 0x149   : > { %v5099_v59 = vpop.f32.mrf.mxu1 }
 0x14a   : > { %v6580_v19 = vadd.f32 %v2075_v48, %v1815_v7  ;;  %v1818_v40 = vadd.f32 %v5099_v59, %v6411_v30  ;;  %v2085_v50 = vpop.f32.mrf.mxu0 }
 0x14b   : > { %v1698_v43 = vpop.f32.mrf.mxu1 }
 0x14c   : > { %v6583_v21 = vadd.f32 %v5149_v22, %v1818_v40  ;;  %v1817_v23 = vadd.f32 %v1698_v43, %v6418_v29  ;;  %v5152_v26 = vpop.f32.mrf.mxu0 }
 0x14d   : > { %v5102_v41 = vpop.f32.mrf.mxu1 }
 0x14e   : > { %v6586_v25 = vadd.f32 %v2085_v50, %v1817_v23  ;;  %v1820_v27 = vadd.f32 %v5102_v41, %v6425_v34  ;;  %v2095_v58 = vpop.f32.mrf.mxu0 }
 0x14f   : > { %v1708_v46 = vpop.f32.mrf.mxu1 }
 0x150   : > { %v6589_v51 = vadd.f32 %v5152_v26, %v1820_v27  ;;  %v1819_v31 = vadd.f32 %v1708_v46, %v6432_v44  ;;  %v5155_v30 = vpop.f32.mrf.mxu0 }
 0x151   : > { %v5105_v54 = vpop.f32.mrf.mxu1 }
 0x152   : > { %v6592_v39 = vadd.f32 %v2095_v58, %v1819_v31  ;;  %v1822_v13 = vadd.f32 %v5105_v54, %v6439_v32  ;;  %v2105_v29 = vpop.f32.mrf.mxu0 }
 0x153   : > { %v1718_v49 = vpop.f32.mrf.mxu1 }
 0x154   : > { %v6595_v33 = vadd.f32 %v5155_v30, %v1822_v13  ;;  %v1821_v35 = vadd.f32 %v1718_v49, %v6446_v52  ;;  %v5158_v34 = vpop.f32.mrf.mxu0 }
 0x155   : > { %v5108_v4 = vpop.f32.mrf.mxu1 }
 0x156   : > { %v6598_v0 = vadd.f32 %v2105_v29, %v1821_v35  ;;  %v1824_v10 = vadd.f32 %v5108_v4, %v6453_v56  ;;  %v2115_v44 = vpop.f32.mrf.mxu0 }
 0x157   : > { %v1728_v15 = vpop.f32.mrf.mxu1 }
 0x158   : > { %v6601_v55 = vadd.f32 %v5158_v34, %v1824_v10  ;;  %v1823_v11 = vadd.f32 %v1728_v15, %v6460_v6  ;;  %v5161_v32 = vpop.f32.mrf.mxu0 }
 0x159   : > { %v5111_v18 = vpop.f32.mrf.mxu1 }
 0x15a   : > { %v6604_v36 = vadd.f32 %v2115_v44, %v1823_v11  ;;  %v1826_v16 = vadd.f32 %v5111_v18, %v6467_v57  ;;  %v2125_v52 = vpop.f32.mrf.mxu0 }
 0x15b   : > { %v1738_v48 = vpop.f32.mrf.mxu1 }
 0x15c   : > { %v6607_v7 = vadd.f32 %v5161_v32, %v1826_v16  ;;  %v1825_v59 = vadd.f32 %v1738_v48, %v6474_v61  ;;  %v5164_v56 = vpop.f32.mrf.mxu0 }
 0x15d   : > { %v5114_v22 = vpop.f32.mrf.mxu1 }
 0x15e   : > { %7299 = vst [vmem:[#allocation20_spill] sm:$0xff] %v6607_v7  ;;  %v6610_v40 = vadd.f32 %v2125_v52, %v1825_v59  ;;  %v1828_v43 = vadd.f32 %v5114_v22, %v6481_v47  ;;  %v2135_v6 = vpop.f32.mrf.mxu0 }
 0x15f   : > { %v1748_v50 = vpop.f32.mrf.mxu1 }
 0x160   : > { %7300 = vst [vmem:[#allocation21_spill] sm:$0xff] %v6610_v40  ;;  %v6613_v23 = vadd.f32 %v5164_v56, %v1828_v43  ;;  %v1827_v41 = vadd.f32 %v1748_v50, %v6488_v37  ;;  %v5167_v57 = vpop.f32.mrf.mxu0 }
 0x161   : > { %v5117_v26 = vpop.f32.mrf.mxu1 }
 0x162   : > { %7301 = vst [vmem:[#allocation22_spill] sm:$0xff] %v6613_v23  ;;  %v6616_v27 = vadd.f32 %v2135_v6, %v1827_v41  ;;  %v1830_v46 = vadd.f32 %v5117_v26, %v6497_v12  ;;  %v2145_v61 = vpop.f32.mrf.mxu0 }
 0x163   : > { %v1758_v58 = vpop.f32.mrf.mxu1 }
 0x164   : > { %7302 = vst [vmem:[#allocation23_spill] sm:$0xff] %v6616_v27  ;;  %v6619_v31 = vadd.f32 %v5167_v57, %v1830_v46  ;;  %v1829_v54 = vadd.f32 %v1758_v58, %v6504_v2  ;;  %v5170_v47 = vpop.f32.mrf.mxu0 }
 0x165   : > { %v5120_v30 = vpop.f32.mrf.mxu1 }
 0x166   : > { %7303 = vst [vmem:[#allocation24_spill] sm:$0xff] %v6619_v31  ;;  %v6622_v13 = vadd.f32 %v2145_v61, %v1829_v54  ;;  %v1832_v49 = vadd.f32 %v5120_v30, %v6511_v28  ;;  %v2155_v37 = vpop.f32.mrf.mxu0 }
 0x167   : > { %v1768_v29 = vpop.f32.mrf.mxu1 }
 0x168   : > { %7304 = vst [vmem:[#allocation38_spill] sm:$0xff] %v6622_v13  ;;  %v6625_v35 = vadd.f32 %v5170_v47, %v1832_v49  ;;  %v1831_v4 = vadd.f32 %v1768_v29, %v6516_v17  ;;  %v5173_v12 = vpop.f32.mrf.mxu0 }
 0x169   : > { %v5123_v34 = vpop.f32.mrf.mxu1 }
 0x16a   : > { %7305 = vst [vmem:[#allocation39_spill] sm:$0xff] %v6625_v35  ;;  %v6628_v10 = vadd.f32 %v2155_v37, %v1831_v4  ;;  %v1834_v15 = vadd.f32 %v5123_v34, %v6525_v3  ;;  %v2165_v2 = vpop.f32.mrf.mxu0 }
 0x16b   : > { %v1778_v44 = vpop.f32.mrf.mxu1 }
 0x16c   : > { %7306 = vst [vmem:[#allocation25_spill] sm:$0xff] %v6628_v10  ;;  %v6631_v11 = vadd.f32 %v5173_v12, %v1834_v15  ;;  %v1833_v18 = vadd.f32 %v1778_v44, %v6532_v24  ;;  %v5176_v28 = vpop.f32.mrf.mxu0 }
 0x16d   : > { %v5126_v32 = vpop.f32.mrf.mxu1 }
 0x16e   : > { %7307 = vst [vmem:[#allocation4_spill] sm:$0xff] %v6631_v11  ;;  %v6634_v16 = vadd.f32 %v2165_v2, %v1833_v18  ;;  %v1836_v48 = vadd.f32 %v5126_v32, %v6539_v38  ;;  %v2175_v17 = vpop.f32.mrf.mxu0 }
 0x16f   : > { %v1788_v52 = vpop.f32.mrf.mxu1 }
 0x170   : > { %7308 = vst [vmem:[#allocation26_spill] sm:$0xff] %v6634_v16  ;;  %v6637_v59 = vadd.f32 %v5176_v28, %v1836_v48  ;;  %v1835_v22 = vadd.f32 %v1788_v52, %v6544_v20  ;;  %v5179_v3 = vpop.f32.mrf.mxu0 }
 0x171   : > { %v5129_v56 = vpop.f32.mrf.mxu1 }
 0x172   : > { %7309 = vst [vmem:[#allocation27_spill] sm:$0xff] %v6637_v59  ;;  %v6640_v43 = vadd.f32 %v2175_v17, %v1835_v22  ;;  %v1838_v50 = vadd.f32 %v5129_v56, %v6547_v14  ;;  %v2185_v24 = vpop.f32.mrf.mxu0 }
 0x173   : > { %v1798_v6 = vpop.f32.mrf.mxu1 }
 0x174   : > { %7310 = vst [vmem:[#allocation5_spill] sm:$0xff] %v6640_v43  ;;  %v6643_v41 = vadd.f32 %v5179_v3, %v1838_v50  ;;  %v1837_v26 = vadd.f32 %v1798_v6, %v6550_v62  ;;  %v6646_v38 = vpop.f32.mrf.mxu0 }
 0x175   : > { %v5184_v57 = vpop.f32.mrf.mxu1 }
 0x176   : > { %7311 = vst [vmem:[#allocation28_spill] sm:$0xff] %v6643_v41  ;;  %v6648_v46 = vadd.f32 %v2185_v24, %v1837_v26  ;;  %v6650_v61 = vpop.f32.mrf.mxu0 }
 0x177   : > { %v2422_v58 = vpop.f32.mrf.mxu1 }
 0x178   : > { %7312 = vst [vmem:[#allocation29_spill] sm:$0xff] %v6648_v46  ;;  %v6654_v54 = vpop.f32.mrf.mxu0 }
 0x179   : > { %v6652_v20 = vpop.f32.mrf.mxu1 }
 0x17a   : > { %v6658_v14 = vpop.f32.mrf.mxu0 }
 0x17b   : > { %v6656_v30 = vpop.f32.mrf.mxu1 }
 0x17c   : > { %v6662_v49 = vpop.f32.mrf.mxu0 }
 0x17d   : > { %v6660_v47 = vpop.f32.mrf.mxu1 }
 0x17e   : > { %v6666_v29 = vpop.f32.mrf.mxu0 }
 0x17f   : > { %v6664_v62 = vpop.f32.mrf.mxu1 }
 0x180   : > { %v6670_v4 = vpop.f32.mrf.mxu0 }
 0x181   : > { %v6668_v37 = vpop.f32.mrf.mxu1 }
 0x182   : > { %v6674_v12 = vpop.f32.mrf.mxu0 }
 0x183   : > { %v6672_v34 = vpop.f32.mrf.mxu1 }
 0x184   : > { %v6678_v44 = vpop.f32.mrf.mxu0 }
 0x185   : > { %v6676_v15 = vpop.f32.mrf.mxu1 }
 0x186   : > { %v6682_v18 = vpop.f32.mrf.mxu0 }
 0x187   : > { %v6680_v2 = vpop.f32.mrf.mxu1 }
 0x188   : > { %v6686_v28 = vpop.f32.mrf.mxu0 }
 0x189   : > { %v6684_v32 = vpop.f32.mrf.mxu1 }
 0x18a   : > { %v6690_v52 = vpop.f32.mrf.mxu0 }
 0x18b   : > { %v6688_v48 = vpop.f32.mrf.mxu1 }
 0x18c   : > { %v6694_v22 = vpop.f32.mrf.mxu0 }
 0x18d   : > { %v6692_v17 = vpop.f32.mrf.mxu1 }
 0x18e   : > { %v6698_v3 = vpop.f32.mrf.mxu0 }
 0x18f   : > { %v6696_v56 = vpop.f32.mrf.mxu1 }
 0x190   : > { %v6702_v6 = vpop.f32.mrf.mxu0 }
 0x191   : > { %v6700_v50 = vpop.f32.mrf.mxu1 }
 0x192   : > { %v6706_v26 = vpop.f32.mrf.mxu0 }
 0x193   : > { %v6704_v24 = vpop.f32.mrf.mxu1 }
 0x194   : > { %v6710_v41 = vpop.f32.mrf.mxu0 }
 0x195   : > { %v6708_v46 = vpop.f32.mrf.mxu1 }
 0x196   : > { %v6714_v59 = vpop.f32.mrf.mxu0 }
 0x197   : > { %v6712_v43 = vpop.f32.mrf.mxu1  ;;  %7313 = vst [vmem:[#allocation6_spill] sm:$0xff] %v6714_v59 }
 0x198   : > { %v6718_v11 = vpop.f32.mrf.mxu0 }
 0x199   : > { %v6716_v16 = vpop.f32.mrf.mxu1  ;;  %7315 = vst [vmem:[#allocation31_spill] sm:$0xff] %v6718_v11 }
 0x19a   : > { %7314 = vst [vmem:[#allocation30_spill] sm:$0xff] %v6716_v16  ;;  %v6722_v35 = vpop.f32.mrf.mxu0 }
 0x19b   : > { %v6720_v10 = vpop.f32.mrf.mxu1  ;;  %7317 = vst [vmem:[#allocation32_spill] sm:$0xff] %v6722_v35 }
 0x19c   : > { %7316 = vst [vmem:[#allocation7_spill] sm:$0xff] %v6720_v10  ;;  %v6726_v31 = vpop.f32.mrf.mxu0 }
 0x19d   : > { %v6724_v13 = vpop.f32.mrf.mxu1  ;;  %7319 = vst [vmem:[#allocation8_spill] sm:$0xff] %v6726_v31 }
 0x19e   : > { %7318 = vst [vmem:[#allocation33_spill] sm:$0xff] %v6724_v13  ;;  %v6730_v23 = vpop.f32.mrf.mxu0 }
 0x19f   : > { %v6728_v27 = vpop.f32.mrf.mxu1  ;;  %7321 = vst [vmem:[#allocation35_spill] sm:$0xff] %v6730_v23 }
 0x1a0   : > { %7320 = vst [vmem:[#allocation34_spill] sm:$0xff] %v6728_v27  ;;  %v6734_v7 = vpop.f32.mrf.mxu0 }
 0x1a1   : > { %v6732_v40 = vpop.f32.mrf.mxu1  ;;  %7323 = vst [vmem:[#allocation36_spill] sm:$0xff] %v6734_v7 }
 0x1a2   : > { %7322 = vst [vmem:[#allocation9_spill] sm:$0xff] %v6732_v40  ;;  %v6738_v16 = vpop.f32.mrf.mxu0 }
 0x1a3   : > { %v6736_v59 = vpop.f32.mrf.mxu1  ;;  %7325 = vst [vmem:[#allocation10_spill] sm:$0xff] %v6738_v16 }
 0x1a4   : > { %7324 = vst [vmem:[#allocation37_spill] sm:$0xff] %v6736_v59  ;;  %v6742_v10 = vpop.f32.mrf.mxu0 }
 0x1a5   : > { %v6740_v11 = vpop.f32.mrf.mxu1  ;;  %7327 = vst [vmem:[#allocation12_spill] sm:$0xff] %v6742_v10 }
 0x1a6   : > { %7326 = vst [vmem:[#allocation11_spill] sm:$0xff] %v6740_v11  ;;  %v6746_v13 = vpop.f32.mrf.mxu0 }
 0x1a7   : > { %v6744_v35 = vpop.f32.mrf.mxu1  ;;  %7329 = vst [vmem:[#allocation14_spill] sm:$0xff] %v6746_v13 }
 0x1a8   : > { %7328 = vst [vmem:[#allocation40_spill] sm:$0xff] %v6744_v35  ;;  %v6750_v23 = vpop.f32.mrf.mxu0  ;;  %v2582_v35 = vadd.f32 %v5184_v57, %v6553_v63  ;;  %v2583_v57 = vadd.f32 %v6656_v30, %v6562_v42  ;;  %v2585_v42 = vadd.f32 %v6664_v62, %v6568_v53 }
 0x1a9   : > { %v6748_v31 = vpop.f32.mrf.mxu1  ;;  %7331 = vst [vmem:[#allocation3_spill] sm:$0xff] %v6750_v23  ;;  %v2581_v23 = vadd.f32 %v2422_v58, %v6556_v1 }
 0x1aa   : > { %7330 = vst [vmem:[#allocation13_spill] sm:$0xff] %v6748_v31  ;;  %v6754_v7 = vpop.f32.mrf.mxu0 }
 0x1ab   : > { %v6752_v40 = vpop.f32.mrf.mxu1  ;;  %7333 = vst [vmem:[#allocation15_spill] sm:$0xff] %v6754_v7  ;;  %v2970_v7 = vadd.f32 %v6646_v38, %v2582_v35  ;;  %v2969_v63 = vadd.f32 %v6650_v61, %v2581_v23  ;;  %v2586_v38 = vadd.f32 %v6660_v47, %v6565_v5  ;;  %v2971_v61 = vadd.f32 %v6658_v14, %v2583_v57 }
 0x1ac   : > { %7332 = vst [vmem:[#allocation16_spill] sm:$0xff] %v6752_v40  ;;  %v6758_v16 = vpop.f32.mrf.mxu0  ;;  %v2973_v14 = vadd.f32 %v6666_v29, %v2585_v42 }
 0x1ad   : > { %v6756_v59 = vpop.f32.mrf.mxu1  ;;  %7334 = vst [vmem:[#allocation17_spill] sm:$0xff] %v6758_v16  ;;  %v2584_v16 = vadd.f32 %v6652_v20, %v6559_v9  ;;  %v2974_v5 = vadd.f32 %v6662_v49, %v2586_v38  ;;  %v2589_v38 = vadd.f32 %v6680_v2, %v6580_v19 }
 0x1ae   : > { %v6762_v10 = vpop.f32.mrf.mxu0 }
 0x1af   : > { %v6760_v11 = vpop.f32.mrf.mxu1  ;;  %7336 = vst [vmem:[#allocation19_spill] sm:$0xff] %v6762_v10  ;;  %v2972_v9 = vadd.f32 %v6654_v54, %v2584_v16 }
 0x1b0   : > { %7335 = vst [vmem:[#allocation18_spill] sm:$0xff] %v6760_v11  ;;  %v6767_v31 = vpop.f32.mrf.mxu0 }
 0x1b1   : > { %v6765_v13 = vpop.f32.mrf.mxu1  ;;  %7337 = vst [vmem:[#allocation41_spill] sm:$0xff] %v6767_v31 }
 0x1b2   : > { %v6772_v40 = vpop.f32.mrf.mxu0 }
 0x1b3   : > { %v6770_v27 = vpop.f32.mrf.mxu1 }
 0x1b4   : > { %v5334_v10 = vpop.f32.mrf.mxu0 }
 0x1b5   : > { %v5284_v11 = vpop.f32.mrf.mxu1 }
 0x1b6   : > { %v3357_v31 = vadd.f32 %v5284_v11, %v2970_v7  ;;  %v3584_v35 = vpop.f32.mrf.mxu0 }
 0x1b7   : > { %v3197_v1 = vpop.f32.mrf.mxu1 }
 0x1b8   : > { %v6789_v58 = vadd.f32 %v5334_v10, %v3357_v31  ;;  %v3356_v23 = vadd.f32 %v3197_v1, %v2969_v63  ;;  %v5337_v11 = vpop.f32.mrf.mxu0  ;;  %v2588_v31 = vadd.f32 %v6668_v37, %v6571_v8  ;;  %v2587_v63 = vadd.f32 %v6672_v34, %v6574_v60 }
 0x1b9   : > { %v5287_v7 = vpop.f32.mrf.mxu1  ;;  %v2590_v37 = vadd.f32 %v6676_v15, %v6577_v45 }
 0x1ba   : > { %3843 = vst [vmem:[%s6784_s18 + $0x8] sm:$0xff] %v6789_v58  ;;  %v6796_v20 = vadd.f32 %v3584_v35, %v3356_v23  ;;  %v3359_v30 = vadd.f32 %v5287_v7, %v2972_v9  ;;  %v3594_v54 = vpop.f32.mrf.mxu0  ;;  %v2976_v29 = vadd.f32 %v6670_v4, %v2588_v31  ;;  %v2975_v7 = vadd.f32 %v6674_v12, %v2587_v63 }
 0x1bb   : > { %v3207_v16 = vpop.f32.mrf.mxu1 }
 0x1bc   : > { %3842 = vst [vmem:[%s6784_s18] sm:$0xff] %v6796_v20  ;;  %v6803_v53 = vadd.f32 %v5337_v11, %v3359_v30  ;;  %v3358_v10 = vadd.f32 %v3207_v16, %v2971_v61  ;;  %v5340_v62 = vpop.f32.mrf.mxu0  ;;  %v3874_v57 = vadd.f32 %v6789_v58, %v6796_v20  ;;  %v2978_v11 = vadd.f32 %v6678_v44, %v2590_v37 }
 0x1bd   : > { %v5290_v47 = vpop.f32.mrf.mxu1  ;;  %v2592_v16 = vadd.f32 %v6684_v32, %v6583_v21  ;;  %v2591_v44 = vadd.f32 %v6688_v48, %v6586_v25 }
 0x1be   : > { %3845 = vst [vmem:[%s6784_s18 + $0x18] sm:$0xff] %v6803_v53  ;;  %v6812_v8 = vadd.f32 %v3594_v54, %v3358_v10  ;;  %v3361_v49 = vadd.f32 %v5290_v47, %v2974_v5  ;;  %v3604_v35 = vpop.f32.mrf.mxu0  ;;  %v2977_v54 = vadd.f32 %v6682_v18, %v2589_v38 }
 0x1bf   : > { %v3217_v1 = vpop.f32.mrf.mxu1  ;;  %v2980_v18 = vadd.f32 %v6686_v28, %v2592_v16 }
 0x1c0   : > { %3844 = vst [vmem:[%s6784_s18 + $0x10] sm:$0xff] %v6812_v8  ;;  %v3875_v60 = vadd.f32 %v3874_v57, %v6812_v8  ;;  %v6820_v34 = vadd.f32 %v5340_v62, %v3361_v49  ;;  %v3360_v9 = vadd.f32 %v3217_v1, %v2973_v14  ;;  %v5343_v42 = vpop.f32.mrf.mxu0  ;;  %v2594_v14 = vadd.f32 %v6692_v17, %v6589_v51 }
 0x1c1   : > { %v5293_v23 = vpop.f32.mrf.mxu1  ;;  %v2593_v57 = vadd.f32 %v6696_v56, %v6592_v39  ;;  %v2979_v1 = vadd.f32 %v6690_v52, %v2591_v44  ;;  %v7338_v44 = vld [vmem:[#allocation20_spill] sm:$0xff] }
 0x1c2   : > { %3847 = vst [vmem:[%s6784_s18 + $0x28] sm:$0xff] %v6820_v34  ;;  %v6827_v45 = vadd.f32 %v3604_v35, %v3360_v9  ;;  %v3876_v4 = vadd.f32 %v3875_v60, %v6803_v53  ;;  %v3363_v15 = vadd.f32 %v5293_v23, %v2976_v29  ;;  %v3614_v30 = vpop.f32.mrf.mxu0  ;;  %v2982_v35 = vadd.f32 %v6694_v22, %v2594_v14  ;;  %v7340_v14 = vld [vmem:[#allocation6_spill] sm:$0xff] }
 0x1c3   : > { %v3227_v61 = vpop.f32.mrf.mxu1  ;;  %v2596_v9 = vadd.f32 %v6700_v50, %v6595_v33  ;;  %v2981_v38 = vadd.f32 %v6698_v3, %v2593_v57  ;;  %v2595_v22 = vadd.f32 %v6704_v24, %v6598_v0 }
 0x1c4   : > { %3846 = vst [vmem:[%s6784_s18 + $0x20] sm:$0xff] %v6827_v45  ;;  %v3877_v19 = vadd.f32 %v3876_v4, %v6827_v45  ;;  %v6836_v12 = vadd.f32 %v5343_v42, %v3363_v15  ;;  %v3362_v2 = vadd.f32 %v3227_v61, %v2975_v7  ;;  %v5346_v31 = vpop.f32.mrf.mxu0  ;;  %v2598_v4 = vadd.f32 %v6708_v46, %v6601_v55 }
 0x1c5   : > { %v5296_v5 = vpop.f32.mrf.mxu1  ;;  %v2984_v3 = vadd.f32 %v6702_v6, %v2596_v9 }
 0x1c6   : > { %3849 = vst [vmem:[%s6784_s18 + $0x38] sm:$0xff] %v6836_v12  ;;  %v6843_v10 = vadd.f32 %v3614_v30, %v3362_v2  ;;  %v3878_v21 = vadd.f32 %v3877_v19, %v6820_v34  ;;  %v3365_v32 = vadd.f32 %v5296_v5, %v2978_v11  ;;  %v3624_v62 = vpop.f32.mrf.mxu0  ;;  %v2597_v30 = vadd.f32 %v6712_v43, %v6604_v36 }
 0x1c7   : > { %v3237_v47 = vpop.f32.mrf.mxu1  ;;  %v2983_v2 = vadd.f32 %v6706_v26, %v2595_v22 }
 0x1c8   : > { %3848 = vst [vmem:[%s6784_s18 + $0x30] sm:$0xff] %v6843_v10  ;;  %v3879_v25 = vadd.f32 %v3878_v21, %v6843_v10  ;;  %v6852_v48 = vadd.f32 %v5346_v31, %v3365_v32  ;;  %v3364_v63 = vadd.f32 %v3237_v47, %v2977_v54  ;;  %v5349_v37 = vpop.f32.mrf.mxu0  ;;  %v2986_v54 = vadd.f32 %v6710_v41, %v2598_v4  ;;  %v7339_v21 = vld [vmem:[#allocation30_spill] sm:$0xff]  ;;  %v7348_v4 = vld [vmem:[#allocation32_spill] sm:$0xff] }
 0x1c9   : > { %v5299_v49 = vpop.f32.mrf.mxu1  ;;  %v2600_v32 = vadd.f32 %v7339_v21, %v7338_v44  ;;  %v2985_v47 = vadd.f32 %v7340_v14, %v2597_v30  ;;  %v7352_v44 = vld [vmem:[#allocation35_spill] sm:$0xff]  ;;  %v7354_v14 = vld [vmem:[#allocation37_spill] sm:$0xff] }
 0x1ca   : > { %3851 = vst [vmem:[%s6784_s18 + $0x48] sm:$0xff] %v6852_v48  ;;  %v6859_v51 = vadd.f32 %v3624_v62, %v3364_v63  ;;  %v3880_v28 = vadd.f32 %v3879_v25, %v6836_v12  ;;  %v3367_v17 = vadd.f32 %v5299_v49, %v2980_v18  ;;  %v3634_v60 = vpop.f32.mrf.mxu0  ;;  %v7341_v25 = vld [vmem:[#allocation21_spill] sm:$0xff]  ;;  %v7342_v63 = vld [vmem:[#allocation7_spill] sm:$0xff] }
 0x1cb   : > { %v3247_v29 = vpop.f32.mrf.mxu1  ;;  %v2599_v41 = vadd.f32 %v7342_v63, %v7341_v25  ;;  %v7355_v63 = vld [vmem:[#allocation39_spill] sm:$0xff] }
 0x1cc   : > { %3850 = vst [vmem:[%s6784_s18 + $0x40] sm:$0xff] %v6859_v51  ;;  %v3881_v39 = vadd.f32 %v3880_v28, %v6859_v51  ;;  %v6868_v52 = vadd.f32 %v5349_v37, %v3367_v17  ;;  %v3366_v56 = vadd.f32 %v3247_v29, %v2979_v1  ;;  %v5352_v42 = vpop.f32.mrf.mxu0  ;;  %v7343_v1 = vld [vmem:[#allocation22_spill] sm:$0xff]  ;;  %v7344_v28 = vld [vmem:[#allocation33_spill] sm:$0xff] }
 0x1cd   : > { %v5302_v23 = vpop.f32.mrf.mxu1  ;;  %v2602_v17 = vadd.f32 %v7344_v28, %v7343_v1  ;;  %v7357_v28 = vld [vmem:[#allocation36_spill] sm:$0xff] }
 0x1ce   : > { %3853 = vst [vmem:[%s6784_s18 + $0x58] sm:$0xff] %v6868_v52  ;;  %v6875_v7 = vadd.f32 %v3634_v60, %v3366_v56  ;;  %v3882_v33 = vadd.f32 %v3881_v39, %v6852_v48  ;;  %v3369_v50 = vadd.f32 %v5302_v23, %v2982_v35  ;;  %v3644_v11 = vpop.f32.mrf.mxu0  ;;  %v7345_v60 = vld [vmem:[#allocation31_spill] sm:$0xff] }
 0x1cf   : > { %v3257_v15 = vpop.f32.mrf.mxu1  ;;  %v2988_v9 = vadd.f32 %v7345_v60, %v2600_v32  ;;  %v7346_v23 = vld [vmem:[#allocation23_spill] sm:$0xff] }
 0x1d0   : > { %3852 = vst [vmem:[%s6784_s18 + $0x50] sm:$0xff] %v6875_v7  ;;  %v3883_v0 = vadd.f32 %v3882_v33, %v6875_v7  ;;  %v6884_v24 = vadd.f32 %v5352_v42, %v3369_v50  ;;  %v3368_v61 = vadd.f32 %v3257_v15, %v2981_v38  ;;  %v5355_v19 = vpop.f32.mrf.mxu0  ;;  %v7347_v42 = vld [vmem:[#allocation34_spill] sm:$0xff]  ;;  %v2987_v15 = vadd.f32 %v7348_v4, %v2599_v41  ;;  %v7356_v41 = vld [vmem:[#allocation11_spill] sm:$0xff] }
 0x1d1   : > { %v5305_v16 = vpop.f32.mrf.mxu1  ;;  %v2601_v22 = vadd.f32 %v7347_v42, %v7346_v23 }
 0x1d2   : > { %3855 = vst [vmem:[%s6784_s18 + $0x68] sm:$0xff] %v6884_v24  ;;  %v6891_v55 = vadd.f32 %v3644_v11, %v3368_v61  ;;  %v3884_v46 = vadd.f32 %v3883_v0, %v6868_v52  ;;  %v3371_v6 = vadd.f32 %v5305_v16, %v2984_v3  ;;  %v3654_v31 = vpop.f32.mrf.mxu0  ;;  %v7349_v61 = vld [vmem:[#allocation8_spill] sm:$0xff] }
 0x1d3   : > { %v3267_v5 = vpop.f32.mrf.mxu1  ;;  %v2990_v30 = vadd.f32 %v7349_v61, %v2602_v17  ;;  %v2989_v21 = vadd.f32 %v7352_v44, %v2601_v22  ;;  %v7360_v22 = vld [vmem:[#allocation10_spill] sm:$0xff] }
 0x1d4   : > { %3854 = vst [vmem:[%s6784_s18 + $0x60] sm:$0xff] %v6891_v55  ;;  %v3885_v36 = vadd.f32 %v3884_v46, %v6891_v55  ;;  %v6900_v43 = vadd.f32 %v5355_v19, %v3371_v6  ;;  %v3370_v26 = vadd.f32 %v3267_v5, %v2983_v2  ;;  %v5358_v18 = vpop.f32.mrf.mxu0  ;;  %v7350_v2 = vld [vmem:[#allocation24_spill] sm:$0xff]  ;;  %v7351_v46 = vld [vmem:[#allocation9_spill] sm:$0xff] }
 0x1d5   : > { %v5308_v62 = vpop.f32.mrf.mxu1  ;;  %v2604_v6 = vadd.f32 %v7351_v46, %v7350_v2 }
 0x1d6   : > { %3857 = vst [vmem:[%s6784_s18 + $0x78] sm:$0xff] %v6900_v43  ;;  %v6907_v57 = vadd.f32 %v3654_v31, %v3370_v26  ;;  %v3886_v49 = vadd.f32 %v3885_v36, %v6884_v24  ;;  %v3373_v37 = vadd.f32 %v5308_v62, %v2986_v54  ;;  %v3664_v29 = vpop.f32.mrf.mxu0  ;;  %v7353_v26 = vld [vmem:[#allocation38_spill] sm:$0xff] }
 0x1d7   : > { %v3277_v35 = vpop.f32.mrf.mxu1  ;;  %v2992_v17 = vadd.f32 %v7357_v28, %v2604_v6 }
 0x1d8   : > { %3856 = vst [vmem:[%s6784_s18 + $0x70] sm:$0xff] %v6907_v57  ;;  %v3887_v39 = vadd.f32 %v3886_v49, %v6907_v57  ;;  %v6916_v56 = vadd.f32 %v5358_v18, %v3373_v37  ;;  %v3372_v38 = vadd.f32 %v3277_v35, %v2985_v47  ;;  %v5361_v50 = vpop.f32.mrf.mxu0  ;;  %v2603_v47 = vadd.f32 %v7354_v14, %v7353_v26  ;;  %v7366_v26 = vld [vmem:[#allocation16_spill] sm:$0xff] }
 0x1d9   : > { %v5311_v33 = vpop.f32.mrf.mxu1  ;;  %v2606_v49 = vadd.f32 %v7356_v41, %v7355_v63  ;;  %v7367_v63 = vld [vmem:[#allocation27_spill] sm:$0xff] }
 0x1da   : > { %3859 = vst [vmem:[%s6784_s18 + $0x88] sm:$0xff] %v6916_v56  ;;  %v6923_v11 = vadd.f32 %v3664_v29, %v3372_v38  ;;  %v3888_v3 = vadd.f32 %v3887_v39, %v6900_v43  ;;  %v3375_v0 = vadd.f32 %v5311_v33, %v2988_v9  ;;  %v3674_v19 = vpop.f32.mrf.mxu0  ;;  %v7358_v9 = vld [vmem:[#allocation25_spill] sm:$0xff]  ;;  %v7359_v39 = vld [vmem:[#allocation40_spill] sm:$0xff]  ;;  %v2991_v33 = vadd.f32 %v7360_v22, %v2603_v47  ;;  %v7371_v22 = vld [vmem:[#allocation15_spill] sm:$0xff] }
 0x1db   : > { %v3287_v16 = vpop.f32.mrf.mxu1  ;;  %v2605_v38 = vadd.f32 %v7359_v39, %v7358_v9  ;;  %v2610_v41 = vadd.f32 %v6756_v59, %v7367_v63  ;;  %v7369_v9 = vld [vmem:[#allocation5_spill] sm:$0xff]  ;;  %v7370_v39 = vld [vmem:[#allocation18_spill] sm:$0xff] }
 0x1dc   : > { %3858 = vst [vmem:[%s6784_s18 + $0x80] sm:$0xff] %v6923_v11  ;;  %v3889_v54 = vadd.f32 %v3888_v3, %v6923_v11  ;;  %v6932_v5 = vadd.f32 %v5361_v50, %v3375_v0  ;;  %v3374_v31 = vadd.f32 %v3287_v16, %v2987_v15  ;;  %v5364_v36 = vpop.f32.mrf.mxu0  ;;  %v7361_v3 = vld [vmem:[#allocation12_spill] sm:$0xff] }
 0x1dd   : > { %v5314_v32 = vpop.f32.mrf.mxu1  ;;  %v2994_v0 = vadd.f32 %v7361_v3, %v2606_v49  ;;  %v7362_v16 = vld [vmem:[#allocation4_spill] sm:$0xff]  ;;  %v7372_v3 = vld [vmem:[#allocation17_spill] sm:$0xff] }
 0x1de   : > { %3861 = vst [vmem:[%s6784_s18 + $0x98] sm:$0xff] %v6932_v5  ;;  %v6939_v62 = vadd.f32 %v3674_v19, %v3374_v31  ;;  %v3890_v18 = vadd.f32 %v3889_v54, %v6916_v56  ;;  %v3377_v25 = vadd.f32 %v5314_v32, %v2990_v30  ;;  %v3684_v1 = vpop.f32.mrf.mxu0  ;;  %v7363_v19 = vld [vmem:[#allocation13_spill] sm:$0xff]  ;;  %v7364_v31 = vld [vmem:[#allocation14_spill] sm:$0xff] }
 0x1df   : > { %v3297_v37 = vpop.f32.mrf.mxu1  ;;  %v2608_v2 = vadd.f32 %v7363_v19, %v7362_v16  ;;  %v2993_v44 = vadd.f32 %v7364_v31, %v2605_v38  ;;  %v2609_v38 = vadd.f32 %v7370_v39, %v7369_v9  ;;  %v7373_v16 = vld [vmem:[#allocation28_spill] sm:$0xff]  ;;  %v7374_v31 = vld [vmem:[#allocation19_spill] sm:$0xff] }
 0x1e0   : > { %3860 = vst [vmem:[%s6784_s18 + $0x90] sm:$0xff] %v6939_v62  ;;  %v3891_v35 = vadd.f32 %v3890_v18, %v6939_v62  ;;  %v6948_v29 = vadd.f32 %v5364_v36, %v3377_v25  ;;  %v3376_v60 = vadd.f32 %v3297_v37, %v2989_v21  ;;  %v5367_v42 = vpop.f32.mrf.mxu0  ;;  %v7365_v36 = vld [vmem:[#allocation26_spill] sm:$0xff]  ;;  %v2612_v19 = vadd.f32 %v6765_v13, %v7373_v16 }
 0x1e1   : > { %v5317_v23 = vpop.f32.mrf.mxu1  ;;  %v2607_v14 = vadd.f32 %v7366_v26, %v7365_v36  ;;  %v7375_v36 = vld [vmem:[#allocation29_spill] sm:$0xff] }
 0x1e2   : > { %3863 = vst [vmem:[%s6784_s18 + $0xa8] sm:$0xff] %v6948_v29  ;;  %v6955_v50 = vadd.f32 %v3684_v1, %v3376_v60  ;;  %v3892_v4 = vadd.f32 %v3891_v35, %v6932_v5  ;;  %v3379_v15 = vadd.f32 %v5317_v23, %v2992_v17  ;;  %v3694_v30 = vpop.f32.mrf.mxu0  ;;  %v7368_v1 = vld [vmem:[#allocation3_spill] sm:$0xff]  ;;  %v2611_v26 = vadd.f32 %v6770_v27, %v7375_v36 }
 0x1e3   : > { %v3307_v61 = vpop.f32.mrf.mxu1  ;;  %v2996_v28 = vadd.f32 %v7368_v1, %v2608_v2 }
 0x1e4   : > { %3862 = vst [vmem:[%s6784_s18 + $0xa0] sm:$0xff] %v6955_v50  ;;  %v3893_v46 = vadd.f32 %v3892_v4, %v6955_v50  ;;  %v6964_v6 = vadd.f32 %v5367_v42, %v3379_v15  ;;  %v3378_v54 = vadd.f32 %v3307_v61, %v2991_v33  ;;  %v5370_v32 = vpop.f32.mrf.mxu0  ;;  %v2995_v33 = vadd.f32 %v7371_v22, %v2607_v14 }
 0x1e5   : > { %v5320_v21 = vpop.f32.mrf.mxu1 }
 0x1e6   : > { %3865 = vst [vmem:[%s6784_s18 + $0xb8] sm:$0xff] %v6964_v6  ;;  %v6971_v47 = vadd.f32 %v3694_v30, %v3378_v54  ;;  %v3894_v18 = vadd.f32 %v3893_v46, %v6948_v29  ;;  %v3381_v25 = vadd.f32 %v5320_v21, %v2994_v0  ;;  %v3704_v37 = vpop.f32.mrf.mxu0  ;;  %v2998_v0 = vadd.f32 %v7372_v3, %v2610_v41  ;;  %v7376_v41 = vld [vmem:[#allocation41_spill] sm:$0xff] }
 0x1e7   : > { %v3317_v49 = vpop.f32.mrf.mxu1 }
 0x1e8   : > { %3864 = vst [vmem:[%s6784_s18 + $0xb0] sm:$0xff] %v6971_v47  ;;  %v3895_v17 = vadd.f32 %v3894_v18, %v6971_v47  ;;  %v6980_v35 = vadd.f32 %v5370_v32, %v3381_v25  ;;  %v3380_v60 = vadd.f32 %v3317_v49, %v2993_v44  ;;  %v5373_v42 = vpop.f32.mrf.mxu0  ;;  %v2997_v44 = vadd.f32 %v7374_v31, %v2609_v38 }
 0x1e9   : > { %v5323_v23 = vpop.f32.mrf.mxu1  ;;  %v3000_v49 = vadd.f32 %v7376_v41, %v2612_v19 }
 0x1ea   : > { %3867 = vst [vmem:[%s6784_s18 + $0xc8] sm:$0xff] %v6980_v35  ;;  %v6987_v59 = vadd.f32 %v3704_v37, %v3380_v60  ;;  %v3896_v4 = vadd.f32 %v3895_v17, %v6964_v6  ;;  %v3383_v15 = vadd.f32 %v5323_v23, %v2996_v28  ;;  %v3714_v30 = vpop.f32.mrf.mxu0  ;;  %v2999_v60 = vadd.f32 %v6772_v40, %v2611_v26 }
 0x1eb   : > { %v3327_v61 = vpop.f32.mrf.mxu1 }
 0x1ec   : > { %3866 = vst [vmem:[%s6784_s18 + $0xc0] sm:$0xff] %v6987_v59  ;;  %v3897_v2 = vadd.f32 %v3896_v4, %v6987_v59  ;;  %v6996_v46 = vadd.f32 %v5373_v42, %v3383_v15  ;;  %v3382_v54 = vadd.f32 %v3327_v61, %v2995_v33  ;;  %v5376_v32 = vpop.f32.mrf.mxu0 }
 0x1ed   : > { %v5326_v21 = vpop.f32.mrf.mxu1 }
 0x1ee   : > { %3869 = vst [vmem:[%s6784_s18 + $0xd8] sm:$0xff] %v6996_v46  ;;  %v7003_v14 = vadd.f32 %v3714_v30, %v3382_v54  ;;  %v3898_v13 = vadd.f32 %v3897_v2, %v6980_v35  ;;  %v3385_v18 = vadd.f32 %v5326_v21, %v2998_v0  ;;  %v3724_v63 = vpop.f32.mrf.mxu0 }
 0x1ef   : > { %v3337_v25 = vpop.f32.mrf.mxu1 }
 0x1f0   : > { %3868 = vst [vmem:[%s6784_s18 + $0xd0] sm:$0xff] %v7003_v14  ;;  %v3899_v37 = vadd.f32 %v3898_v13, %v7003_v14  ;;  %v7010_v1 = vadd.f32 %v5376_v32, %v3385_v18  ;;  %v3384_v27 = vadd.f32 %v3337_v25, %v2997_v44  ;;  %v5379_v17 = vpop.f32.mrf.mxu0 }
 0x1f1   : > { %v5329_v28 = vpop.f32.mrf.mxu1 }
 0x1f2   : > { %3871 = vst [vmem:[%s6784_s18 + $0xe8] sm:$0xff] %v7010_v1  ;;  %v7015_v9 = vadd.f32 %v3724_v63, %v3384_v27  ;;  %v3900_v39 = vadd.f32 %v3899_v37, %v6996_v46  ;;  %v3387_v38 = vadd.f32 %v5329_v28, %v3000_v49  ;;  %v3734_v4 = vpop.f32.mrf.mxu0 }
 0x1f3   : > { %v3347_v23 = vpop.f32.mrf.mxu1 }
 0x1f4   : > { %3870 = vst [vmem:[%s6784_s18 + $0xe0] sm:$0xff] %v7015_v9  ;;  %v3901_v42 = vadd.f32 %v3900_v39, %v7015_v9  ;;  %v7021_v22 = vadd.f32 %v5379_v17, %v3387_v38  ;;  %v3386_v33 = vadd.f32 %v3347_v23, %v2999_v60 }
 0x1f6   : > { %3873 = vst [vmem:[%s6784_s18 + $0xf8] sm:$0xff] %v7021_v22  ;;  %v7025_v15 = vadd.f32 %v3734_v4, %v3386_v33  ;;  %v3902_v40 = vadd.f32 %v3901_v42, %v7010_v1 }
 0x1f8   : > { %3872 = vst [vmem:[%s6784_s18 + $0xf0] sm:$0xff] %v7025_v15  ;;  %v3903_v3 = vadd.f32 %v3902_v40, %v7025_v15 }
 0x1fa   : > { %v3904_v0 = vadd.f32 %v3903_v3, %v7021_v22 }
 0x1fc   : > { %v3905_v61 = vrot.slane %v3904_v0, 4 }
 0x1fe   : > { %v3906_v30 = vadd.f32 %v3905_v61, %v3904_v0 }
 0x200   : > { %v3907_v16 = vrot.slane %v3906_v30, 2 }
 0x202   : > { %v3908_v19 = vadd.f32 %v3907_v16, %v3906_v30 }
 0x204   : > { %v3909_v2 = vrot.slane %v3908_v19, 1 }
 0x206   : > { %v3910_v54 = vadd.f32 %v3909_v2, %v3908_v19 }
 0x208   : > { %v7032_v31 = vmul.f32 0.00390625, %v3910_v54 }
 0x20a   : > { %v3912_v44 = vsub.f32 %v6796_v20, %v7032_v31  ;;  %v3913_v21 = vsub.f32 %v6789_v58, %v7032_v31  ;;  %v3914_v32 = vsub.f32 %v6812_v8, %v7032_v31  ;;  %v3915_v13 = vsub.f32 %v6803_v53, %v7032_v31 }
 0x20b   : > { %v3916_v18 = vsub.f32 %v6827_v45, %v7032_v31  ;;  %v3917_v41 = vsub.f32 %v6820_v34, %v7032_v31  ;;  %v3918_v58 = vsub.f32 %v6843_v10, %v7032_v31  ;;  %v3919_v27 = vsub.f32 %v6836_v12, %v7032_v31 }
 0x20c   : > { %v3944_v36 = vmul.f32 %v3912_v44, %v3912_v44  ;;  %v3945_v26 = vmul.f32 %v3913_v21, %v3913_v21  ;;  %v3946_v25 = vmul.f32 %v3914_v32, %v3914_v32  ;;  %v3947_v20 = vmul.f32 %v3915_v13, %v3915_v13 }
 0x20d   : > { %v3948_v37 = vmul.f32 %v3916_v18, %v3916_v18  ;;  %v3949_v28 = vmul.f32 %v3917_v41, %v3917_v41  ;;  %v3920_v45 = vsub.f32 %v6859_v51, %v7032_v31  ;;  %v3950_v17 = vmul.f32 %v3918_v58, %v3918_v58 }
 0x20e   : > { %v3976_v63 = vadd.f32 %v3945_v26, %v3944_v36  ;;  %v3921_v34 = vsub.f32 %v6852_v48, %v7032_v31  ;;  %v3951_v39 = vmul.f32 %v3919_v27, %v3919_v27  ;;  %v3922_v10 = vsub.f32 %v6875_v7, %v7032_v31 }
 0x20f   : > { %v3952_v23 = vmul.f32 %v3920_v45, %v3920_v45  ;;  %v3923_v12 = vsub.f32 %v6868_v52, %v7032_v31  ;;  %v3924_v51 = vsub.f32 %v6891_v55, %v7032_v31  ;;  %v3925_v48 = vsub.f32 %v6884_v24, %v7032_v31 }
 0x210   : > { %v3977_v49 = vadd.f32 %v3976_v63, %v3946_v25  ;;  %v3953_v33 = vmul.f32 %v3921_v34, %v3921_v34  ;;  %v3954_v40 = vmul.f32 %v3922_v10, %v3922_v10  ;;  %v3926_v7 = vsub.f32 %v6907_v57, %v7032_v31 }
 0x211   : > { %v3955_v0 = vmul.f32 %v3923_v12, %v3923_v12  ;;  %v3956_v30 = vmul.f32 %v3924_v51, %v3924_v51  ;;  %v3927_v52 = vsub.f32 %v6900_v43, %v7032_v31  ;;  %v3957_v19 = vmul.f32 %v3925_v48, %v3925_v48 }
 0x212   : > { %v3978_v8 = vadd.f32 %v3977_v49, %v3947_v20  ;;  %v3928_v55 = vsub.f32 %v6923_v11, %v7032_v31  ;;  %v3958_v54 = vmul.f32 %v3926_v7, %v3926_v7  ;;  %v3929_v24 = vsub.f32 %v6916_v56, %v7032_v31 }
 0x213   : > { %v3959_v21 = vmul.f32 %v3927_v52, %v3927_v52  ;;  %v3930_v57 = vsub.f32 %v6939_v62, %v7032_v31  ;;  %v3931_v43 = vsub.f32 %v6932_v5, %v7032_v31  ;;  %v3932_v11 = vsub.f32 %v6955_v50, %v7032_v31 }
 0x214   : > { %v3979_v53 = vadd.f32 %v3978_v8, %v3948_v37  ;;  %v3960_v36 = vmul.f32 %v3928_v55, %v3928_v55  ;;  %v3961_v13 = vmul.f32 %v3929_v24, %v3929_v24  ;;  %v3933_v56 = vsub.f32 %v6948_v29, %v7032_v31 }
 0x215   : > { %v3962_v25 = vmul.f32 %v3930_v57, %v3930_v57  ;;  %v3963_v41 = vmul.f32 %v3931_v43, %v3931_v43  ;;  %v3934_v62 = vsub.f32 %v6971_v47, %v7032_v31  ;;  %v3964_v49 = vmul.f32 %v3932_v11, %v3932_v11 }
 0x216   : > { %v3980_v60 = vadd.f32 %v3979_v53, %v3949_v28  ;;  %v3935_v5 = vsub.f32 %v6964_v6, %v7032_v31  ;;  %v3965_v37 = vmul.f32 %v3933_v56, %v3933_v56  ;;  %v3936_v50 = vsub.f32 %v6987_v59, %v7032_v31 }
 0x217   : > { %v3966_v27 = vmul.f32 %v3934_v62, %v3934_v62  ;;  %v3937_v29 = vsub.f32 %v6980_v35, %v7032_v31  ;;  %v3938_v47 = vsub.f32 %v7003_v14, %v7032_v31  ;;  %v3939_v6 = vsub.f32 %v6996_v46, %v7032_v31 }
 0x218   : > { %v3981_v38 = vadd.f32 %v3980_v60, %v3950_v17  ;;  %v3967_v53 = vmul.f32 %v3935_v5, %v3935_v5  ;;  %v3968_v17 = vmul.f32 %v3936_v50, %v3936_v50  ;;  %v3940_v59 = vsub.f32 %v7015_v9, %v7032_v31 }
 0x219   : > { %v3969_v34 = vmul.f32 %v3937_v29, %v3937_v29  ;;  %v3941_v35 = vsub.f32 %v7010_v1, %v7032_v31  ;;  %v3942_v14 = vsub.f32 %v7025_v15, %v7032_v31  ;;  %v3943_v46 = vsub.f32 %v7021_v22, %v7032_v31 }
 0x21a   : > { %v3982_v42 = vadd.f32 %v3981_v38, %v3951_v39  ;;  %v3970_v38 = vmul.f32 %v3938_v47, %v3938_v47  ;;  %v3972_v12 = vmul.f32 %v3940_v59, %v3940_v59 }
 0x21c   : > { %v3983_v4 = vadd.f32 %v3982_v42, %v3952_v23  ;;  %v3971_v23 = vmul.f32 %v3939_v6, %v3939_v6 }
 0x21e   : > { %v3984_v3 = vadd.f32 %v3983_v4, %v3953_v33  ;;  %v3973_v4 = vmul.f32 %v3941_v35, %v3941_v35 }
 0x220   : > { %v3985_v61 = vadd.f32 %v3984_v3, %v3954_v40  ;;  %v3974_v40 = vmul.f32 %v3942_v14, %v3942_v14  ;;  %v3975_v3 = vmul.f32 %v3943_v46, %v3943_v46 }
 0x222   : > { %v3986_v16 = vadd.f32 %v3985_v61, %v3955_v0 }
 0x224   : > { %v3987_v2 = vadd.f32 %v3986_v16, %v3956_v30 }
 0x226   : > { %v3988_v44 = vadd.f32 %v3987_v2, %v3957_v19 }
 0x228   : > { %v3989_v32 = vadd.f32 %v3988_v44, %v3958_v54 }
 0x22a   : > { %v3990_v26 = vadd.f32 %v3989_v32, %v3959_v21 }
 0x22c   : > { %v3991_v18 = vadd.f32 %v3990_v26, %v3960_v36 }
 0x22e   : > { %v3992_v63 = vadd.f32 %v3991_v18, %v3961_v13 }
 0x230   : > { %v3993_v20 = vadd.f32 %v3992_v63, %v3962_v25 }
 0x232   : > { %v3994_v58 = vadd.f32 %v3993_v20, %v3963_v41 }
 0x234   : > { %v3995_v8 = vadd.f32 %v3994_v58, %v3964_v49 }
 0x236   : > { %v3996_v28 = vadd.f32 %v3995_v8, %v3965_v37 }
 0x238   : > { %v3997_v45 = vadd.f32 %v3996_v28, %v3966_v27 }
 0x23a   : > { %v3998_v60 = vadd.f32 %v3997_v45, %v3967_v53 }
 0x23c   : > { %v3999_v39 = vadd.f32 %v3998_v60, %v3968_v17 }
 0x23e   : > { %v4000_v10 = vadd.f32 %v3999_v39, %v3969_v34 }
 0x240   : > { %v4001_v42 = vadd.f32 %v4000_v10, %v3970_v38 }
 0x242   : > { %v4002_v33 = vadd.f32 %v4001_v42, %v3971_v23 }
 0x244   : > { %v4003_v51 = vadd.f32 %v4002_v33, %v3972_v12 }
 0x246   : > { %v4004_v9 = vadd.f32 %v4003_v51, %v3973_v4 }
 0x248   : > { %v4005_v48 = vadd.f32 %v4004_v9, %v3974_v40 }
 0x24a   : > { %v4006_v0 = vadd.f32 %v4005_v48, %v3975_v3 }
 0x24c   : > { %v4007_v61 = vrot.slane %v4006_v0, 4 }
 0x24e   : > { %v4008_v1 = vadd.f32 %v4007_v61, %v4006_v0 }
 0x250   : > { %v4009_v7 = vrot.slane %v4008_v1, 2 }
 0x252   : > { %v4010_v30 = vadd.f32 %v4009_v7, %v4008_v1 }
 0x254   : > { %v4011_v16 = vrot.slane %v4010_v30, 1 }
 0x256   : > { %v4012_v15 = vadd.f32 %v4011_v16, %v4010_v30 }
 0x258   : > { %v4014_v22 = vsel %vm4013_vm1, %v7032_v31, %v4012_v15 }
 0x259   : > { %4015 = vst [vmem:[%s221_s22] sm:$0x3] %v4014_v22 }
 0x25a PF: > { %s14_s14 = sadd.s32 1, %s5429_s14   ;;  %s7377_s12 = smov %s5425_s13 }
 0x25b   : > { %p11_p5 = scmp.ge.s32.totalorder %s14_s14, 4   ;;  %s7378_s13 = smov %s7380_s15 }
 0x25d   :  { %13 = sbr.rel (!%p11_p5) target bundleno = 2 (0x2), region = 91 }

// kernel: bridge_forward.6
= control target key start
LH: loop header
LB: loop body
LE: loop exit
PB: predicated region body
PF: predicated region fallthrough
CT: control target
= control target key end

     0   :  { %s4993_s12 = smov 0   ;;  %s4995_s13 = smov 0   ;;  %s6748_s0 = inlined_call_operand.vmem [shape: f32[2,18,18,128], index: 0, kind: input, shape index: {}]   ;;  %s6749_s1 = inlined_call_operand.vmem [shape: f32[3,3,128,128], index: 1, kind: input, shape index: {}]   ;;  %s6750_s2 = inlined_call_operand.vmem [shape: f32[2,256,128], index: 2, kind: output, shape index: {0}]   ;;  %s6751_s3 = inlined_call_operand.vmem [shape: f32[2,2,128], index: 3, kind: output, shape index: {1}]  }
   0x1   :  { %s4997_s14 = smov 0  }
   0x2 LB: > { %s26_s15 = sadd.s32 1, %s4967_s13  ;;  %p3412_p0 = scmp.ge.s32.totalorder %s4971_s14, 1  ;;  %s4971_s14 = sphi %s4997_s14, %s14_s14   ;;  %s4967_s13 = sphi %s4995_s13, %s6919_s13   ;;  %s4963_s12 = sphi %s4993_s12, %s6918_s12  }
   0x3   : > { %p28_p1 = scmp.ge.s32.totalorder %s26_s15, 2  ;;  %p168_p2 = scmp.lt.s32.totalorder %s4971_s14, 3 }
   0x5   : > { %s6921_s15 = smov (%p28_p1, %s26_s15), 0  ;;  %p169_p3 = pnand %p3412_p0, %p168_p2 }
   0x7   : > { %172 = sbr.rel (%p169_p3) target bundleno = 642 (0x282), region = 28 }
   0xc   : > { %v342_v0 = vld [vmem:[%s6749_s1 + $0x78] sm:$0xff]  ;;  %v341_v1 = vld [vmem:[%s6749_s1 + $0x70] sm:$0xff]  ;;  %v340_v2 = vld [vmem:[%s6749_s1 + $0x68] sm:$0xff]  ;;  %p204_p4 = scmp.lt.s32.totalorder %s4963_s12, 1  ;;  %vm3288_vm0 = vcmask 1040384  }
   0xd   : > { %4892 = vmatprep.subr.mxu1 %v342_v0  ;;  %4172 = vmatprep.subr.mxu0 %v342_v0  ;;  %v339_v3 = vld [vmem:[%s6749_s1 + $0x60] sm:$0xff]  ;;  %v338_v4 = vld [vmem:[%s6749_s1 + $0x58] sm:$0xff]  ;;  %v337_v5 = vld [vmem:[%s6749_s1 + $0x50] sm:$0xff] }
   0xe   : > { %4908 = vmatpush3.msra.mxu1 %v342_v0  ;;  %4173 = vmatpush3.msra.mxu0 %v342_v0  ;;  %v336_v6 = vld [vmem:[%s6749_s1 + $0x48] sm:$0xff]  ;;  %v335_v7 = vld [vmem:[%s6749_s1 + $0x40] sm:$0xff]  ;;  %v334_v8 = vld [vmem:[%s6749_s1 + $0x38] sm:$0xff]  ;;  %s6923_s12 = smov (!%p204_p4, %s4963_s12), 1 }
   0xf   : > { %4893 = vmatprep.subr.mxu1 %v341_v1  ;;  %4174 = vmatprep.subr.mxu0 %v341_v1  ;;  %v333_v9 = vld [vmem:[%s6749_s1 + $0x30] sm:$0xff]  ;;  %v332_v10 = vld [vmem:[%s6749_s1 + $0x28] sm:$0xff]  ;;  %v331_v11 = vld [vmem:[%s6749_s1 + $0x20] sm:$0xff]  ;;  %s4924_s19 = smul.u32 432, %s6923_s12  ;;  %s3416_s23 = sshll.u32 %s6923_s12, 1 }
  0x10   : > { %4909 = vmatpush3.msra.mxu1 %v341_v1  ;;  %4175 = vmatpush3.msra.mxu0 %v341_v1  ;;  %v330_v12 = vld [vmem:[%s6749_s1 + $0x18] sm:$0xff]  ;;  %v329_v13 = vld [vmem:[%s6749_s1 + $0x10] sm:$0xff]  ;;  %v328_v14 = vld [vmem:[%s6749_s1 + $0x8] sm:$0xff]  ;;  %s226_s27 = scalar_lea.vmem %s6751_s3, %s3416_s23 }
  0x11   : > { %4894 = vmatprep.subr.mxu1 %v340_v2  ;;  %4176 = vmatprep.subr.mxu0 %v340_v2  ;;  %s5066_s26 = scalar_lea.vmem %s6748_s0, %s4924_s19  ;;  %v327_v15 = vld [vmem:[%s6749_s1] sm:$0xff]  ;;  %v3432_v19 = vld [vmem:[%s6749_s1 + $0xf8] sm:$0xff]  ;;  %v3431_v22 = vld [vmem:[%s6749_s1 + $0xf0] sm:$0xff] }
  0x12   : > { %4910 = vmatpush3.msra.mxu1 %v340_v2  ;;  %4177 = vmatpush3.msra.mxu0 %v340_v2  ;;  %v5072_v16 = vld [vmem:[%s5066_s26 + $0xc0] sm:$0xff]  ;;  %v5076_v18 = vld [vmem:[%s5066_s26 + $0xc8] sm:$0xff]  ;;  %v3448_v21 = vld [vmem:[%s6749_s1 + $0x178] sm:$0xff] }
  0x13   : > { %4895 = vmatprep.subr.mxu1 %v339_v3  ;;  %4178 = vmatprep.subr.mxu0 %v339_v3  ;;  %v295_v17 = vld [vmem:[%s5066_s26] sm:$0xff]  ;;  %v296_v20 = vld [vmem:[%s5066_s26 + $0x8] sm:$0xff]  ;;  %v5091_v23 = vld [vmem:[%s5066_s26 + $0xd8] sm:$0xff] }
  0x14   : > { %4911 = vmatpush3.msra.mxu1 %v339_v3  ;;  %4179 = vmatpush3.msra.mxu0 %v339_v3  ;;  %v3447_v24 = vld [vmem:[%s6749_s1 + $0x170] sm:$0xff]  ;;  %v5097_v25 = vld [vmem:[%s5066_s26 + $0x18] sm:$0xff]  ;;  %v5100_v26 = vld [vmem:[%s5066_s26 + $0xe0] sm:$0xff] }
  0x15   : > { %4896 = vmatprep.subr.mxu1 %v338_v4  ;;  %4180 = vmatprep.subr.mxu0 %v338_v4  ;;  %v3430_v27 = vld [vmem:[%s6749_s1 + $0xe8] sm:$0xff]  ;;  %v5107_v28 = vld [vmem:[%s5066_s26 + $0x20] sm:$0xff]  ;;  %v5118_v31 = vld [vmem:[%s5066_s26 + $0xf0] sm:$0xff] }
  0x16   : > { %4912 = vmatpush3.msra.mxu1 %v338_v4  ;;  %4181 = vmatpush3.msra.mxu0 %v338_v4  ;;  %v3446_v29 = vld [vmem:[%s6749_s1 + $0x168] sm:$0xff]  ;;  %v3429_v30 = vld [vmem:[%s6749_s1 + $0xe0] sm:$0xff]  ;;  %v5125_v33 = vld [vmem:[%s5066_s26 + $0x30] sm:$0xff] }
  0x17   : > { %4897 = vmatprep.subr.mxu1 %v337_v5  ;;  %4182 = vmatprep.subr.mxu0 %v337_v5  ;;  %v3445_v32 = vld [vmem:[%s6749_s1 + $0x160] sm:$0xff]  ;;  %v5128_v34 = vld [vmem:[%s5066_s26 + $0xf8] sm:$0xff]  ;;  %v3427_v38 = vld [vmem:[%s6749_s1 + $0xd0] sm:$0xff] }
  0x18   : > { %4913 = vmatpush3.msra.mxu1 %v337_v5  ;;  %4183 = vmatpush3.msra.mxu0 %v337_v5  ;;  %v3428_v35 = vld [vmem:[%s6749_s1 + $0xd8] sm:$0xff]  ;;  %v5146_v39 = vld [vmem:[%s5066_s26 + $0x108] sm:$0xff]  ;;  %v3443_v40 = vld [vmem:[%s6749_s1 + $0x150] sm:$0xff] }
  0x19   : > { %4898 = vmatprep.subr.mxu1 %v336_v6  ;;  %4184 = vmatprep.subr.mxu0 %v336_v6  ;;  %v5135_v36 = vld [vmem:[%s5066_s26 + $0x38] sm:$0xff]  ;;  %v5153_v41 = vld [vmem:[%s5066_s26 + $0x48] sm:$0xff]  ;;  %v5156_v42 = vld [vmem:[%s5066_s26 + $0x110] sm:$0xff] }
  0x1a   : > { %4914 = vmatpush3.msra.mxu1 %v336_v6  ;;  %4185 = vmatpush3.msra.mxu0 %v336_v6  ;;  %v3444_v37 = vld [vmem:[%s6749_s1 + $0x158] sm:$0xff]  ;;  %v3426_v43 = vld [vmem:[%s6749_s1 + $0xc8] sm:$0xff]  ;;  %v5163_v44 = vld [vmem:[%s5066_s26 + $0x50] sm:$0xff] }
  0x1b   : > { %4899 = vmatprep.subr.mxu1 %v335_v7  ;;  %4186 = vmatprep.subr.mxu0 %v335_v7  ;;  %v3442_v45 = vld [vmem:[%s6749_s1 + $0x148] sm:$0xff]  ;;  %v3425_v46 = vld [vmem:[%s6749_s1 + $0xc0] sm:$0xff]  ;;  %v3424_v51 = vld [vmem:[%s6749_s1 + $0xb8] sm:$0xff] }
  0x1c   : > { %4915 = vmatpush3.msra.mxu1 %v335_v7  ;;  %4187 = vmatpush3.msra.mxu0 %v335_v7  ;;  %v5174_v47 = vld [vmem:[%s5066_s26 + $0x120] sm:$0xff]  ;;  %v5184_v50 = vld [vmem:[%s5066_s26 + $0x128] sm:$0xff]  ;;  %v3440_v53 = vld [vmem:[%s6749_s1 + $0x138] sm:$0xff] }
  0x1d   : > { %4900 = vmatprep.subr.mxu1 %v334_v8  ;;  %4188 = vmatprep.subr.mxu0 %v334_v8  ;;  %v3441_v48 = vld [vmem:[%s6749_s1 + $0x140] sm:$0xff]  ;;  %v5191_v52 = vld [vmem:[%s5066_s26 + $0x68] sm:$0xff]  ;;  %v3423_v54 = vld [vmem:[%s6749_s1 + $0xb0] sm:$0xff] }
  0x1e   : > { %4916 = vmatpush3.msra.mxu1 %v334_v8  ;;  %4189 = vmatpush3.msra.mxu0 %v334_v8  ;;  %v5181_v49 = vld [vmem:[%s5066_s26 + $0x60] sm:$0xff]  ;;  %v5202_v55 = vld [vmem:[%s5066_s26 + $0x138] sm:$0xff]  ;;  %v3439_v56 = vld [vmem:[%s6749_s1 + $0x130] sm:$0xff] }
  0x1f   : > { %4901 = vmatprep.subr.mxu1 %v333_v9  ;;  %4190 = vmatprep.subr.mxu0 %v333_v9  ;;  %v5209_v57 = vld [vmem:[%s5066_s26 + $0x78] sm:$0xff]  ;;  %v5212_v58 = vld [vmem:[%s5066_s26 + $0x140] sm:$0xff]  ;;  %v3422_v59 = vld [vmem:[%s6749_s1 + $0xa8] sm:$0xff] }
  0x20   : > { %4917 = vmatpush3.msra.mxu1 %v333_v9  ;;  %4191 = vmatpush3.msra.mxu0 %v333_v9  ;;  %v5219_v60 = vld [vmem:[%s5066_s26 + $0x80] sm:$0xff]  ;;  %v3438_v61 = vld [vmem:[%s6749_s1 + $0x128] sm:$0xff]  ;;  %v5230_v63 = vld [vmem:[%s5066_s26 + $0x150] sm:$0xff] }
  0x21   : > { %4902 = vmatprep.subr.mxu1 %v332_v10  ;;  %4192 = vmatprep.subr.mxu0 %v332_v10  ;;  %v3421_v62 = vld [vmem:[%s6749_s1 + $0xa0] sm:$0xff]  ;;  %v5237_v1 = vld [vmem:[%s5066_s26 + $0x90] sm:$0xff]  ;;  %v5240_v2 = vld [vmem:[%s5066_s26 + $0x158] sm:$0xff] }
  0x22   : > { %4918 = vmatpush3.msra.mxu1 %v332_v10  ;;  %4193 = vmatpush3.msra.mxu0 %v332_v10  ;;  %v3437_v0 = vld [vmem:[%s6749_s1 + $0x120] sm:$0xff]  ;;  %v3420_v3 = vld [vmem:[%s6749_s1 + $0x98] sm:$0xff]  ;;  %v3419_v6 = vld [vmem:[%s6749_s1 + $0x90] sm:$0xff] }
  0x23   : > { %4903 = vmatprep.subr.mxu1 %v331_v11  ;;  %4194 = vmatprep.subr.mxu0 %v331_v11  ;;  %v5247_v4 = vld [vmem:[%s5066_s26 + $0x98] sm:$0xff]  ;;  %v5258_v7 = vld [vmem:[%s5066_s26 + $0x168] sm:$0xff]  ;;  %v3435_v8 = vld [vmem:[%s6749_s1 + $0x110] sm:$0xff] }
  0x24   : > { %4919 = vmatpush3.msra.mxu1 %v331_v11  ;;  %4195 = vmatpush3.msra.mxu0 %v331_v11  ;;  %v3436_v5 = vld [vmem:[%s6749_s1 + $0x118] sm:$0xff]  ;;  %6782 = vst [vmem:[#allocation3_spill] sm:$0xff] %v5258_v7  ;;  %v5265_v9 = vld [vmem:[%s5066_s26 + $0xa8] sm:$0xff]  ;;  %v5268_v10 = vld [vmem:[%s5066_s26 + $0x170] sm:$0xff] }
  0x25   : > { %4904 = vmatprep.subr.mxu1 %v330_v12  ;;  %4196 = vmatprep.subr.mxu0 %v330_v12  ;;  %6783 = vst [vmem:[#allocation4_spill] sm:$0xff] %v5268_v10  ;;  %v3418_v11 = vld [vmem:[%s6749_s1 + $0x88] sm:$0xff] }
  0x26   : > { %4920 = vmatpush3.msra.mxu1 %v330_v12  ;;  %4197 = vmatpush3.msra.mxu0 %v330_v12  ;;  %v5275_v12 = vld [vmem:[%s5066_s26 + $0xb0] sm:$0xff] }
  0x27   : > { %4905 = vmatprep.subr.mxu1 %v329_v13  ;;  %4198 = vmatprep.subr.mxu0 %v329_v13 }
  0x28   : > { %4921 = vmatpush3.msra.mxu1 %v329_v13  ;;  %4199 = vmatpush3.msra.mxu0 %v329_v13  ;;  %v3434_v13 = vld [vmem:[%s6749_s1 + $0x108] sm:$0xff] }
  0x29   : > { %4906 = vmatprep.subr.mxu1 %v328_v14  ;;  %4200 = vmatprep.subr.mxu0 %v328_v14 }
  0x2a   : > { %4922 = vmatpush3.msra.mxu1 %v328_v14  ;;  %4201 = vmatpush3.msra.mxu0 %v328_v14  ;;  %v3417_v14 = vld [vmem:[%s6749_s1 + $0x80] sm:$0xff] }
  0x2b   : > { %4907 = vmatprep.subr.mxu1 %v327_v15  ;;  %4202 = vmatprep.subr.mxu0 %v327_v15 }
  0x2c   : > { %4923 = vmatpush3.msra.mxu1 %v327_v15  ;;  %4228 = vmatprep.mubr.f32.mxu1 %v5072_v16 }
  0x2d   : > { %4203 = vmatpush3.msra.mxu0 %v327_v15  ;;  %4204 = vmatprep.mubr.f32.mxu0 %v295_v17  ;;  %v600_v15 = vld [vmem:[%s5066_s26 + $0x1] sm:$0xff] }
  0x2e   : > { %4229 = vmatmul.mubr.f32.vlgmr.msra.gmra.mxu1 %v5076_v18  ;;  %4252 = vmatprep.subr.mxu1 %v3432_v19  ;;  %v3433_v17 = vld [vmem:[%s6749_s1 + $0x100] sm:$0xff] }
  0x2f   : > { %4205 = vmatmul.mubr.f32.vlgmr.msra.gmra.mxu0 %v296_v20  ;;  %4253 = vmatpush3.msra.mxu1 %v3432_v19  ;;  %v601_v19 = vld [vmem:[%s5066_s26 + $0x9] sm:$0xff] }
  0x30   : > { %4332 = vmatprep.subr.mxu0 %v3448_v21  ;;  %4254 = vmatprep.subr.mxu1 %v3431_v22  ;;  %v906_v20 = vld [vmem:[%s5066_s26 + $0x2] sm:$0xff] }
  0x31   : > { %4333 = vmatpush3.msra.mxu0 %v3448_v21  ;;  %4231 = vmatprep.mubr.f32.mxu1 %v5091_v23  ;;  %v3496_v21 = vld [vmem:[%s6749_s1 + $0x1f8] sm:$0xff] }
  0x32   : > { %4255 = vmatpush3.msra.mxu1 %v3431_v22  ;;  %4334 = vmatprep.subr.mxu0 %v3447_v24  ;;  %v907_v22 = vld [vmem:[%s5066_s26 + $0xa] sm:$0xff] }
  0x33   : > { %4207 = vmatprep.mubr.f32.mxu0 %v5097_v25  ;;  %4232 = vmatmul.mubr.f32.gmra.mxu1 %v5100_v26 }
  0x34   : > { %4256 = vmatprep.subr.mxu1 %v3430_v27  ;;  %4335 = vmatpush3.msra.mxu0 %v3447_v24  ;;  %v3544_v24 = vld [vmem:[%s6749_s1 + $0x278] sm:$0xff] }
  0x35   : > { %4208 = vmatmul.mubr.f32.gmra.mxu0 %v5107_v28  ;;  %4257 = vmatpush3.msra.mxu1 %v3430_v27  ;;  %v5300_v27 = vld [vmem:[%s5066_s26 + $0x19] sm:$0xff] }
  0x36   : > { %4336 = vmatprep.subr.mxu0 %v3446_v29  ;;  %4258 = vmatprep.subr.mxu1 %v3429_v30 }
  0x37   : > { %4337 = vmatpush3.msra.mxu0 %v3446_v29  ;;  %4234 = vmatprep.mubr.f32.mxu1 %v5118_v31  ;;  %v5303_v29 = vld [vmem:[%s5066_s26 + $0x21] sm:$0xff] }
  0x38   : > { %4259 = vmatpush3.msra.mxu1 %v3429_v30  ;;  %4338 = vmatprep.subr.mxu0 %v3445_v32  ;;  %v5306_v30 = vld [vmem:[%s5066_s26 + $0x1a] sm:$0xff] }
  0x39   : > { %4210 = vmatprep.mubr.f32.mxu0 %v5125_v33  ;;  %4235 = vmatmul.mubr.f32.gmra.mxu1 %v5128_v34  ;;  %6784 = vst [vmem:[#allocation5_spill] sm:$0xff] %v5306_v30 }
  0x3a   : > { %4260 = vmatprep.subr.mxu1 %v3428_v35  ;;  %4339 = vmatpush3.msra.mxu0 %v3445_v32  ;;  %v3495_v32 = vld [vmem:[%s6749_s1 + $0x1f0] sm:$0xff] }
  0x3b   : > { %4211 = vmatmul.mubr.f32.gmra.mxu0 %v5135_v36  ;;  %4261 = vmatpush3.msra.mxu1 %v3428_v35  ;;  %v5313_v35 = vld [vmem:[%s5066_s26 + $0x22] sm:$0xff] }
  0x3c   : > { %4340 = vmatprep.subr.mxu0 %v3444_v37  ;;  %4262 = vmatprep.subr.mxu1 %v3427_v38  ;;  %6785 = vst [vmem:[#allocation6_spill] sm:$0xff] %v5313_v35 }
  0x3d   : > { %4341 = vmatpush3.msra.mxu0 %v3444_v37  ;;  %4237 = vmatprep.mubr.f32.mxu1 %v5146_v39  ;;  %v3543_v37 = vld [vmem:[%s6749_s1 + $0x270] sm:$0xff] }
  0x3e   : > { %4263 = vmatpush3.msra.mxu1 %v3427_v38  ;;  %4342 = vmatprep.subr.mxu0 %v3443_v40  ;;  %v5320_v38 = vld [vmem:[%s5066_s26 + $0x31] sm:$0xff] }
  0x3f   : > { %4213 = vmatprep.mubr.f32.mxu0 %v5153_v41  ;;  %4238 = vmatmul.mubr.f32.gmra.mxu1 %v5156_v42 }
  0x40   : > { %4264 = vmatprep.subr.mxu1 %v3426_v43  ;;  %4343 = vmatpush3.msra.mxu0 %v3443_v40  ;;  %v5324_v40 = vld [vmem:[%s5066_s26 + $0x39] sm:$0xff] }
  0x41   : > { %4214 = vmatmul.mubr.f32.gmra.mxu0 %v5163_v44  ;;  %4265 = vmatpush3.msra.mxu1 %v3426_v43  ;;  %v5328_v43 = vld [vmem:[%s5066_s26 + $0x32] sm:$0xff] }
  0x42   : > { %4344 = vmatprep.subr.mxu0 %v3442_v45  ;;  %4266 = vmatprep.subr.mxu1 %v3425_v46  ;;  %6786 = vst [vmem:[#allocation7_spill] sm:$0xff] %v5328_v43 }
  0x43   : > { %4345 = vmatpush3.msra.mxu0 %v3442_v45  ;;  %4240 = vmatprep.mubr.f32.mxu1 %v5174_v47  ;;  %v3494_v45 = vld [vmem:[%s6749_s1 + $0x1e8] sm:$0xff] }
  0x44   : > { %4267 = vmatpush3.msra.mxu1 %v3425_v46  ;;  %4346 = vmatprep.subr.mxu0 %v3441_v48  ;;  %v5335_v46 = vld [vmem:[%s5066_s26 + $0x3a] sm:$0xff] }
  0x45   : > { %4216 = vmatprep.mubr.f32.mxu0 %v5181_v49  ;;  %4241 = vmatmul.mubr.f32.gmra.mxu1 %v5184_v50  ;;  %6787 = vst [vmem:[#allocation8_spill] sm:$0xff] %v5335_v46 }
  0x46   : > { %4268 = vmatprep.subr.mxu1 %v3424_v51  ;;  %4347 = vmatpush3.msra.mxu0 %v3441_v48  ;;  %v3542_v48 = vld [vmem:[%s6749_s1 + $0x268] sm:$0xff] }
  0x47   : > { %4217 = vmatmul.mubr.f32.gmra.mxu0 %v5191_v52  ;;  %4269 = vmatpush3.msra.mxu1 %v3424_v51  ;;  %v5342_v51 = vld [vmem:[%s5066_s26 + $0x49] sm:$0xff] }
  0x48   : > { %4348 = vmatprep.subr.mxu0 %v3440_v53  ;;  %4270 = vmatprep.subr.mxu1 %v3423_v54 }
  0x49   : > { %4349 = vmatpush3.msra.mxu0 %v3440_v53  ;;  %4243 = vmatprep.mubr.f32.mxu1 %v5202_v55  ;;  %v5346_v53 = vld [vmem:[%s5066_s26 + $0x51] sm:$0xff] }
  0x4a   : > { %4271 = vmatpush3.msra.mxu1 %v3423_v54  ;;  %4350 = vmatprep.subr.mxu0 %v3439_v56  ;;  %v5350_v54 = vld [vmem:[%s5066_s26 + $0x4a] sm:$0xff] }
  0x4b   : > { %4219 = vmatprep.mubr.f32.mxu0 %v5209_v57  ;;  %4244 = vmatmul.mubr.f32.gmra.mxu1 %v5212_v58  ;;  %6788 = vst [vmem:[#allocation9_spill] sm:$0xff] %v5350_v54 }
  0x4c   : > { %4272 = vmatprep.subr.mxu1 %v3422_v59  ;;  %4351 = vmatpush3.msra.mxu0 %v3439_v56  ;;  %v3493_v56 = vld [vmem:[%s6749_s1 + $0x1e0] sm:$0xff] }
  0x4d   : > { %4220 = vmatmul.mubr.f32.gmra.mxu0 %v5219_v60  ;;  %4273 = vmatpush3.msra.mxu1 %v3422_v59  ;;  %v5357_v59 = vld [vmem:[%s5066_s26 + $0x52] sm:$0xff] }
  0x4e   : > { %4352 = vmatprep.subr.mxu0 %v3438_v61  ;;  %4274 = vmatprep.subr.mxu1 %v3421_v62  ;;  %6789 = vst [vmem:[#allocation10_spill] sm:$0xff] %v5357_v59 }
  0x4f   : > { %4353 = vmatpush3.msra.mxu0 %v3438_v61  ;;  %4246 = vmatprep.mubr.f32.mxu1 %v5230_v63  ;;  %v3541_v61 = vld [vmem:[%s6749_s1 + $0x260] sm:$0xff] }
  0x50   : > { %4275 = vmatpush3.msra.mxu1 %v3421_v62  ;;  %4354 = vmatprep.subr.mxu0 %v3437_v0  ;;  %v5364_v62 = vld [vmem:[%s5066_s26 + $0x61] sm:$0xff] }
  0x51   : > { %4222 = vmatprep.mubr.f32.mxu0 %v5237_v1  ;;  %4247 = vmatmul.mubr.f32.gmra.mxu1 %v5240_v2 }
  0x52   : > { %4276 = vmatprep.subr.mxu1 %v3420_v3  ;;  %4355 = vmatpush3.msra.mxu0 %v3437_v0  ;;  %v5368_v0 = vld [vmem:[%s5066_s26 + $0x69] sm:$0xff] }
  0x53   : > { %4223 = vmatmul.mubr.f32.gmra.mxu0 %v5247_v4  ;;  %4277 = vmatpush3.msra.mxu1 %v3420_v3  ;;  %v5372_v3 = vld [vmem:[%s5066_s26 + $0x62] sm:$0xff] }
  0x54   : > { %4356 = vmatprep.subr.mxu0 %v3436_v5  ;;  %4278 = vmatprep.subr.mxu1 %v3419_v6  ;;  %6790 = vst [vmem:[#allocation11_spill] sm:$0xff] %v5372_v3 }
  0x55   : > { %4357 = vmatpush3.msra.mxu0 %v3436_v5  ;;  %4249 = vmatprep.mubr.f32.mxu1 %v5258_v7  ;;  %v3492_v5 = vld [vmem:[%s6749_s1 + $0x1d8] sm:$0xff]  ;;  %v5614_v7 = vld [vmem:[%s5066_s26 + $0x16a] sm:$0xff] }
  0x56   : > { %4279 = vmatpush3.msra.mxu1 %v3419_v6  ;;  %4358 = vmatprep.subr.mxu0 %v3435_v8  ;;  %v5379_v6 = vld [vmem:[%s5066_s26 + $0x6a] sm:$0xff] }
  0x57   : > { %4225 = vmatprep.mubr.f32.mxu0 %v5265_v9  ;;  %4250 = vmatmul.mubr.f32.gmra.mxu1 %v5268_v10  ;;  %6791 = vst [vmem:[#allocation12_spill] sm:$0xff] %v5379_v6  ;;  %v5599_v10 = vld [vmem:[%s5066_s26 + $0x15a] sm:$0xff] }
  0x58   : > { %4280 = vmatprep.subr.mxu1 %v3418_v11  ;;  %4359 = vmatpush3.msra.mxu0 %v3435_v8  ;;  %v3540_v8 = vld [vmem:[%s6749_s1 + $0x258] sm:$0xff] }
  0x59   : > { %4226 = vmatmul.mubr.f32.gmra.mxu0 %v5275_v12  ;;  %4281 = vmatpush3.msra.mxu1 %v3418_v11  ;;  %v5386_v11 = vld [vmem:[%s5066_s26 + $0x79] sm:$0xff] }
  0x5a   : > { %4360 = vmatprep.subr.mxu0 %v3434_v13  ;;  %4282 = vmatprep.subr.mxu1 %v3417_v14 }
  0x5b   : > { %4361 = vmatpush3.msra.mxu0 %v3434_v13  ;;  %4283 = vmatpush3.msra.mxu1 %v3417_v14  ;;  %v5390_v13 = vld [vmem:[%s5066_s26 + $0x81] sm:$0xff] }
  0x5c   : > { %4284 = vmatprep.mubr.f32.mxu1 %v600_v15  ;;  %4362 = vmatprep.subr.mxu0 %v3433_v17  ;;  %v5394_v14 = vld [vmem:[%s5066_s26 + $0x7a] sm:$0xff]  ;;  %v3491_v15 = vld [vmem:[%s6749_s1 + $0x1d0] sm:$0xff] }
  0x5d   : > { %4285 = vmatmul.mubr.f32.vlgmr.msra.gmra.mxu1 %v601_v19  ;;  %4363 = vmatpush3.msra.mxu0 %v3433_v17  ;;  %6792 = vst [vmem:[#allocation13_spill] sm:$0xff] %v5394_v14  ;;  %v5401_v17 = vld [vmem:[%s5066_s26 + $0x82] sm:$0xff]  ;;  %v3539_v19 = vld [vmem:[%s6749_s1 + $0x250] sm:$0xff] }
  0x5e   : > { %4364 = vmatprep.mubr.f32.mxu0 %v906_v20  ;;  %4412 = vmatprep.subr.mxu1 %v3496_v21  ;;  %6793 = vst [vmem:[#allocation14_spill] sm:$0xff] %v5401_v17  ;;  %v5408_v20 = vld [vmem:[%s5066_s26 + $0x91] sm:$0xff] }
  0x5f   : > { %4365 = vmatmul.mubr.f32.vlgmr.msra.gmra.mxu0 %v907_v22  ;;  %4413 = vmatpush3.msra.mxu1 %v3496_v21  ;;  %v5412_v21 = vld [vmem:[%s5066_s26 + $0x99] sm:$0xff] }
  0x60   : > { %4492 = vmatprep.subr.mxu0 %v3544_v24  ;;  %4287 = vmatprep.mubr.f32.mxu1 %v5300_v27  ;;  %v5416_v22 = vld [vmem:[%s5066_s26 + $0x92] sm:$0xff] }
  0x61   : > { %4493 = vmatpush3.msra.mxu0 %v3544_v24  ;;  %4288 = vmatmul.mubr.f32.gmra.mxu1 %v5303_v29  ;;  %6794 = vst [vmem:[#allocation15_spill] sm:$0xff] %v5416_v22  ;;  %v3490_v24 = vld [vmem:[%s6749_s1 + $0x1c8] sm:$0xff] }
  0x62   : > { %4367 = vmatprep.mubr.f32.mxu0 %v5306_v30  ;;  %4414 = vmatprep.subr.mxu1 %v3495_v32  ;;  %v3482_v30 = vld [vmem:[%s6749_s1 + $0x188] sm:$0xff] }
  0x63   : > { %4368 = vmatmul.mubr.f32.gmra.mxu0 %v5313_v35  ;;  %4415 = vmatpush3.msra.mxu1 %v3495_v32  ;;  %v5423_v32 = vld [vmem:[%s5066_s26 + $0x9a] sm:$0xff]  ;;  %v5577_v35 = vld [vmem:[%s5066_s26 + $0x142] sm:$0xff] }
  0x64   : > { %4494 = vmatprep.subr.mxu0 %v3543_v37  ;;  %4290 = vmatprep.mubr.f32.mxu1 %v5320_v38  ;;  %6795 = vst [vmem:[#allocation16_spill] sm:$0xff] %v5423_v32  ;;  %6809 = vst [vmem:[#allocation30_spill] sm:$0xff] %v5577_v35 }
  0x65   : > { %4495 = vmatpush3.msra.mxu0 %v3543_v37  ;;  %4291 = vmatmul.mubr.f32.gmra.mxu1 %v5324_v40  ;;  %v3538_v37 = vld [vmem:[%s6749_s1 + $0x248] sm:$0xff] }
  0x66   : > { %4370 = vmatprep.mubr.f32.mxu0 %v5328_v43  ;;  %4416 = vmatprep.subr.mxu1 %v3494_v45  ;;  %v3483_v43 = vld [vmem:[%s6749_s1 + $0x190] sm:$0xff] }
  0x67   : > { %4371 = vmatmul.mubr.f32.gmra.mxu0 %v5335_v46  ;;  %4417 = vmatpush3.msra.mxu1 %v3494_v45  ;;  %v5430_v45 = vld [vmem:[%s5066_s26 + $0xa9] sm:$0xff] }
  0x68   : > { %4496 = vmatprep.subr.mxu0 %v3542_v48  ;;  %4293 = vmatprep.mubr.f32.mxu1 %v5342_v51  ;;  %v5555_v46 = vld [vmem:[%s5066_s26 + $0x12a] sm:$0xff] }
  0x69   : > { %4497 = vmatpush3.msra.mxu0 %v3542_v48  ;;  %4294 = vmatmul.mubr.f32.gmra.mxu1 %v5346_v53  ;;  %v5434_v48 = vld [vmem:[%s5066_s26 + $0xb1] sm:$0xff]  ;;  %6807 = vst [vmem:[#allocation28_spill] sm:$0xff] %v5555_v46 }
  0x6a   : > { %4373 = vmatprep.mubr.f32.mxu0 %v5350_v54  ;;  %4418 = vmatprep.subr.mxu1 %v3493_v56  ;;  %v3484_v54 = vld [vmem:[%s6749_s1 + $0x198] sm:$0xff] }
  0x6b   : > { %4374 = vmatmul.mubr.f32.gmra.mxu0 %v5357_v59  ;;  %4419 = vmatpush3.msra.mxu1 %v3493_v56  ;;  %v5438_v56 = vld [vmem:[%s5066_s26 + $0xaa] sm:$0xff]  ;;  %v5533_v59 = vld [vmem:[%s5066_s26 + $0x112] sm:$0xff] }
  0x6c   : > { %4498 = vmatprep.subr.mxu0 %v3541_v61  ;;  %4296 = vmatprep.mubr.f32.mxu1 %v5364_v62  ;;  %6796 = vst [vmem:[#allocation17_spill] sm:$0xff] %v5438_v56  ;;  %6805 = vst [vmem:[#allocation26_spill] sm:$0xff] %v5533_v59 }
  0x6d   : > { %4499 = vmatpush3.msra.mxu0 %v3541_v61  ;;  %4297 = vmatmul.mubr.f32.gmra.mxu1 %v5368_v0  ;;  %v3489_v61 = vld [vmem:[%s6749_s1 + $0x1c0] sm:$0xff] }
  0x6e   : > { %4376 = vmatprep.mubr.f32.mxu0 %v5372_v3  ;;  %4420 = vmatprep.subr.mxu1 %v3492_v5  ;;  %v3485_v3 = vld [vmem:[%s6749_s1 + $0x1a0] sm:$0xff] }
  0x6f   : > { %4377 = vmatmul.mubr.f32.gmra.mxu0 %v5379_v6  ;;  %4421 = vmatpush3.msra.mxu1 %v3492_v5  ;;  %v5445_v5 = vld [vmem:[%s5066_s26 + $0xb2] sm:$0xff]  ;;  %v5511_v6 = vld [vmem:[%s5066_s26 + $0xfa] sm:$0xff] }
  0x70   : > { %4500 = vmatprep.subr.mxu0 %v3540_v8  ;;  %4299 = vmatprep.mubr.f32.mxu1 %v5386_v11  ;;  %6797 = vst [vmem:[#allocation18_spill] sm:$0xff] %v5445_v5  ;;  %6803 = vst [vmem:[#allocation24_spill] sm:$0xff] %v5511_v6 }
  0x71   : > { %4501 = vmatpush3.msra.mxu0 %v3540_v8  ;;  %4300 = vmatmul.mubr.f32.gmra.mxu1 %v5390_v13  ;;  %v3537_v8 = vld [vmem:[%s6749_s1 + $0x240] sm:$0xff] }
  0x72   : > { %4379 = vmatprep.mubr.f32.mxu0 %v5394_v14  ;;  %4422 = vmatprep.subr.mxu1 %v3491_v15  ;;  %v3486_v14 = vld [vmem:[%s6749_s1 + $0x1a8] sm:$0xff] }
  0x73   : > { %4380 = vmatmul.mubr.f32.gmra.mxu0 %v5401_v17  ;;  %4423 = vmatpush3.msra.mxu1 %v3491_v15  ;;  %v5452_v15 = vld [vmem:[%s5066_s26 + $0xc1] sm:$0xff] }
  0x74   : > { %4502 = vmatprep.subr.mxu0 %v3539_v19  ;;  %4302 = vmatprep.mubr.f32.mxu1 %v5408_v20  ;;  %v5489_v17 = vld [vmem:[%s5066_s26 + $0xe2] sm:$0xff] }
  0x75   : > { %4503 = vmatpush3.msra.mxu0 %v3539_v19  ;;  %4303 = vmatmul.mubr.f32.gmra.mxu1 %v5412_v21  ;;  %v5456_v19 = vld [vmem:[%s5066_s26 + $0xc9] sm:$0xff]  ;;  %6801 = vst [vmem:[#allocation22_spill] sm:$0xff] %v5489_v17 }
  0x76   : > { %4382 = vmatprep.mubr.f32.mxu0 %v5416_v22  ;;  %4424 = vmatprep.subr.mxu1 %v3490_v24  ;;  %v3487_v22 = vld [vmem:[%s6749_s1 + $0x1b0] sm:$0xff] }
  0x77   : > { %4383 = vmatmul.mubr.f32.gmra.mxu0 %v5423_v32  ;;  %4425 = vmatpush3.msra.mxu1 %v3490_v24  ;;  %v5460_v24 = vld [vmem:[%s5066_s26 + $0xc2] sm:$0xff]  ;;  %v5467_v32 = vld [vmem:[%s5066_s26 + $0xca] sm:$0xff] }
  0x78   : > { %4504 = vmatprep.subr.mxu0 %v3538_v37  ;;  %4305 = vmatprep.mubr.f32.mxu1 %v5430_v45  ;;  %6798 = vst [vmem:[#allocation19_spill] sm:$0xff] %v5460_v24  ;;  %6799 = vst [vmem:[#allocation20_spill] sm:$0xff] %v5467_v32 }
  0x79   : > { %4505 = vmatpush3.msra.mxu0 %v3538_v37  ;;  %4306 = vmatmul.mubr.f32.gmra.mxu1 %v5434_v48  ;;  %v3488_v37 = vld [vmem:[%s6749_s1 + $0x1b8] sm:$0xff] }
  0x7a   : > { %4385 = vmatprep.mubr.f32.mxu0 %v5438_v56  ;;  %4426 = vmatprep.subr.mxu1 %v3489_v61  ;;  %v5478_v56 = vld [vmem:[%s5066_s26 + $0xe1] sm:$0xff] }
  0x7b   : > { %4386 = vmatmul.mubr.f32.gmra.mxu0 %v5445_v5  ;;  %4427 = vmatpush3.msra.mxu1 %v3489_v61  ;;  %v3536_v61 = vld [vmem:[%s6749_s1 + $0x238] sm:$0xff] }
  0x7c   : > { %4506 = vmatprep.subr.mxu0 %v3537_v8  ;;  %4308 = vmatprep.mubr.f32.mxu1 %v5452_v15  ;;  %v5474_v5 = vld [vmem:[%s5066_s26 + $0xd9] sm:$0xff] }
  0x7d   : > { %4507 = vmatpush3.msra.mxu0 %v3537_v8  ;;  %4309 = vmatmul.mubr.f32.gmra.mxu1 %v5456_v19  ;;  %v5482_v8 = vld [vmem:[%s5066_s26 + $0xda] sm:$0xff] }
  0x7e   : > { %4388 = vmatprep.mubr.f32.mxu0 %v5460_v24  ;;  %4428 = vmatprep.subr.mxu1 %v3488_v37  ;;  %6800 = vst [vmem:[#allocation21_spill] sm:$0xff] %v5482_v8  ;;  %v5500_v24 = vld [vmem:[%s5066_s26 + $0xf9] sm:$0xff] }
  0x7f   : > { %4389 = vmatmul.mubr.f32.gmra.mxu0 %v5467_v32  ;;  %4429 = vmatpush3.msra.mxu1 %v3488_v37  ;;  %v3535_v37 = vld [vmem:[%s6749_s1 + $0x230] sm:$0xff] }
  0x80   : > { %4508 = vmatprep.subr.mxu0 %v3536_v61  ;;  %4311 = vmatprep.mubr.f32.mxu1 %v5474_v5  ;;  %v5496_v32 = vld [vmem:[%s5066_s26 + $0xf1] sm:$0xff] }
  0x81   : > { %4509 = vmatpush3.msra.mxu0 %v3536_v61  ;;  %4312 = vmatmul.mubr.f32.gmra.mxu1 %v5478_v56  ;;  %v5504_v61 = vld [vmem:[%s5066_s26 + $0xf2] sm:$0xff] }
  0x82   : > { %4391 = vmatprep.mubr.f32.mxu0 %v5482_v8  ;;  %4430 = vmatprep.subr.mxu1 %v3487_v22  ;;  %6802 = vst [vmem:[#allocation23_spill] sm:$0xff] %v5504_v61  ;;  %v5522_v8 = vld [vmem:[%s5066_s26 + $0x111] sm:$0xff] }
  0x83   : > { %4392 = vmatmul.mubr.f32.gmra.mxu0 %v5489_v17  ;;  %4431 = vmatpush3.msra.mxu1 %v3487_v22  ;;  %v3534_v22 = vld [vmem:[%s6749_s1 + $0x228] sm:$0xff] }
  0x84   : > { %4510 = vmatprep.subr.mxu0 %v3535_v37  ;;  %4314 = vmatprep.mubr.f32.mxu1 %v5496_v32  ;;  %v5518_v17 = vld [vmem:[%s5066_s26 + $0x109] sm:$0xff] }
  0x85   : > { %4511 = vmatpush3.msra.mxu0 %v3535_v37  ;;  %4315 = vmatmul.mubr.f32.gmra.mxu1 %v5500_v24  ;;  %v5526_v37 = vld [vmem:[%s5066_s26 + $0x10a] sm:$0xff] }
  0x86   : > { %4394 = vmatprep.mubr.f32.mxu0 %v5504_v61  ;;  %4432 = vmatprep.subr.mxu1 %v3486_v14  ;;  %6804 = vst [vmem:[#allocation25_spill] sm:$0xff] %v5526_v37  ;;  %v5544_v61 = vld [vmem:[%s5066_s26 + $0x129] sm:$0xff] }
  0x87   : > { %4395 = vmatmul.mubr.f32.gmra.mxu0 %v5511_v6  ;;  %4433 = vmatpush3.msra.mxu1 %v3486_v14  ;;  %v3533_v14 = vld [vmem:[%s6749_s1 + $0x220] sm:$0xff] }
  0x88   : > { %4512 = vmatprep.subr.mxu0 %v3534_v22  ;;  %4317 = vmatprep.mubr.f32.mxu1 %v5518_v17  ;;  %v5540_v6 = vld [vmem:[%s5066_s26 + $0x121] sm:$0xff] }
  0x89   : > { %4513 = vmatpush3.msra.mxu0 %v3534_v22  ;;  %4318 = vmatmul.mubr.f32.gmra.mxu1 %v5522_v8  ;;  %v5548_v22 = vld [vmem:[%s5066_s26 + $0x122] sm:$0xff] }
  0x8a   : > { %4397 = vmatprep.mubr.f32.mxu0 %v5526_v37  ;;  %4434 = vmatprep.subr.mxu1 %v3485_v3  ;;  %6806 = vst [vmem:[#allocation27_spill] sm:$0xff] %v5548_v22  ;;  %v5566_v37 = vld [vmem:[%s5066_s26 + $0x141] sm:$0xff] }
  0x8b   : > { %4398 = vmatmul.mubr.f32.gmra.mxu0 %v5533_v59  ;;  %4435 = vmatpush3.msra.mxu1 %v3485_v3  ;;  %v3532_v3 = vld [vmem:[%s6749_s1 + $0x218] sm:$0xff] }
  0x8c   : > { %4514 = vmatprep.subr.mxu0 %v3533_v14  ;;  %4320 = vmatprep.mubr.f32.mxu1 %v5540_v6  ;;  %v5562_v59 = vld [vmem:[%s5066_s26 + $0x139] sm:$0xff] }
  0x8d   : > { %4515 = vmatpush3.msra.mxu0 %v3533_v14  ;;  %4321 = vmatmul.mubr.f32.gmra.mxu1 %v5544_v61  ;;  %v5570_v14 = vld [vmem:[%s5066_s26 + $0x13a] sm:$0xff] }
  0x8e   : > { %4400 = vmatprep.mubr.f32.mxu0 %v5548_v22  ;;  %4436 = vmatprep.subr.mxu1 %v3484_v54  ;;  %6808 = vst [vmem:[#allocation29_spill] sm:$0xff] %v5570_v14  ;;  %v5588_v22 = vld [vmem:[%s5066_s26 + $0x159] sm:$0xff] }
  0x8f   : > { %4401 = vmatmul.mubr.f32.gmra.mxu0 %v5555_v46  ;;  %4437 = vmatpush3.msra.mxu1 %v3484_v54  ;;  %v3531_v54 = vld [vmem:[%s6749_s1 + $0x210] sm:$0xff]  ;;  %6810 = vst [vmem:[#allocation31_spill] sm:$0xff] %v5588_v22 }
  0x90   : > { %4516 = vmatprep.subr.mxu0 %v3532_v3  ;;  %4323 = vmatprep.mubr.f32.mxu1 %v5562_v59  ;;  %v5584_v46 = vld [vmem:[%s5066_s26 + $0x151] sm:$0xff] }
  0x91   : > { %4517 = vmatpush3.msra.mxu0 %v3532_v3  ;;  %4324 = vmatmul.mubr.f32.gmra.mxu1 %v5566_v37  ;;  %v5592_v3 = vld [vmem:[%s5066_s26 + $0x152] sm:$0xff] }
  0x92   : > { %4403 = vmatprep.mubr.f32.mxu0 %v5570_v14  ;;  %4438 = vmatprep.subr.mxu1 %v3483_v43  ;;  %6811 = vst [vmem:[#allocation32_spill] sm:$0xff] %v5592_v3  ;;  %v5610_v14 = vld [vmem:[%s5066_s26 + $0x171] sm:$0xff] }
  0x93   : > { %4404 = vmatmul.mubr.f32.gmra.mxu0 %v5577_v35  ;;  %4439 = vmatpush3.msra.mxu1 %v3483_v43  ;;  %v3530_v35 = vld [vmem:[%s6749_s1 + $0x208] sm:$0xff] }
  0x94   : > { %4518 = vmatprep.subr.mxu0 %v3531_v54  ;;  %4326 = vmatprep.mubr.f32.mxu1 %v5584_v46  ;;  %v5606_v43 = vld [vmem:[%s5066_s26 + $0x169] sm:$0xff] }
  0x95   : > { %4519 = vmatpush3.msra.mxu0 %v3531_v54  ;;  %4327 = vmatmul.mubr.f32.gmra.mxu1 %v5588_v22  ;;  %v3481_v54 = vld [vmem:[%s6749_s1 + $0x180] sm:$0xff]  ;;  %v5621_v22 = vld [vmem:[%s5066_s26 + $0x172] sm:$0xff] }
  0x96   : > { %4406 = vmatprep.mubr.f32.mxu0 %v5592_v3  ;;  %4440 = vmatprep.subr.mxu1 %v3482_v30  ;;  %v3529_v3 = vld [vmem:[%s6749_s1 + $0x200] sm:$0xff] }
  0x97   : > { %4407 = vmatmul.mubr.f32.gmra.mxu0 %v5599_v10  ;;  %4441 = vmatpush3.msra.mxu1 %v3482_v30  ;;  %v3592_v30 = vld [vmem:[%s6749_s1 + $0x2f8] sm:$0xff] }
  0x98   : > { %4520 = vmatprep.subr.mxu0 %v3530_v35  ;;  %4329 = vmatprep.mubr.f32.mxu1 %v5606_v43 }
  0x99   : > { %4521 = vmatpush3.msra.mxu0 %v3530_v35  ;;  %4330 = vmatmul.mubr.f32.gmra.mxu1 %v5610_v14  ;;  %v3640_v35 = vld [vmem:[%s6749_s1 + $0x378] sm:$0xff] }
  0x9a   : > { %4409 = vmatprep.mubr.f32.mxu0 %v5614_v7  ;;  %4442 = vmatprep.subr.mxu1 %v3481_v54 }
  0x9b   : > { %4410 = vmatmul.mubr.f32.gmra.mxu0 %v5621_v22  ;;  %4443 = vmatpush3.msra.mxu1 %v3481_v54  ;;  %v3591_v54 = vld [vmem:[%s6749_s1 + $0x2f0] sm:$0xff] }
  0x9c   : > { %4522 = vmatprep.subr.mxu0 %v3529_v3  ;;  %4444 = vmatprep.mubr.f32.mxu1 %v5097_v25  ;;  %v3639_v25 = vld [vmem:[%s6749_s1 + $0x370] sm:$0xff] }
  0x9d   : > { %4523 = vmatpush3.msra.mxu0 %v3529_v3  ;;  %4445 = vmatmul.mubr.f32.vlgmr.msra.gmra.mxu1 %v5107_v28  ;;  %v3590_v28 = vld [vmem:[%s6749_s1 + $0x2e8] sm:$0xff]  ;;  %v6821_v3 = vld [vmem:[#allocation11_spill] sm:$0xff] }
  0x9e   : > { %4524 = vmatprep.mubr.f32.mxu0 %v5300_v27  ;;  %4572 = vmatprep.subr.mxu1 %v3592_v30  ;;  %v3578_v27 = vld [vmem:[%s6749_s1 + $0x288] sm:$0xff] }
  0x9f   : > { %4525 = vmatmul.mubr.f32.vlgmr.msra.gmra.mxu0 %v5303_v29  ;;  %4573 = vmatpush3.msra.mxu1 %v3592_v30  ;;  %v3626_v29 = vld [vmem:[%s6749_s1 + $0x308] sm:$0xff] }
  0xa0   : > { %4652 = vmatprep.subr.mxu0 %v3640_v35  ;;  %4447 = vmatprep.mubr.f32.mxu1 %v5125_v33  ;;  %v3638_v33 = vld [vmem:[%s6749_s1 + $0x368] sm:$0xff] }
  0xa1   : > { %4653 = vmatpush3.msra.mxu0 %v3640_v35  ;;  %4448 = vmatmul.mubr.f32.gmra.mxu1 %v5135_v36  ;;  %v3589_v36 = vld [vmem:[%s6749_s1 + $0x2e0] sm:$0xff]  ;;  %v6822_v30 = vld [vmem:[#allocation12_spill] sm:$0xff] }
  0xa2   : > { %4527 = vmatprep.mubr.f32.mxu0 %v5320_v38  ;;  %4574 = vmatprep.subr.mxu1 %v3591_v54  ;;  %v5778_v38 = vld [vmem:[%s5066_s26 + $0x180] sm:$0xff] }
  0xa3   : > { %4528 = vmatmul.mubr.f32.gmra.mxu0 %v5324_v40  ;;  %4575 = vmatpush3.msra.mxu1 %v3591_v54  ;;  %v5782_v40 = vld [vmem:[%s5066_s26 + $0x188] sm:$0xff]  ;;  %v3733_v35 = vld [vmem:[%s6749_s1 + $0x460] sm:$0xff]  ;;  %v3601_v54 = vld [vmem:[%s5066_s26 + $0x90] sm:$0xff] }
  0xa4   : > { %4654 = vmatprep.subr.mxu0 %v3639_v25  ;;  %4450 = vmatprep.mubr.f32.mxu1 %v5153_v41  ;;  %v3637_v41 = vld [vmem:[%s6749_s1 + $0x360] sm:$0xff] }
  0xa5   : > { %4655 = vmatpush3.msra.mxu0 %v3639_v25  ;;  %4451 = vmatmul.mubr.f32.gmra.mxu1 %v5163_v44  ;;  %v3588_v44 = vld [vmem:[%s6749_s1 + $0x2d8] sm:$0xff] }
  0xa6   : > { %4530 = vmatprep.mubr.f32.mxu0 %v5342_v51  ;;  %4576 = vmatprep.subr.mxu1 %v3590_v28  ;;  %v3577_v51 = vld [vmem:[%s6749_s1 + $0x280] sm:$0xff]  ;;  %v3684_v25 = vld [vmem:[%s6749_s1 + $0x3d8] sm:$0xff] }
  0xa7   : > { %4531 = vmatmul.mubr.f32.gmra.mxu0 %v5346_v53  ;;  %4577 = vmatpush3.msra.mxu1 %v3590_v28  ;;  %v5793_v53 = vld [vmem:[%s5066_s26 + $0x189] sm:$0xff] }
  0xa8   : > { %4656 = vmatprep.subr.mxu0 %v3638_v33  ;;  %4453 = vmatprep.mubr.f32.mxu1 %v5181_v49  ;;  %v3636_v49 = vld [vmem:[%s6749_s1 + $0x358] sm:$0xff]  ;;  %v6823_v28 = vld [vmem:[#allocation13_spill] sm:$0xff] }
  0xa9   : > { %4657 = vmatpush3.msra.mxu0 %v3638_v33  ;;  %4454 = vmatmul.mubr.f32.gmra.mxu1 %v5191_v52  ;;  %v3587_v52 = vld [vmem:[%s6749_s1 + $0x2d0] sm:$0xff]  ;;  %v3602_v33 = vld [vmem:[%s5066_s26 + $0x98] sm:$0xff] }
  0xaa   : > { %4533 = vmatprep.mubr.f32.mxu0 %v5364_v62  ;;  %4578 = vmatprep.subr.mxu1 %v3589_v36  ;;  %v3593_v62 = vld [vmem:[%s5066_s26 + $0x30] sm:$0xff] }
  0xab   : > { %4534 = vmatmul.mubr.f32.gmra.mxu0 %v5368_v0  ;;  %4579 = vmatpush3.msra.mxu1 %v3589_v36  ;;  %v3688_v0 = vld [vmem:[%s6749_s1 + $0x3f8] sm:$0xff] }
  0xac   : > { %4658 = vmatprep.subr.mxu0 %v3637_v41  ;;  %4456 = vmatprep.mubr.f32.mxu1 %v5209_v57  ;;  %v3635_v57 = vld [vmem:[%s6749_s1 + $0x350] sm:$0xff]  ;;  %v6824_v36 = vld [vmem:[#allocation14_spill] sm:$0xff] }
  0xad   : > { %4659 = vmatpush3.msra.mxu0 %v3637_v41  ;;  %4457 = vmatmul.mubr.f32.gmra.mxu1 %v5219_v60  ;;  %v3586_v60 = vld [vmem:[%s6749_s1 + $0x2c8] sm:$0xff]  ;;  %v3732_v41 = vld [vmem:[%s6749_s1 + $0x458] sm:$0xff] }
  0xae   : > { %4536 = vmatprep.mubr.f32.mxu0 %v5386_v11  ;;  %4580 = vmatprep.subr.mxu1 %v3588_v44  ;;  %v3594_v11 = vld [vmem:[%s5066_s26 + $0x38] sm:$0xff] }
  0xaf   : > { %4537 = vmatmul.mubr.f32.gmra.mxu0 %v5390_v13  ;;  %4581 = vmatpush3.msra.mxu1 %v3588_v44  ;;  %v6816_v13 = vld [vmem:[#allocation6_spill] sm:$0xff] }
  0xb0   : > { %4660 = vmatprep.subr.mxu0 %v3636_v49  ;;  %4459 = vmatprep.mubr.f32.mxu1 %v5237_v1  ;;  %v3634_v1 = vld [vmem:[%s6749_s1 + $0x348] sm:$0xff] }
  0xb1   : > { %4661 = vmatpush3.msra.mxu0 %v3636_v49  ;;  %4460 = vmatmul.mubr.f32.gmra.mxu1 %v5247_v4  ;;  %v3585_v4 = vld [vmem:[%s6749_s1 + $0x2c0] sm:$0xff]  ;;  %v3603_v49 = vld [vmem:[%s5066_s26 + $0xa8] sm:$0xff] }
  0xb2   : > { %4539 = vmatprep.mubr.f32.mxu0 %v5408_v20  ;;  %4582 = vmatprep.subr.mxu1 %v3587_v52  ;;  %v3595_v20 = vld [vmem:[%s5066_s26 + $0x48] sm:$0xff] }
  0xb3   : > { %4540 = vmatmul.mubr.f32.gmra.mxu0 %v5412_v21  ;;  %4583 = vmatpush3.msra.mxu1 %v3587_v52  ;;  %v3687_v21 = vld [vmem:[%s6749_s1 + $0x3f0] sm:$0xff] }
  0xb4   : > { %4662 = vmatprep.subr.mxu0 %v3635_v57  ;;  %4462 = vmatprep.mubr.f32.mxu1 %v5265_v9  ;;  %v3633_v9 = vld [vmem:[%s6749_s1 + $0x340] sm:$0xff]  ;;  %v3683_v52 = vld [vmem:[%s6749_s1 + $0x3d0] sm:$0xff] }
  0xb5   : > { %4663 = vmatpush3.msra.mxu0 %v3635_v57  ;;  %4463 = vmatmul.mubr.f32.gmra.mxu1 %v5275_v12  ;;  %v3584_v12 = vld [vmem:[%s6749_s1 + $0x2b8] sm:$0xff] }
  0xb6   : > { %4542 = vmatprep.mubr.f32.mxu0 %v5430_v45  ;;  %4584 = vmatprep.subr.mxu1 %v3586_v60  ;;  %v3596_v45 = vld [vmem:[%s5066_s26 + $0x50] sm:$0xff] }
  0xb7   : > { %4543 = vmatmul.mubr.f32.gmra.mxu0 %v5434_v48  ;;  %4585 = vmatpush3.msra.mxu1 %v3586_v60  ;;  %v6818_v48 = vld [vmem:[#allocation8_spill] sm:$0xff]  ;;  %v6825_v60 = vld [vmem:[#allocation15_spill] sm:$0xff] }
  0xb8   : > { %4664 = vmatprep.subr.mxu0 %v3634_v1  ;;  %4465 = vmatprep.mubr.f32.mxu1 %v5072_v16  ;;  %v3632_v16 = vld [vmem:[%s6749_s1 + $0x338] sm:$0xff] }
  0xb9   : > { %4665 = vmatpush3.msra.mxu0 %v3634_v1  ;;  %4466 = vmatmul.mubr.f32.gmra.mxu1 %v5076_v18  ;;  %v3583_v18 = vld [vmem:[%s6749_s1 + $0x2b0] sm:$0xff] }
  0xba   : > { %4545 = vmatprep.mubr.f32.mxu0 %v5452_v15  ;;  %4586 = vmatprep.subr.mxu1 %v3585_v4  ;;  %v3686_v15 = vld [vmem:[%s6749_s1 + $0x3e8] sm:$0xff]  ;;  %v3604_v1 = vld [vmem:[%s5066_s26 + $0xb0] sm:$0xff] }
  0xbb   : > { %4546 = vmatmul.mubr.f32.gmra.mxu0 %v5456_v19  ;;  %4587 = vmatpush3.msra.mxu1 %v3585_v4  ;;  %v6819_v19 = vld [vmem:[#allocation9_spill] sm:$0xff] }
  0xbc   : > { %4666 = vmatprep.subr.mxu0 %v3633_v9  ;;  %4468 = vmatprep.mubr.f32.mxu1 %v5091_v23  ;;  %v3631_v23 = vld [vmem:[%s6749_s1 + $0x330] sm:$0xff] }
  0xbd   : > { %4667 = vmatpush3.msra.mxu0 %v3633_v9  ;;  %4469 = vmatmul.mubr.f32.gmra.mxu1 %v5100_v26  ;;  %v3582_v26 = vld [vmem:[%s6749_s1 + $0x2a8] sm:$0xff] }
  0xbe   : > { %4548 = vmatprep.mubr.f32.mxu0 %v5474_v5  ;;  %4588 = vmatprep.subr.mxu1 %v3584_v12  ;;  %v3597_v5 = vld [vmem:[%s5066_s26 + $0x60] sm:$0xff]  ;;  %v6826_v9 = vld [vmem:[#allocation16_spill] sm:$0xff] }
  0xbf   : > { %4549 = vmatmul.mubr.f32.gmra.mxu0 %v5478_v56  ;;  %4589 = vmatpush3.msra.mxu1 %v3584_v12  ;;  %v3735_v56 = vld [vmem:[%s6749_s1 + $0x470] sm:$0xff] }
  0xc0   : > { %4668 = vmatprep.subr.mxu0 %v3632_v16  ;;  %4471 = vmatprep.mubr.f32.mxu1 %v5118_v31  ;;  %v3630_v31 = vld [vmem:[%s6749_s1 + $0x328] sm:$0xff]  ;;  %v3731_v12 = vld [vmem:[%s6749_s1 + $0x450] sm:$0xff] }
  0xc1   : > { %4669 = vmatpush3.msra.mxu0 %v3632_v16  ;;  %4472 = vmatmul.mubr.f32.gmra.mxu1 %v5128_v34  ;;  %v3581_v34 = vld [vmem:[%s6749_s1 + $0x2a0] sm:$0xff] }
  0xc2   : > { %4551 = vmatprep.mubr.f32.mxu0 %v5496_v32  ;;  %4590 = vmatprep.subr.mxu1 %v3583_v18  ;;  %v6817_v32 = vld [vmem:[#allocation7_spill] sm:$0xff] }
  0xc3   : > { %4552 = vmatmul.mubr.f32.gmra.mxu0 %v5500_v24  ;;  %4591 = vmatpush3.msra.mxu1 %v3583_v18  ;;  %v3598_v24 = vld [vmem:[%s5066_s26 + $0x68] sm:$0xff]  ;;  %v3605_v18 = vld [vmem:[%s5066_s26 + $0xc0] sm:$0xff] }
  0xc4   : > { %4670 = vmatprep.subr.mxu0 %v3631_v23  ;;  %4474 = vmatprep.mubr.f32.mxu1 %v5146_v39  ;;  %v3629_v39 = vld [vmem:[%s6749_s1 + $0x320] sm:$0xff] }
  0xc5   : > { %4671 = vmatpush3.msra.mxu0 %v3631_v23  ;;  %4475 = vmatmul.mubr.f32.gmra.mxu1 %v5156_v42  ;;  %v3580_v42 = vld [vmem:[%s6749_s1 + $0x298] sm:$0xff]  ;;  %v3682_v23 = vld [vmem:[%s6749_s1 + $0x3c8] sm:$0xff] }
  0xc6   : > { %4554 = vmatprep.mubr.f32.mxu0 %v5518_v17  ;;  %4592 = vmatprep.subr.mxu1 %v3582_v26  ;;  %v3736_v17 = vld [vmem:[%s6749_s1 + $0x478] sm:$0xff] }
  0xc7   : > { %4555 = vmatmul.mubr.f32.gmra.mxu0 %v5522_v8  ;;  %4593 = vmatpush3.msra.mxu1 %v3582_v26  ;;  %v6820_v8 = vld [vmem:[#allocation10_spill] sm:$0xff] }
  0xc8   : > { %4672 = vmatprep.subr.mxu0 %v3630_v31  ;;  %4477 = vmatprep.mubr.f32.mxu1 %v5174_v47  ;;  %v3628_v47 = vld [vmem:[%s6749_s1 + $0x318] sm:$0xff] }
  0xc9   : > { %4673 = vmatpush3.msra.mxu0 %v3630_v31  ;;  %4478 = vmatmul.mubr.f32.gmra.mxu1 %v5184_v50  ;;  %v3579_v50 = vld [vmem:[%s6749_s1 + $0x290] sm:$0xff] }
  0xca   : > { %4557 = vmatprep.mubr.f32.mxu0 %v5540_v6  ;;  %4594 = vmatprep.subr.mxu1 %v3581_v34  ;;  %v6815_v6 = vld [vmem:[#allocation5_spill] sm:$0xff] }
  0xcb   : > { %4558 = vmatmul.mubr.f32.gmra.mxu0 %v5544_v61  ;;  %4595 = vmatpush3.msra.mxu1 %v3581_v34  ;;  %v3734_v61 = vld [vmem:[%s6749_s1 + $0x468] sm:$0xff]  ;;  %v6827_v31 = vld [vmem:[#allocation17_spill] sm:$0xff] }
  0xcc   : > { %4674 = vmatprep.subr.mxu0 %v3629_v39  ;;  %4480 = vmatprep.mubr.f32.mxu1 %v5202_v55  ;;  %v3627_v55 = vld [vmem:[%s6749_s1 + $0x310] sm:$0xff]  ;;  %v3606_v34 = vld [vmem:[%s5066_s26 + $0xc8] sm:$0xff] }
  0xcd   : > { %4675 = vmatpush3.msra.mxu0 %v3629_v39  ;;  %4481 = vmatmul.mubr.f32.gmra.mxu1 %v5212_v58  ;;  %v6812_v58 = vld [vmem:[#allocation31_spill] sm:$0xff]  ;;  %v6828_v39 = vld [vmem:[#allocation18_spill] sm:$0xff] }
  0xce   : > { %4560 = vmatprep.mubr.f32.mxu0 %v5562_v59  ;;  %4596 = vmatprep.subr.mxu1 %v3580_v42  ;;  %v3625_v59 = vld [vmem:[%s6749_s1 + $0x300] sm:$0xff] }
  0xcf   : > { %4561 = vmatmul.mubr.f32.gmra.mxu0 %v5566_v37  ;;  %4597 = vmatpush3.msra.mxu1 %v3580_v42  ;;  %v3599_v37 = vld [vmem:[%s5066_s26 + $0x78] sm:$0xff]  ;;  %v3730_v42 = vld [vmem:[%s6749_s1 + $0x448] sm:$0xff] }
  0xd0   : > { %4676 = vmatprep.subr.mxu0 %v3628_v47  ;;  %4483 = vmatprep.mubr.f32.mxu1 %v5230_v63  ;;  %v6813_v63 = vld [vmem:[#allocation3_spill] sm:$0xff] }
  0xd1   : > { %4677 = vmatpush3.msra.mxu0 %v3628_v47  ;;  %4484 = vmatmul.mubr.f32.gmra.mxu1 %v5240_v2  ;;  %v6814_v2 = vld [vmem:[#allocation4_spill] sm:$0xff] }
  0xd2   : > { %4563 = vmatprep.mubr.f32.mxu0 %v5584_v46  ;;  %4598 = vmatprep.subr.mxu1 %v3579_v50  ;;  %v5786_v46 = vld [vmem:[%s5066_s26 + $0x181] sm:$0xff] }
  0xd3   : > { %4564 = vmatmul.mubr.f32.gmra.mxu0 %v6812_v58  ;;  %4599 = vmatpush3.msra.mxu1 %v3579_v50  ;;  %v3681_v58 = vld [vmem:[%s6749_s1 + $0x3c0] sm:$0xff] }
  0xd4   : > { %4678 = vmatprep.subr.mxu0 %v3627_v55  ;;  %4486 = vmatprep.mubr.f32.mxu1 %v6813_v63  ;;  %v6829_v63 = vld [vmem:[#allocation19_spill] sm:$0xff] }
  0xd5   : > { %4679 = vmatpush3.msra.mxu0 %v3627_v55  ;;  %4487 = vmatmul.mubr.f32.gmra.mxu1 %v6814_v2  ;;  %v3607_v55 = vld [vmem:[%s5066_s26 + $0xd8] sm:$0xff]  ;;  %v3608_v2 = vld [vmem:[%s5066_s26 + $0xe0] sm:$0xff] }
  0xd6   : > { %4566 = vmatprep.mubr.f32.mxu0 %v5606_v43  ;;  %4600 = vmatprep.subr.mxu1 %v3578_v27  ;;  %v3600_v43 = vld [vmem:[%s5066_s26 + $0x80] sm:$0xff] }
  0xd7   : > { %4567 = vmatmul.mubr.f32.gmra.mxu0 %v5610_v14  ;;  %4601 = vmatpush3.msra.mxu1 %v3578_v27  ;;  %v3685_v14 = vld [vmem:[%s6749_s1 + $0x3e0] sm:$0xff] }
  0xd8   : > { %4680 = vmatprep.subr.mxu0 %v3626_v29  ;;  %4489 = vmatprep.mubr.f32.mxu1 %v5778_v38 }
  0xd9   : > { %4681 = vmatpush3.msra.mxu0 %v3626_v29  ;;  %4490 = vmatmul.mubr.f32.gmra.mxu1 %v5782_v40  ;;  %v6830_v29 = vld [vmem:[#allocation20_spill] sm:$0xff] }
  0xda   : > { %4569 = vmatprep.mubr.f32.mxu0 %v5786_v46  ;;  %4602 = vmatprep.subr.mxu1 %v3577_v51 }
  0xdb   : > { %4570 = vmatmul.mubr.f32.gmra.mxu0 %v5793_v53  ;;  %4603 = vmatpush3.msra.mxu1 %v3577_v51  ;;  %v3729_v51 = vld [vmem:[%s6749_s1 + $0x440] sm:$0xff] }
  0xdc   : > { %4682 = vmatprep.subr.mxu0 %v3625_v59  ;;  %4604 = vmatprep.mubr.f32.mxu1 %v6815_v6 }
  0xdd   : > { %4683 = vmatpush3.msra.mxu0 %v3625_v59  ;;  %4605 = vmatmul.mubr.f32.vlgmr.msra.gmra.mxu1 %v6816_v13  ;;  %v6831_v13 = vld [vmem:[#allocation21_spill] sm:$0xff] }
  0xde   : > { %4684 = vmatprep.mubr.f32.mxu0 %v3593_v62  ;;  %4732 = vmatprep.subr.mxu1 %v3688_v0  ;;  %v3609_v62 = vld [vmem:[%s5066_s26 + $0xf0] sm:$0xff] }
  0xdf   : > { %4685 = vmatmul.mubr.f32.vlgmr.msra.gmra.mxu0 %v3594_v11  ;;  %4733 = vmatpush3.msra.mxu1 %v3688_v0  ;;  %v3680_v0 = vld [vmem:[%s6749_s1 + $0x3b8] sm:$0xff] }
  0xe0   : > { %4812 = vmatprep.subr.mxu0 %v3736_v17  ;;  %4607 = vmatprep.mubr.f32.mxu1 %v6817_v32 }
  0xe1   : > { %4813 = vmatpush3.msra.mxu0 %v3736_v17  ;;  %4608 = vmatmul.mubr.f32.gmra.mxu1 %v6818_v48  ;;  %v3610_v17 = vld [vmem:[%s5066_s26 + $0xf8] sm:$0xff]  ;;  %v3679_v48 = vld [vmem:[%s6749_s1 + $0x3b0] sm:$0xff] }
  0xe2   : > { %4687 = vmatprep.mubr.f32.mxu0 %v3595_v20  ;;  %4734 = vmatprep.subr.mxu1 %v3687_v21  ;;  %v6832_v20 = vld [vmem:[#allocation22_spill] sm:$0xff] }
  0xe3   : > { %4688 = vmatmul.mubr.f32.gmra.mxu0 %v3596_v45  ;;  %4735 = vmatpush3.msra.mxu1 %v3687_v21  ;;  %v3728_v21 = vld [vmem:[%s6749_s1 + $0x438] sm:$0xff]  ;;  %v3611_v45 = vld [vmem:[%s5066_s26 + $0x108] sm:$0xff] }
  0xe4   : > { %4814 = vmatprep.subr.mxu0 %v3735_v56  ;;  %4610 = vmatprep.mubr.f32.mxu1 %v6819_v19  ;;  %v6834_v19 = vld [vmem:[#allocation24_spill] sm:$0xff] }
  0xe5   : > { %4815 = vmatpush3.msra.mxu0 %v3735_v56  ;;  %4611 = vmatmul.mubr.f32.gmra.mxu1 %v6820_v8 }
  0xe6   : > { %4690 = vmatprep.mubr.f32.mxu0 %v3597_v5  ;;  %4736 = vmatprep.subr.mxu1 %v3686_v15  ;;  %v6833_v5 = vld [vmem:[#allocation23_spill] sm:$0xff] }
  0xe7   : > { %4691 = vmatmul.mubr.f32.gmra.mxu0 %v3598_v24  ;;  %4737 = vmatpush3.msra.mxu1 %v3686_v15  ;;  %v3612_v15 = vld [vmem:[%s5066_s26 + $0x110] sm:$0xff] }
  0xe8   : > { %4816 = vmatprep.subr.mxu0 %v3734_v61  ;;  %4613 = vmatprep.mubr.f32.mxu1 %v6821_v3  ;;  %v3727_v24 = vld [vmem:[%s6749_s1 + $0x430] sm:$0xff] }
  0xe9   : > { %4817 = vmatpush3.msra.mxu0 %v3734_v61  ;;  %4614 = vmatmul.mubr.f32.gmra.mxu1 %v6822_v30  ;;  %v3614_v30 = vld [vmem:[%s5066_s26 + $0x128] sm:$0xff] }
  0xea   : > { %4693 = vmatprep.mubr.f32.mxu0 %v3599_v37  ;;  %4738 = vmatprep.subr.mxu1 %v3685_v14  ;;  %v3613_v37 = vld [vmem:[%s5066_s26 + $0x120] sm:$0xff] }
  0xeb   : > { %4694 = vmatmul.mubr.f32.gmra.mxu0 %v3600_v43  ;;  %4739 = vmatpush3.msra.mxu1 %v3685_v14  ;;  %v3678_v14 = vld [vmem:[%s6749_s1 + $0x3a8] sm:$0xff]  ;;  %v6835_v43 = vld [vmem:[#allocation25_spill] sm:$0xff] }
  0xec   : > { %4818 = vmatprep.subr.mxu0 %v3733_v35  ;;  %4616 = vmatprep.mubr.f32.mxu1 %v6823_v28  ;;  %v3615_v28 = vld [vmem:[%s5066_s26 + $0x138] sm:$0xff] }
  0xed   : > { %4819 = vmatpush3.msra.mxu0 %v3733_v35  ;;  %4617 = vmatmul.mubr.f32.gmra.mxu1 %v6824_v36  ;;  %v6836_v35 = vld [vmem:[#allocation26_spill] sm:$0xff] }
  0xee   : > { %4696 = vmatprep.mubr.f32.mxu0 %v3601_v54  ;;  %4740 = vmatprep.subr.mxu1 %v3684_v25  ;;  %v5851_v44 = vpop.f32.mrf.mxu1  ;;  %v3726_v54 = vld [vmem:[%s6749_s1 + $0x428] sm:$0xff] }
  0xef   : > { %4697 = vmatmul.mubr.f32.gmra.mxu0 %v3602_v33  ;;  %4741 = vmatpush3.msra.mxu1 %v3684_v25  ;;  %v5857_v57 = vpop.f32.mrf.mxu0  ;;  %v3677_v33 = vld [vmem:[%s6749_s1 + $0x3a0] sm:$0xff] }
  0xf0   : > { %4820 = vmatprep.subr.mxu0 %v3732_v41  ;;  %4619 = vmatprep.mubr.f32.mxu1 %v6825_v60  ;;  %v5861_v4 = vpop.f32.mrf.mxu1  ;;  %v6838_v60 = vld [vmem:[#allocation28_spill] sm:$0xff] }
  0xf1   : > { %4821 = vmatpush3.msra.mxu0 %v3732_v41  ;;  %4620 = vmatmul.mubr.f32.gmra.mxu1 %v6826_v9  ;;  %v5867_v16 = vpop.f32.mrf.mxu0 }
  0xf2   : > { %4699 = vmatprep.mubr.f32.mxu0 %v3603_v49  ;;  %4742 = vmatprep.subr.mxu1 %v3683_v52  ;;  %v6837_v49 = vld [vmem:[#allocation27_spill] sm:$0xff] }
  0xf3   : > { %4700 = vmatmul.mubr.f32.gmra.mxu0 %v3604_v1  ;;  %4743 = vmatpush3.msra.mxu1 %v3683_v52  ;;  %v5873_v26 = vpop.f32.mrf.mxu1  ;;  %v3616_v52 = vld [vmem:[%s5066_s26 + $0x140] sm:$0xff] }
  0xf4   : > { %4822 = vmatprep.subr.mxu0 %v3731_v12  ;;  %4622 = vmatprep.mubr.f32.mxu1 %v6827_v31  ;;  %v3725_v1 = vld [vmem:[%s6749_s1 + $0x420] sm:$0xff]  ;;  %v6839_v31 = vld [vmem:[#allocation29_spill] sm:$0xff] }
  0xf5   : > { %4823 = vmatpush3.msra.mxu0 %v3731_v12  ;;  %4623 = vmatmul.mubr.f32.gmra.mxu1 %v6828_v39  ;;  %v5881_v47 = vpop.f32.mrf.mxu0  ;;  %v5883_v50 = vpop.f32.mrf.mxu1  ;;  %v3617_v12 = vld [vmem:[%s5066_s26 + $0x150] sm:$0xff]  ;;  %v6840_v39 = vld [vmem:[#allocation30_spill] sm:$0xff] }
  0xf6   : > { %4702 = vmatprep.mubr.f32.mxu0 %v3605_v18  ;;  %4744 = vmatprep.subr.mxu1 %v3682_v23  ;;  %v3676_v18 = vld [vmem:[%s6749_s1 + $0x398] sm:$0xff] }
  0xf7   : > { %4703 = vmatmul.mubr.f32.gmra.mxu0 %v3606_v34  ;;  %4745 = vmatpush3.msra.mxu1 %v3682_v23  ;;  %v5889_v27 = vpop.f32.mrf.mxu0  ;;  %v3618_v34 = vld [vmem:[%s5066_s26 + $0x158] sm:$0xff] }
  0xf8   : > { %4824 = vmatprep.subr.mxu0 %v3730_v42  ;;  %4625 = vmatprep.mubr.f32.mxu1 %v6829_v63  ;;  %v3619_v63 = vld [vmem:[%s5066_s26 + $0x168] sm:$0xff] }
  0xf9   : > { %4825 = vmatpush3.msra.mxu0 %v3730_v42  ;;  %4626 = vmatmul.mubr.f32.gmra.mxu1 %v6830_v29  ;;  %v5897_v59 = vpop.f32.mrf.mxu1  ;;  %v3724_v42 = vld [vmem:[%s6749_s1 + $0x418] sm:$0xff] }
  0xfa   : > { %4705 = vmatprep.mubr.f32.mxu0 %v3607_v55  ;;  %4746 = vmatprep.subr.mxu1 %v3681_v58 }
  0xfb   : > { %4706 = vmatmul.mubr.f32.gmra.mxu0 %v3608_v2  ;;  %4747 = vmatpush3.msra.mxu1 %v3681_v58  ;;  %v5903_v6 = vpop.f32.mrf.mxu0  ;;  %v5905_v11 = vpop.f32.mrf.mxu1  ;;  %v3675_v2 = vld [vmem:[%s6749_s1 + $0x390] sm:$0xff] }
  0xfc   : > { %4826 = vmatprep.subr.mxu0 %v3729_v51  ;;  %4628 = vmatprep.mubr.f32.mxu1 %v6831_v13 }
  0xfd   : > { %4827 = vmatpush3.msra.mxu0 %v3729_v51  ;;  %4629 = vmatmul.mubr.f32.gmra.mxu1 %v6832_v20  ;;  %v5913_v32 = vpop.f32.mrf.mxu0  ;;  %v6841_v51 = vld [vmem:[#allocation32_spill] sm:$0xff] }
  0xfe   : > { %4708 = vmatprep.mubr.f32.mxu0 %v3609_v62  ;;  %4748 = vmatprep.subr.mxu1 %v3680_v0  ;;  %v3620_v62 = vld [vmem:[%s5066_s26 + $0x170] sm:$0xff] }
  0xff   : > { %4709 = vmatmul.mubr.f32.gmra.mxu0 %v3610_v17  ;;  %4749 = vmatpush3.msra.mxu1 %v3680_v0  ;;  %v5919_v56 = vpop.f32.mrf.mxu1  ;;  %v3723_v0 = vld [vmem:[%s6749_s1 + $0x410] sm:$0xff]  ;;  %v3674_v17 = vld [vmem:[%s6749_s1 + $0x388] sm:$0xff] }
 0x100   : > { %4828 = vmatprep.subr.mxu0 %v3728_v21  ;;  %4631 = vmatprep.mubr.f32.mxu1 %v6833_v5  ;;  %v6010_v5 = vld [vmem:[%s5066_s26 + $0x18a] sm:$0xff] }
 0x101   : > { %4829 = vmatpush3.msra.mxu0 %v3728_v21  ;;  %4632 = vmatmul.mubr.f32.gmra.mxu1 %v6834_v19  ;;  %v5927_v8 = vpop.f32.mrf.mxu0  ;;  %v5929_v61 = vpop.f32.mrf.mxu1  ;;  %v3722_v21 = vld [vmem:[%s6749_s1 + $0x408] sm:$0xff] }
 0x102   : > { %4711 = vmatprep.mubr.f32.mxu0 %v3611_v45  ;;  %4750 = vmatprep.subr.mxu1 %v3679_v48 }
 0x103   : > { %4712 = vmatmul.mubr.f32.gmra.mxu0 %v3612_v15  ;;  %4751 = vmatpush3.msra.mxu1 %v3679_v48  ;;  %v5935_v3 = vpop.f32.mrf.mxu0  ;;  %v6006_v48 = vld [vmem:[%s5066_s26 + $0x182] sm:$0xff] }
 0x104   : > { %4830 = vmatprep.subr.mxu0 %v3727_v24  ;;  %4634 = vmatprep.mubr.f32.mxu1 %v6835_v43  ;;  %v3673_v15 = vld [vmem:[%s6749_s1 + $0x380] sm:$0xff] }
 0x105   : > { %4831 = vmatpush3.msra.mxu0 %v3727_v24  ;;  %4635 = vmatmul.mubr.f32.gmra.mxu1 %v6836_v35  ;;  %v5943_v25 = vpop.f32.mrf.mxu1  ;;  %v3721_v24 = vld [vmem:[%s6749_s1 + $0x400] sm:$0xff]  ;;  %v3643_v35 = vld [vmem:[%s5066_s26 + $0x49] sm:$0xff] }
 0x106   : > { %4714 = vmatprep.mubr.f32.mxu0 %v3613_v37  ;;  %4752 = vmatprep.subr.mxu1 %v3678_v14  ;;  %v3641_v37 = vld [vmem:[%s5066_s26 + $0x31] sm:$0xff] }
 0x107   : > { %4715 = vmatmul.mubr.f32.gmra.mxu0 %v3614_v30  ;;  %4753 = vmatpush3.msra.mxu1 %v3678_v14  ;;  %v5949_v36 = vpop.f32.mrf.mxu0  ;;  %v5951_v41 = vpop.f32.mrf.mxu1  ;;  %v3642_v14 = vld [vmem:[%s5066_s26 + $0x39] sm:$0xff] }
 0x108   : > { %4832 = vmatprep.subr.mxu0 %v3726_v54  ;;  %4637 = vmatprep.mubr.f32.mxu1 %v6837_v49  ;;  %v3689_v30 = vld [vmem:[%s5066_s26 + $0x32] sm:$0xff] }
 0x109   : > { %4833 = vmatpush3.msra.mxu0 %v3726_v54  ;;  %4638 = vmatmul.mubr.f32.gmra.mxu1 %v6838_v60  ;;  %v5959_v9 = vpop.f32.mrf.mxu0  ;;  %v3690_v54 = vld [vmem:[%s5066_s26 + $0x3a] sm:$0xff] }
 0x10a   : > { %4717 = vmatprep.mubr.f32.mxu0 %v3615_v28  ;;  %4754 = vmatprep.subr.mxu1 %v3677_v33 }
 0x10b   : > { %4718 = vmatmul.mubr.f32.gmra.mxu0 %v3616_v52  ;;  %4755 = vmatpush3.msra.mxu1 %v3677_v33  ;;  %v5965_v23 = vpop.f32.mrf.mxu1  ;;  %v3691_v33 = vld [vmem:[%s5066_s26 + $0x4a] sm:$0xff] }
 0x10c   : > { %4834 = vmatprep.subr.mxu0 %v3725_v1  ;;  %4640 = vmatprep.mubr.f32.mxu1 %v6839_v31  ;;  %v3644_v52 = vld [vmem:[%s5066_s26 + $0x51] sm:$0xff] }
 0x10d   : > { %4835 = vmatpush3.msra.mxu0 %v3725_v1  ;;  %4641 = vmatmul.mubr.f32.gmra.mxu1 %v6840_v39  ;;  %v5973_v55 = vpop.f32.mrf.mxu0  ;;  %v5975_v58 = vpop.f32.mrf.mxu1 }
 0x10e   : > { %4720 = vmatprep.mubr.f32.mxu0 %v3617_v12  ;;  %4756 = vmatprep.subr.mxu1 %v3676_v18  ;;  %v3645_v12 = vld [vmem:[%s5066_s26 + $0x61] sm:$0xff] }
 0x10f   : > { %4721 = vmatmul.mubr.f32.gmra.mxu0 %v3618_v34  ;;  %4757 = vmatpush3.msra.mxu1 %v3676_v18  ;;  %v5981_v29 = vpop.f32.mrf.mxu0  ;;  %v3692_v34 = vld [vmem:[%s5066_s26 + $0x52] sm:$0xff] }
 0x110   : > { %4836 = vmatprep.subr.mxu0 %v3724_v42  ;;  %4643 = vmatprep.mubr.f32.mxu1 %v6841_v51  ;;  %v3646_v51 = vld [vmem:[%s5066_s26 + $0x69] sm:$0xff] }
 0x111   : > { %4837 = vmatpush3.msra.mxu0 %v3724_v42  ;;  %4644 = vmatmul.mubr.f32.gmra.mxu1 %v5599_v10  ;;  %v5989_v13 = vpop.f32.mrf.mxu1 }
 0x112   : > { %4723 = vmatprep.mubr.f32.mxu0 %v3619_v63  ;;  %4758 = vmatprep.subr.mxu1 %v3675_v2 }
 0x113   : > { %4724 = vmatmul.mubr.f32.gmra.mxu0 %v3620_v62  ;;  %4759 = vmatpush3.msra.mxu1 %v3675_v2  ;;  %v5994_v20 = vpop.f32.mrf.mxu0  ;;  %v5996_v10 = vpop.f32.mrf.mxu1 }
 0x114   : > { %4838 = vmatprep.subr.mxu0 %v3723_v0  ;;  %4646 = vmatprep.mubr.f32.mxu1 %v5614_v7 }
 0x115   : > { %4839 = vmatpush3.msra.mxu0 %v3723_v0  ;;  %4647 = vmatmul.mubr.f32.gmra.mxu1 %v5621_v22  ;;  %v6003_v45 = vpop.f32.mrf.mxu0  ;;  %v3623_v22 = vld [vmem:[%s5066_s26 + $0x198] sm:$0xff] }
 0x116   : > { %4726 = vmatprep.mubr.f32.mxu0 %v5778_v38  ;;  %4760 = vmatprep.subr.mxu1 %v3674_v17  ;;  %v3624_v38 = vld [vmem:[%s5066_s26 + $0x1a0] sm:$0xff] }
 0x117   : > { %4727 = vmatmul.mubr.f32.gmra.mxu0 %v5782_v40  ;;  %4761 = vmatpush3.msra.mxu1 %v3674_v17  ;;  %v6013_v7 = vpop.f32.mrf.mxu1  ;;  %v3647_v17 = vld [vmem:[%s5066_s26 + $0x79] sm:$0xff] }
 0x118   : > { %4840 = vmatprep.subr.mxu0 %v3722_v21  ;;  %4649 = vmatprep.mubr.f32.mxu1 %v6006_v48 }
 0x119   : > { %4841 = vmatpush3.msra.mxu0 %v3722_v21  ;;  %4650 = vmatmul.mubr.f32.gmra.mxu1 %v6010_v5  ;;  %v6022_v40 = vpop.f32.mrf.mxu0  ;;  %v6024_v19 = vpop.f32.mrf.mxu1 }
 0x11a   : > { %4729 = vmatprep.mubr.f32.mxu0 %v3623_v22  ;;  %4762 = vmatprep.subr.mxu1 %v3673_v15  ;;  %v3694_v22 = vld [vmem:[%s5066_s26 + $0x6a] sm:$0xff] }
 0x11b   : > { %4730 = vmatmul.mubr.f32.gmra.mxu0 %v3624_v38  ;;  %4763 = vmatpush3.msra.mxu1 %v3673_v15  ;;  %v6031_v43 = vpop.f32.mrf.mxu0 }
 0x11c   : > { %4842 = vmatprep.subr.mxu0 %v3721_v24  ;;  %4764 = vmatprep.mubr.f32.mxu1 %v3641_v37 }
 0x11d   : > { %4843 = vmatpush3.msra.mxu0 %v3721_v24  ;;  %v4286_v28 = vpop.f32.mrf.mxu1  ;;  %4765 = vmatmul.mubr.f32.vlgmr.msra.gmra.mxu1 %v3642_v14  ;;  %v3695_v24 = vld [vmem:[%s5066_s26 + $0x7a] sm:$0xff] }
 0x11e   : > { %v875_v49 = vadd.f32 %v4286_v28, %v5857_v57  ;;  %4844 = vmatprep.mubr.f32.mxu0 %v3689_v30  ;;  %4767 = vmatprep.mubr.f32.mxu1 %v3643_v35  ;;  %v3693_v57 = vld [vmem:[%s5066_s26 + $0x62] sm:$0xff] }
 0x11f   : > { %v4366_v60 = vpop.f32.mrf.mxu0  ;;  %4845 = vmatmul.mubr.f32.vlgmr.msra.gmra.mxu0 %v3690_v54  ;;  %v715_v1 = vpop.f32.mrf.mxu1  ;;  %v3648_v14 = vld [vmem:[%s5066_s26 + $0x81] sm:$0xff]  ;;  %v3649_v54 = vld [vmem:[%s5066_s26 + $0x91] sm:$0xff] }
 0x120   : > { %v6040_v18 = vadd.f32 %v4366_v60, %v875_v49  ;;  %v874_v31 = vadd.f32 %v715_v1, %v5867_v16  ;;  %4847 = vmatprep.mubr.f32.mxu0 %v3691_v33  ;;  %v3696_v33 = vld [vmem:[%s5066_s26 + $0x82] sm:$0xff]  ;;  %v3697_v60 = vld [vmem:[%s5066_s26 + $0x92] sm:$0xff] }
 0x121   : > { %v1021_v39 = vpop.f32.mrf.mxu0  ;;  %v4289_v42 = vpop.f32.mrf.mxu1  ;;  %4768 = vmatmul.mubr.f32.gmra.mxu1 %v3644_v52 }
 0x122   : > { %v6045_v63 = vadd.f32 %v1021_v39, %v874_v31  ;;  %v877_v2 = vadd.f32 %v4289_v42, %v5881_v47  ;;  %4770 = vmatprep.mubr.f32.mxu1 %v3645_v12  ;;  %v3650_v12 = vld [vmem:[%s5066_s26 + $0x99] sm:$0xff]  ;;  %v3651_v39 = vld [vmem:[%s5066_s26 + $0xa9] sm:$0xff] }
 0x123   : > { %v4369_v62 = vpop.f32.mrf.mxu0  ;;  %4848 = vmatmul.mubr.f32.gmra.mxu0 %v3692_v34  ;;  %v725_v0 = vpop.f32.mrf.mxu1 }
 0x124   : > { %v6050_v16 = vadd.f32 %v4369_v62, %v877_v2  ;;  %v876_v21 = vadd.f32 %v725_v0, %v5889_v27  ;;  %4850 = vmatprep.mubr.f32.mxu0 %v3693_v57  ;;  %v3698_v57 = vld [vmem:[%s5066_s26 + $0x9a] sm:$0xff]  ;;  %v3699_v62 = vld [vmem:[%s5066_s26 + $0xaa] sm:$0xff] }
 0x125   : > { %v1031_v15 = vpop.f32.mrf.mxu0  ;;  %v4292_v38 = vpop.f32.mrf.mxu1  ;;  %4771 = vmatmul.mubr.f32.gmra.mxu1 %v3646_v51 }
 0x126   : > { %v6055_v47 = vadd.f32 %v1031_v15, %v876_v21  ;;  %v879_v37 = vadd.f32 %v4292_v38, %v5903_v6  ;;  %4773 = vmatprep.mubr.f32.mxu1 %v3647_v17  ;;  %v3652_v17 = vld [vmem:[%s5066_s26 + $0xb1] sm:$0xff]  ;;  %v3653_v15 = vld [vmem:[%s5066_s26 + $0xc1] sm:$0xff] }
 0x127   : > { %v4372_v30 = vpop.f32.mrf.mxu0  ;;  %4851 = vmatmul.mubr.f32.gmra.mxu0 %v3694_v22  ;;  %v735_v35 = vpop.f32.mrf.mxu1 }
 0x128   : > { %v6060_v27 = vadd.f32 %v4372_v30, %v879_v37  ;;  %v878_v28 = vadd.f32 %v735_v35, %v5913_v32  ;;  %4853 = vmatprep.mubr.f32.mxu0 %v3695_v24  ;;  %v3700_v24 = vld [vmem:[%s5066_s26 + $0xb2] sm:$0xff]  ;;  %v3701_v30 = vld [vmem:[%s5066_s26 + $0xc2] sm:$0xff] }
 0x129   : > { %v1041_v49 = vpop.f32.mrf.mxu0  ;;  %v4295_v52 = vpop.f32.mrf.mxu1  ;;  %4774 = vmatmul.mubr.f32.gmra.mxu1 %v3648_v14 }
 0x12a   : > { %v6065_v6 = vadd.f32 %v1041_v49, %v878_v28  ;;  %v881_v1 = vadd.f32 %v4295_v52, %v5927_v8  ;;  %4776 = vmatprep.mubr.f32.mxu1 %v3649_v54  ;;  %v3654_v54 = vld [vmem:[%s5066_s26 + $0xc9] sm:$0xff]  ;;  %v3655_v49 = vld [vmem:[%s5066_s26 + $0xd9] sm:$0xff] }
 0x12b   : > { %v4375_v31 = vpop.f32.mrf.mxu0  ;;  %4854 = vmatmul.mubr.f32.gmra.mxu0 %v3696_v33  ;;  %v745_v34 = vpop.f32.mrf.mxu1 }
 0x12c   : > { %v6070_v32 = vadd.f32 %v4375_v31, %v881_v1  ;;  %v880_v42 = vadd.f32 %v745_v34, %v5935_v3  ;;  %4856 = vmatprep.mubr.f32.mxu0 %v3697_v60  ;;  %v3702_v60 = vld [vmem:[%s5066_s26 + $0xca] sm:$0xff]  ;;  %v3703_v31 = vld [vmem:[%s5066_s26 + $0xda] sm:$0xff] }
 0x12d   : > { %v1051_v2 = vpop.f32.mrf.mxu0  ;;  %v4298_v51 = vpop.f32.mrf.mxu1  ;;  %4777 = vmatmul.mubr.f32.gmra.mxu1 %v3650_v12 }
 0x12e   : > { %v6075_v8 = vadd.f32 %v1051_v2, %v880_v42  ;;  %v883_v0 = vadd.f32 %v4298_v51, %v5949_v36  ;;  %4779 = vmatprep.mubr.f32.mxu1 %v3651_v39  ;;  %v3656_v39 = vld [vmem:[%s5066_s26 + $0xe1] sm:$0xff]  ;;  %v3657_v2 = vld [vmem:[%s5066_s26 + $0xf1] sm:$0xff] }
 0x12f   : > { %v4378_v21 = vpop.f32.mrf.mxu0  ;;  %4857 = vmatmul.mubr.f32.gmra.mxu0 %v3698_v57  ;;  %v755_v22 = vpop.f32.mrf.mxu1 }
 0x130   : > { %v6080_v3 = vadd.f32 %v4378_v21, %v883_v0  ;;  %v882_v38 = vadd.f32 %v755_v22, %v5959_v9  ;;  %4859 = vmatprep.mubr.f32.mxu0 %v3699_v62  ;;  %v3704_v62 = vld [vmem:[%s5066_s26 + $0xe2] sm:$0xff]  ;;  %v3705_v21 = vld [vmem:[%s5066_s26 + $0xf2] sm:$0xff] }
 0x131   : > { %v1061_v37 = vpop.f32.mrf.mxu0  ;;  %v4301_v14 = vpop.f32.mrf.mxu1  ;;  %4780 = vmatmul.mubr.f32.gmra.mxu1 %v3652_v17 }
 0x132   : > { %v6085_v36 = vadd.f32 %v1061_v37, %v882_v38  ;;  %v885_v35 = vadd.f32 %v4301_v14, %v5973_v55  ;;  %4782 = vmatprep.mubr.f32.mxu1 %v3653_v15  ;;  %v3658_v15 = vld [vmem:[%s5066_s26 + $0xf9] sm:$0xff]  ;;  %v3659_v37 = vld [vmem:[%s5066_s26 + $0x109] sm:$0xff] }
 0x133   : > { %v4381_v28 = vpop.f32.mrf.mxu0  ;;  %4860 = vmatmul.mubr.f32.gmra.mxu0 %v3700_v24  ;;  %v765_v33 = vpop.f32.mrf.mxu1 }
 0x134   : > { %v6090_v9 = vadd.f32 %v4381_v28, %v885_v35  ;;  %v884_v52 = vadd.f32 %v765_v33, %v5981_v29  ;;  %4862 = vmatprep.mubr.f32.mxu0 %v3701_v30  ;;  %v3706_v30 = vld [vmem:[%s5066_s26 + $0xfa] sm:$0xff]  ;;  %v3707_v28 = vld [vmem:[%s5066_s26 + $0x10a] sm:$0xff] }
 0x135   : > { %v1071_v1 = vpop.f32.mrf.mxu0  ;;  %v4304_v12 = vpop.f32.mrf.mxu1  ;;  %4783 = vmatmul.mubr.f32.gmra.mxu1 %v3654_v54 }
 0x136   : > { %v6095_v55 = vadd.f32 %v1071_v1, %v884_v52  ;;  %v887_v34 = vadd.f32 %v4304_v12, %v5994_v20  ;;  %4785 = vmatprep.mubr.f32.mxu1 %v3655_v49  ;;  %v3660_v49 = vld [vmem:[%s5066_s26 + $0x111] sm:$0xff]  ;;  %v3661_v1 = vld [vmem:[%s5066_s26 + $0x121] sm:$0xff] }
 0x137   : > { %v4384_v42 = vpop.f32.mrf.mxu0  ;;  %4863 = vmatmul.mubr.f32.gmra.mxu0 %v3702_v60  ;;  %v775_v57 = vpop.f32.mrf.mxu1 }
 0x138   : > { %v6100_v29 = vadd.f32 %v4384_v42, %v887_v34  ;;  %v886_v51 = vadd.f32 %v775_v57, %v6003_v45  ;;  %4865 = vmatprep.mubr.f32.mxu0 %v3703_v31  ;;  %v3708_v31 = vld [vmem:[%s5066_s26 + $0x112] sm:$0xff]  ;;  %v3709_v42 = vld [vmem:[%s5066_s26 + $0x122] sm:$0xff] }
 0x139   : > { %v1081_v0 = vpop.f32.mrf.mxu0  ;;  %v4307_v17 = vpop.f32.mrf.mxu1  ;;  %4786 = vmatmul.mubr.f32.gmra.mxu1 %v3656_v39 }
 0x13a   : > { %v6105_v20 = vadd.f32 %v1081_v0, %v886_v51  ;;  %v889_v22 = vadd.f32 %v4307_v17, %v6022_v40  ;;  %4788 = vmatprep.mubr.f32.mxu1 %v3657_v2  ;;  %v3662_v2 = vld [vmem:[%s5066_s26 + $0x129] sm:$0xff]  ;;  %v3663_v0 = vld [vmem:[%s5066_s26 + $0x139] sm:$0xff] }
 0x13b   : > { %v4387_v38 = vpop.f32.mrf.mxu0  ;;  %4866 = vmatmul.mubr.f32.gmra.mxu0 %v3704_v62  ;;  %v785_v24 = vpop.f32.mrf.mxu1 }
 0x13c   : > { %v6110_v45 = vadd.f32 %v4387_v38, %v889_v22  ;;  %v888_v14 = vadd.f32 %v785_v24, %v6031_v43  ;;  %4868 = vmatprep.mubr.f32.mxu0 %v3705_v21  ;;  %v3710_v21 = vld [vmem:[%s5066_s26 + $0x12a] sm:$0xff]  ;;  %v3711_v38 = vld [vmem:[%s5066_s26 + $0x13a] sm:$0xff] }
 0x13d   : > { %v1091_v35 = vpop.f32.mrf.mxu0  ;;  %v4310_v54 = vpop.f32.mrf.mxu1  ;;  %4789 = vmatmul.mubr.f32.gmra.mxu1 %v3658_v15 }
 0x13e   : > { %v6115_v40 = vadd.f32 %v1091_v35, %v888_v14  ;;  %v891_v33 = vadd.f32 %v4310_v54, %v5851_v44  ;;  %4791 = vmatprep.mubr.f32.mxu1 %v3659_v37  ;;  %v3664_v37 = vld [vmem:[%s5066_s26 + $0x141] sm:$0xff]  ;;  %v3665_v35 = vld [vmem:[%s5066_s26 + $0x151] sm:$0xff] }
 0x13f   : > { %v4390_v52 = vpop.f32.mrf.mxu0  ;;  %4869 = vmatmul.mubr.f32.gmra.mxu0 %v3706_v30  ;;  %v795_v60 = vpop.f32.mrf.mxu1 }
 0x140   : > { %v6120_v43 = vadd.f32 %v4390_v52, %v891_v33  ;;  %v890_v12 = vadd.f32 %v795_v60, %v5861_v4  ;;  %4871 = vmatprep.mubr.f32.mxu0 %v3707_v28  ;;  %v3712_v28 = vld [vmem:[%s5066_s26 + $0x142] sm:$0xff]  ;;  %v3713_v52 = vld [vmem:[%s5066_s26 + $0x152] sm:$0xff] }
 0x141   : > { %v1101_v34 = vpop.f32.mrf.mxu0  ;;  %v4313_v39 = vpop.f32.mrf.mxu1  ;;  %4792 = vmatmul.mubr.f32.gmra.mxu1 %v3660_v49 }
 0x142   : > { %v6125_v44 = vadd.f32 %v1101_v34, %v890_v12  ;;  %v893_v57 = vadd.f32 %v4313_v39, %v5873_v26  ;;  %4794 = vmatprep.mubr.f32.mxu1 %v3661_v1  ;;  %v3666_v1 = vld [vmem:[%s5066_s26 + $0x159] sm:$0xff]  ;;  %v3667_v34 = vld [vmem:[%s5066_s26 + $0x169] sm:$0xff] }
 0x143   : > { %v4393_v51 = vpop.f32.mrf.mxu0  ;;  %4872 = vmatmul.mubr.f32.gmra.mxu0 %v3708_v31  ;;  %v805_v62 = vpop.f32.mrf.mxu1 }
 0x144   : > { %v6130_v4 = vadd.f32 %v4393_v51, %v893_v57  ;;  %v892_v17 = vadd.f32 %v805_v62, %v5883_v50  ;;  %4874 = vmatprep.mubr.f32.mxu0 %v3709_v42  ;;  %v3714_v42 = vld [vmem:[%s5066_s26 + $0x15a] sm:$0xff]  ;;  %v3715_v51 = vld [vmem:[%s5066_s26 + $0x16a] sm:$0xff] }
 0x145   : > { %v1111_v22 = vpop.f32.mrf.mxu0  ;;  %v4316_v15 = vpop.f32.mrf.mxu1  ;;  %4795 = vmatmul.mubr.f32.gmra.mxu1 %v3662_v2 }
 0x146   : > { %v6135_v26 = vadd.f32 %v1111_v22, %v892_v17  ;;  %v895_v24 = vadd.f32 %v4316_v15, %v5897_v59  ;;  %4797 = vmatprep.mubr.f32.mxu1 %v3663_v0  ;;  %v3668_v0 = vld [vmem:[%s5066_s26 + $0x171] sm:$0xff] }
 0x147   : > { %v4396_v14 = vpop.f32.mrf.mxu0  ;;  %4875 = vmatmul.mubr.f32.gmra.mxu0 %v3710_v21  ;;  %v815_v30 = vpop.f32.mrf.mxu1  ;;  %v3716_v15 = vld [vmem:[%s5066_s26 + $0x172] sm:$0xff] }
 0x148   : > { %v6140_v50 = vadd.f32 %v4396_v14, %v895_v24  ;;  %v894_v54 = vadd.f32 %v815_v30, %v5905_v11  ;;  %4877 = vmatprep.mubr.f32.mxu0 %v3711_v38 }
 0x149   : > { %v1121_v33 = vpop.f32.mrf.mxu0  ;;  %v4319_v49 = vpop.f32.mrf.mxu1  ;;  %4798 = vmatmul.mubr.f32.gmra.mxu1 %v3664_v37 }
 0x14a   : > { %v6145_v59 = vadd.f32 %v1121_v33, %v894_v54  ;;  %v897_v60 = vadd.f32 %v4319_v49, %v5919_v56  ;;  %4800 = vmatprep.mubr.f32.mxu1 %v3665_v35  ;;  %v3671_v35 = vld [vmem:[%s5066_s26 + $0x199] sm:$0xff] }
 0x14b   : > { %v4399_v12 = vpop.f32.mrf.mxu0  ;;  %4878 = vmatmul.mubr.f32.gmra.mxu0 %v3712_v28  ;;  %v825_v31 = vpop.f32.mrf.mxu1  ;;  %v3719_v49 = vld [vmem:[%s5066_s26 + $0x19a] sm:$0xff] }
 0x14c   : > { %v6150_v11 = vadd.f32 %v4399_v12, %v897_v60  ;;  %v896_v39 = vadd.f32 %v825_v31, %v5929_v61  ;;  %4880 = vmatprep.mubr.f32.mxu0 %v3713_v52  ;;  %v3672_v52 = vld [vmem:[%s5066_s26 + $0x1a1] sm:$0xff] }
 0x14d   : > { %v1131_v57 = vpop.f32.mrf.mxu0  ;;  %v4322_v2 = vpop.f32.mrf.mxu1  ;;  %4801 = vmatmul.mubr.f32.gmra.mxu1 %v3666_v1 }
 0x14e   : > { %v6155_v62 = vadd.f32 %v1131_v57, %v896_v39  ;;  %v899_v56 = vadd.f32 %v4322_v2, %v5943_v25  ;;  %4803 = vmatprep.mubr.f32.mxu1 %v3667_v34 }
 0x14f   : > { %v4402_v17 = vpop.f32.mrf.mxu0  ;;  %4881 = vmatmul.mubr.f32.gmra.mxu0 %v3714_v42  ;;  %v835_v21 = vpop.f32.mrf.mxu1 }
 0x150   : > { %v6159_v22 = vadd.f32 %v4402_v17, %v899_v56  ;;  %v898_v61 = vadd.f32 %v835_v21, %v5951_v41  ;;  %4883 = vmatprep.mubr.f32.mxu0 %v3715_v51 }
 0x151   : > { %v1141_v38 = vpop.f32.mrf.mxu0  ;;  %v4325_v24 = vpop.f32.mrf.mxu1  ;;  %4804 = vmatmul.mubr.f32.gmra.mxu1 %v3668_v0 }
 0x152   : > { %v6163_v37 = vadd.f32 %v1141_v38, %v898_v61  ;;  %v901_v25 = vadd.f32 %v4325_v24, %v5965_v23  ;;  %4806 = vmatprep.mubr.f32.mxu1 %v5786_v46 }
 0x153   : > { %v4405_v14 = vpop.f32.mrf.mxu0  ;;  %4884 = vmatmul.mubr.f32.gmra.mxu0 %v3716_v15  ;;  %v845_v30 = vpop.f32.mrf.mxu1 }
 0x154   : > { %v6168_v54 = vadd.f32 %v4405_v14, %v901_v25  ;;  %v900_v41 = vadd.f32 %v845_v30, %v5975_v58  ;;  %4886 = vmatprep.mubr.f32.mxu0 %v6006_v48  ;;  %v3720_v48 = vld [vmem:[%s5066_s26 + $0x1a2] sm:$0xff]  ;;  %s3739_s26 = sshll.u32 %s6923_s12, 8 }
 0x155   : > { %v1151_v28 = vpop.f32.mrf.mxu0  ;;  %v4328_v33 = vpop.f32.mrf.mxu1  ;;  %4807 = vmatmul.mubr.f32.gmra.mxu1 %v5793_v53  ;;  %s6420_s22 = scalar_lea.vmem %s6750_s2, %s3739_s26 }
 0x156   : > { %v6174_v23 = vadd.f32 %v1151_v28, %v900_v41  ;;  %v903_v46 = vadd.f32 %v4328_v33, %v5989_v13  ;;  %4809 = vmatprep.mubr.f32.mxu1 %v3671_v35 }
 0x157   : > { %v4408_v60 = vpop.f32.mrf.mxu0  ;;  %4887 = vmatmul.mubr.f32.gmra.mxu0 %v6010_v5  ;;  %v855_v1 = vpop.f32.mrf.mxu1 }
 0x158   : > { %v6179_v12 = vadd.f32 %v4408_v60, %v903_v46  ;;  %v902_v58 = vadd.f32 %v855_v1, %v5996_v10  ;;  %4889 = vmatprep.mubr.f32.mxu0 %v3719_v49 }
 0x159   : > { %v1161_v31 = vpop.f32.mrf.mxu0  ;;  %v4331_v34 = vpop.f32.mrf.mxu1  ;;  %4810 = vmatmul.mubr.f32.gmra.mxu1 %v3672_v52 }
 0x15a   : > { %v6183_v53 = vadd.f32 %v1161_v31, %v902_v58  ;;  %v905_v39 = vadd.f32 %v4331_v34, %v6013_v7 }
 0x15b   : > { %v4411_v13 = vpop.f32.mrf.mxu0  ;;  %4890 = vmatmul.mubr.f32.gmra.mxu0 %v3720_v48  ;;  %v865_v42 = vpop.f32.mrf.mxu1 }
 0x15c   : > { %v6186_v57 = vadd.f32 %v4411_v13, %v905_v39  ;;  %v904_v5 = vadd.f32 %v865_v42, %v6024_v19 }
 0x15d   : > { %v1171_v2 = vpop.f32.mrf.mxu0  ;;  %v4446_v51 = vpop.f32.mrf.mxu1 }
 0x15e   : > { %v6189_v56 = vadd.f32 %v1171_v2, %v904_v5  ;;  %v1488_v10 = vadd.f32 %v4446_v51, %v6040_v18 }
 0x15f   : > { %v4526_v0 = vpop.f32.mrf.mxu0  ;;  %v1328_v17 = vpop.f32.mrf.mxu1 }
 0x160   : > { %v6192_v21 = vadd.f32 %v4526_v0, %v1488_v10  ;;  %v1487_v61 = vadd.f32 %v1328_v17, %v6045_v63 }
 0x161   : > { %v1634_v7 = vpop.f32.mrf.mxu0  ;;  %v4449_v15 = vpop.f32.mrf.mxu1 }
 0x162   : > { %v6195_v38 = vadd.f32 %v1634_v7, %v1487_v61  ;;  %v1490_v24 = vadd.f32 %v4449_v15, %v6050_v16 }
 0x163   : > { %v4529_v25 = vpop.f32.mrf.mxu0  ;;  %v1338_v19 = vpop.f32.mrf.mxu1 }
 0x164   : > { %v6198_v14 = vadd.f32 %v4529_v25, %v1490_v24  ;;  %v1489_v30 = vadd.f32 %v1338_v19, %v6055_v47 }
 0x165   : > { %v1644_v35 = vpop.f32.mrf.mxu0  ;;  %v4452_v18 = vpop.f32.mrf.mxu1 }
 0x166   : > { %v6201_v41 = vadd.f32 %v1644_v35, %v1489_v30  ;;  %v1492_v28 = vadd.f32 %v4452_v18, %v6060_v27 }
 0x167   : > { %v4532_v33 = vpop.f32.mrf.mxu0  ;;  %v1348_v63 = vpop.f32.mrf.mxu1 }
 0x168   : > { %v6204_v49 = vadd.f32 %v4532_v33, %v1492_v28  ;;  %v1491_v46 = vadd.f32 %v1348_v63, %v6065_v6 }
 0x169   : > { %v1654_v52 = vpop.f32.mrf.mxu0  ;;  %v4455_v16 = vpop.f32.mrf.mxu1 }
 0x16a   : > { %v6207_v60 = vadd.f32 %v1654_v52, %v1491_v46  ;;  %v1494_v1 = vadd.f32 %v4455_v16, %v6070_v32 }
 0x16b   : > { %v4535_v58 = vpop.f32.mrf.mxu0  ;;  %v1358_v47 = vpop.f32.mrf.mxu1 }
 0x16c   : > { %v6210_v48 = vadd.f32 %v4535_v58, %v1494_v1  ;;  %v1493_v31 = vadd.f32 %v1358_v47, %v6075_v8 }
 0x16d   : > { %v1664_v34 = vpop.f32.mrf.mxu0  ;;  %v4458_v27 = vpop.f32.mrf.mxu1 }
 0x16e   : > { %v6213_v39 = vadd.f32 %v1664_v34, %v1493_v31  ;;  %v1496_v13 = vadd.f32 %v4458_v27, %v6080_v3 }
 0x16f   : > { %v4538_v42 = vpop.f32.mrf.mxu0  ;;  %v1368_v6 = vpop.f32.mrf.mxu1 }
 0x170   : > { %v6216_v5 = vadd.f32 %v4538_v42, %v1496_v13  ;;  %v1495_v2 = vadd.f32 %v1368_v6, %v6085_v36 }
 0x171   : > { %v1674_v51 = vpop.f32.mrf.mxu0  ;;  %v4461_v32 = vpop.f32.mrf.mxu1 }
 0x172   : > { %v6219_v10 = vadd.f32 %v1674_v51, %v1495_v2  ;;  %v1498_v0 = vadd.f32 %v4461_v32, %v6090_v9 }
 0x173   : > { %v4541_v17 = vpop.f32.mrf.mxu0  ;;  %v1378_v8 = vpop.f32.mrf.mxu1 }
 0x174   : > { %v6222_v61 = vadd.f32 %v4541_v17, %v1498_v0  ;;  %v1497_v7 = vadd.f32 %v1378_v8, %v6095_v55 }
 0x175   : > { %v1684_v15 = vpop.f32.mrf.mxu0  ;;  %v4464_v3 = vpop.f32.mrf.mxu1 }
 0x176   : > { %v6225_v24 = vadd.f32 %v1684_v15, %v1497_v7  ;;  %v1500_v25 = vadd.f32 %v4464_v3, %v6100_v29 }
 0x177   : > { %v4544_v19 = vpop.f32.mrf.mxu0  ;;  %v1388_v36 = vpop.f32.mrf.mxu1 }
 0x178   : > { %v6228_v30 = vadd.f32 %v4544_v19, %v1500_v25  ;;  %v1499_v35 = vadd.f32 %v1388_v36, %v6105_v20 }
 0x179   : > { %v1694_v18 = vpop.f32.mrf.mxu0  ;;  %v4467_v9 = vpop.f32.mrf.mxu1 }
 0x17a   : > { %v6231_v28 = vadd.f32 %v1694_v18, %v1499_v35  ;;  %v1502_v33 = vadd.f32 %v4467_v9, %v6110_v45 }
 0x17b   : > { %v4547_v63 = vpop.f32.mrf.mxu0  ;;  %v1398_v55 = vpop.f32.mrf.mxu1 }
 0x17c   : > { %v6234_v46 = vadd.f32 %v4547_v63, %v1502_v33  ;;  %v1501_v52 = vadd.f32 %v1398_v55, %v6115_v40 }
 0x17d   : > { %v1704_v16 = vpop.f32.mrf.mxu0  ;;  %v4470_v29 = vpop.f32.mrf.mxu1 }
 0x17e   : > { %v6237_v1 = vadd.f32 %v1704_v16, %v1501_v52  ;;  %v1504_v58 = vadd.f32 %v4470_v29, %v6120_v43 }
 0x17f   : > { %v4550_v47 = vpop.f32.mrf.mxu0  ;;  %v1408_v20 = vpop.f32.mrf.mxu1 }
 0x180   : > { %v6240_v31 = vadd.f32 %v4550_v47, %v1504_v58  ;;  %v1503_v34 = vadd.f32 %v1408_v20, %v6125_v44 }
 0x181   : > { %v1714_v27 = vpop.f32.mrf.mxu0  ;;  %v4473_v45 = vpop.f32.mrf.mxu1 }
 0x182   : > { %v6243_v13 = vadd.f32 %v1714_v27, %v1503_v34  ;;  %v1506_v42 = vadd.f32 %v4473_v45, %v6130_v4 }
 0x183   : > { %v4553_v6 = vpop.f32.mrf.mxu0  ;;  %v1418_v40 = vpop.f32.mrf.mxu1 }
 0x184   : > { %v6246_v2 = vadd.f32 %v4553_v6, %v1506_v42  ;;  %v1505_v51 = vadd.f32 %v1418_v40, %v6135_v26 }
 0x185   : > { %v1724_v32 = vpop.f32.mrf.mxu0  ;;  %v4476_v43 = vpop.f32.mrf.mxu1 }
 0x186   : > { %6842 = vst [vmem:[#allocation31_spill] sm:$0xff] %v6246_v2  ;;  %v6249_v0 = vadd.f32 %v1724_v32, %v1505_v51  ;;  %v1508_v17 = vadd.f32 %v4476_v43, %v6140_v50 }
 0x187   : > { %v4556_v8 = vpop.f32.mrf.mxu0  ;;  %v1428_v44 = vpop.f32.mrf.mxu1 }
 0x188   : > { %6843 = vst [vmem:[#allocation3_spill] sm:$0xff] %v6249_v0  ;;  %v6252_v7 = vadd.f32 %v4556_v8, %v1508_v17  ;;  %v1507_v15 = vadd.f32 %v1428_v44, %v6145_v59 }
 0x189   : > { %v1734_v3 = vpop.f32.mrf.mxu0  ;;  %v4479_v4 = vpop.f32.mrf.mxu1 }
 0x18a   : > { %6844 = vst [vmem:[#allocation4_spill] sm:$0xff] %v6252_v7  ;;  %v6255_v25 = vadd.f32 %v1734_v3, %v1507_v15  ;;  %v1510_v19 = vadd.f32 %v4479_v4, %v6150_v11 }
 0x18b   : > { %v4559_v36 = vpop.f32.mrf.mxu0  ;;  %v1438_v26 = vpop.f32.mrf.mxu1 }
 0x18c   : > { %6845 = vst [vmem:[#allocation5_spill] sm:$0xff] %v6255_v25  ;;  %v6258_v35 = vadd.f32 %v4559_v36, %v1510_v19  ;;  %v1509_v18 = vadd.f32 %v1438_v26, %v6155_v62 }
 0x18d   : > { %v1744_v9 = vpop.f32.mrf.mxu0  ;;  %v4482_v50 = vpop.f32.mrf.mxu1 }
 0x18e   : > { %6846 = vst [vmem:[#allocation6_spill] sm:$0xff] %v6258_v35  ;;  %v6261_v33 = vadd.f32 %v1744_v9, %v1509_v18  ;;  %v1512_v63 = vadd.f32 %v4482_v50, %v6159_v22 }
 0x18f   : > { %v4562_v55 = vpop.f32.mrf.mxu0  ;;  %v1448_v59 = vpop.f32.mrf.mxu1 }
 0x190   : > { %6847 = vst [vmem:[#allocation7_spill] sm:$0xff] %v6261_v33  ;;  %v6264_v52 = vadd.f32 %v4562_v55, %v1512_v63  ;;  %v1511_v16 = vadd.f32 %v1448_v59, %v6163_v37 }
 0x191   : > { %v1754_v29 = vpop.f32.mrf.mxu0  ;;  %v4485_v11 = vpop.f32.mrf.mxu1 }
 0x192   : > { %6848 = vst [vmem:[#allocation8_spill] sm:$0xff] %v6264_v52  ;;  %v6267_v58 = vadd.f32 %v1754_v29, %v1511_v16  ;;  %v1514_v47 = vadd.f32 %v4485_v11, %v6168_v54 }
 0x193   : > { %v4565_v20 = vpop.f32.mrf.mxu0  ;;  %v1458_v62 = vpop.f32.mrf.mxu1 }
 0x194   : > { %6849 = vst [vmem:[#allocation9_spill] sm:$0xff] %v6267_v58  ;;  %v6270_v34 = vadd.f32 %v4565_v20, %v1514_v47  ;;  %v1513_v27 = vadd.f32 %v1458_v62, %v6174_v23 }
 0x195   : > { %v1764_v45 = vpop.f32.mrf.mxu0  ;;  %v4488_v22 = vpop.f32.mrf.mxu1 }
 0x196   : > { %6850 = vst [vmem:[#allocation10_spill] sm:$0xff] %v6270_v34  ;;  %v6273_v42 = vadd.f32 %v1764_v45, %v1513_v27  ;;  %v1516_v6 = vadd.f32 %v4488_v22, %v6179_v12 }
 0x197   : > { %v4568_v40 = vpop.f32.mrf.mxu0  ;;  %v1468_v37 = vpop.f32.mrf.mxu1 }
 0x198   : > { %6851 = vst [vmem:[#allocation11_spill] sm:$0xff] %v6273_v42  ;;  %v6276_v51 = vadd.f32 %v4568_v40, %v1516_v6  ;;  %v1515_v32 = vadd.f32 %v1468_v37, %v6183_v53 }
 0x199   : > { %v1774_v43 = vpop.f32.mrf.mxu0  ;;  %v4491_v54 = vpop.f32.mrf.mxu1 }
 0x19a   : > { %6852 = vst [vmem:[#allocation12_spill] sm:$0xff] %v6276_v51  ;;  %v6279_v17 = vadd.f32 %v1774_v43, %v1515_v32  ;;  %v1518_v8 = vadd.f32 %v4491_v54, %v6186_v57 }
 0x19b   : > { %v4571_v44 = vpop.f32.mrf.mxu0  ;;  %v1478_v23 = vpop.f32.mrf.mxu1 }
 0x19c   : > { %6853 = vst [vmem:[#allocation13_spill] sm:$0xff] %v6279_v17  ;;  %v6282_v15 = vadd.f32 %v4571_v44, %v1518_v8  ;;  %v1517_v3 = vadd.f32 %v1478_v23, %v6189_v56 }
 0x19d   : > { %v1784_v4 = vpop.f32.mrf.mxu0  ;;  %v4606_v12 = vpop.f32.mrf.mxu1 }
 0x19e   : > { %6854 = vst [vmem:[#allocation14_spill] sm:$0xff] %v6282_v15  ;;  %v6285_v19 = vadd.f32 %v1784_v4, %v1517_v3 }
 0x19f   : > { %v6287_v36 = vpop.f32.mrf.mxu0  ;;  %v1940_v26 = vpop.f32.mrf.mxu1 }
 0x1a0   : > { %6855 = vst [vmem:[#allocation15_spill] sm:$0xff] %v6285_v19 }
 0x1a1   : > { %v6289_v53 = vpop.f32.mrf.mxu0  ;;  %v4609_v18 = vpop.f32.mrf.mxu1 }
 0x1a3   : > { %v6291_v9 = vpop.f32.mrf.mxu0  ;;  %v6293_v50 = vpop.f32.mrf.mxu1 }
 0x1a5   : > { %v6295_v57 = vpop.f32.mrf.mxu0  ;;  %v6297_v63 = vpop.f32.mrf.mxu1 }
 0x1a7   : > { %v6299_v55 = vpop.f32.mrf.mxu0  ;;  %v6301_v56 = vpop.f32.mrf.mxu1 }
 0x1a9   : > { %v6303_v59 = vpop.f32.mrf.mxu0  ;;  %v6305_v16 = vpop.f32.mrf.mxu1 }
 0x1ab   : > { %v6307_v29 = vpop.f32.mrf.mxu0  ;;  %v6309_v11 = vpop.f32.mrf.mxu1 }
 0x1ad   : > { %v6311_v47 = vpop.f32.mrf.mxu0  ;;  %v6313_v20 = vpop.f32.mrf.mxu1 }
 0x1af   : > { %v6315_v62 = vpop.f32.mrf.mxu0  ;;  %v6317_v27 = vpop.f32.mrf.mxu1 }
 0x1b1   : > { %v6319_v45 = vpop.f32.mrf.mxu0  ;;  %v6321_v22 = vpop.f32.mrf.mxu1 }
 0x1b3   : > { %v6323_v6 = vpop.f32.mrf.mxu0  ;;  %v6325_v40 = vpop.f32.mrf.mxu1 }
 0x1b5   : > { %v6327_v37 = vpop.f32.mrf.mxu0  ;;  %v6329_v32 = vpop.f32.mrf.mxu1 }
 0x1b7   : > { %v6331_v43 = vpop.f32.mrf.mxu0  ;;  %v6333_v54 = vpop.f32.mrf.mxu1 }
 0x1b9   : > { %v6335_v8 = vpop.f32.mrf.mxu0  ;;  %v6337_v44 = vpop.f32.mrf.mxu1 }
 0x1bb   : > { %v6339_v23 = vpop.f32.mrf.mxu0  ;;  %v6341_v3 = vpop.f32.mrf.mxu1 }
 0x1bd   : > { %v6343_v4 = vpop.f32.mrf.mxu0  ;;  %v6345_v19 = vpop.f32.mrf.mxu1 }
 0x1bf   : > { %v6347_v15 = vpop.f32.mrf.mxu0  ;;  %v6349_v17 = vpop.f32.mrf.mxu1 }
 0x1c1   : > { %v6351_v51 = vpop.f32.mrf.mxu0  ;;  %v6353_v42 = vpop.f32.mrf.mxu1 }
 0x1c2   : > { %6856 = vst [vmem:[#allocation16_spill] sm:$0xff] %v6351_v51  ;;  %6857 = vst [vmem:[#allocation17_spill] sm:$0xff] %v6353_v42 }
 0x1c3   : > { %v6355_v34 = vpop.f32.mrf.mxu0  ;;  %v6357_v58 = vpop.f32.mrf.mxu1 }
 0x1c4   : > { %6858 = vst [vmem:[#allocation18_spill] sm:$0xff] %v6355_v34  ;;  %6859 = vst [vmem:[#allocation19_spill] sm:$0xff] %v6357_v58 }
 0x1c5   : > { %v6359_v52 = vpop.f32.mrf.mxu0  ;;  %v6361_v33 = vpop.f32.mrf.mxu1 }
 0x1c6   : > { %6860 = vst [vmem:[#allocation20_spill] sm:$0xff] %v6359_v52  ;;  %6861 = vst [vmem:[#allocation21_spill] sm:$0xff] %v6361_v33 }
 0x1c7   : > { %v6363_v35 = vpop.f32.mrf.mxu0  ;;  %v6365_v25 = vpop.f32.mrf.mxu1 }
 0x1c8   : > { %6862 = vst [vmem:[#allocation22_spill] sm:$0xff] %v6363_v35  ;;  %6863 = vst [vmem:[#allocation23_spill] sm:$0xff] %v6365_v25 }
 0x1c9   : > { %v6367_v7 = vpop.f32.mrf.mxu0  ;;  %v6369_v0 = vpop.f32.mrf.mxu1 }
 0x1ca   : > { %6864 = vst [vmem:[#allocation24_spill] sm:$0xff] %v6367_v7  ;;  %6865 = vst [vmem:[#allocation25_spill] sm:$0xff] %v6369_v0 }
 0x1cb   : > { %v6371_v2 = vpop.f32.mrf.mxu0  ;;  %v6373_v51 = vpop.f32.mrf.mxu1 }
 0x1cc   : > { %6866 = vst [vmem:[#allocation26_spill] sm:$0xff] %v6371_v2  ;;  %6867 = vst [vmem:[#allocation27_spill] sm:$0xff] %v6373_v51 }
 0x1cd   : > { %v6375_v42 = vpop.f32.mrf.mxu0  ;;  %v6377_v34 = vpop.f32.mrf.mxu1 }
 0x1ce   : > { %6868 = vst [vmem:[#allocation28_spill] sm:$0xff] %v6375_v42  ;;  %6869 = vst [vmem:[#allocation29_spill] sm:$0xff] %v6377_v34 }
 0x1cf   : > { %v6379_v58 = vpop.f32.mrf.mxu0  ;;  %v6381_v52 = vpop.f32.mrf.mxu1 }
 0x1d0   : > { %6870 = vst [vmem:[#allocation30_spill] sm:$0xff] %v6379_v58  ;;  %6871 = vst [vmem:[#allocation32_spill] sm:$0xff] %v6381_v52  ;;  %v2100_v58 = vadd.f32 %v4606_v12, %v6192_v21  ;;  %v2101_v12 = vadd.f32 %v6293_v50, %v6201_v41  ;;  %v2103_v41 = vadd.f32 %v6301_v56, %v6207_v60 }
 0x1d1   : > { %v6383_v33 = vpop.f32.mrf.mxu0  ;;  %v6385_v35 = vpop.f32.mrf.mxu1 }
 0x1d2   : > { %6872 = vst [vmem:[#allocation33_spill] sm:$0xff] %v6383_v33  ;;  %6873 = vst [vmem:[#allocation34_spill] sm:$0xff] %v6385_v35  ;;  %v2099_v35 = vadd.f32 %v1940_v26, %v6195_v38 }
 0x1d3   : > { %v6387_v7 = vpop.f32.mrf.mxu0  ;;  %v6389_v0 = vpop.f32.mrf.mxu1 }
 0x1d4   : > { %6874 = vst [vmem:[#allocation35_spill] sm:$0xff] %v6387_v7  ;;  %v2406_v21 = vadd.f32 %v6289_v53, %v2099_v35  ;;  %v2408_v53 = vadd.f32 %v6295_v57, %v2101_v12  ;;  %v2410_v57 = vadd.f32 %v6303_v59, %v2103_v41  ;;  %v2105_v12 = vadd.f32 %v6309_v11, %v6213_v39 }
 0x1d5   : > { %v6391_v2 = vpop.f32.mrf.mxu0  ;;  %v6393_v51 = vpop.f32.mrf.mxu1 }
 0x1d6   : > { %6875 = vst [vmem:[#allocation36_spill] sm:$0xff] %v6391_v2  ;;  %6876 = vst [vmem:[#allocation37_spill] sm:$0xff] %v6393_v51  ;;  %v2407_v2 = vadd.f32 %v6287_v36, %v2100_v58  ;;  %v2102_v51 = vadd.f32 %v4609_v18, %v6198_v14  ;;  %v2104_v36 = vadd.f32 %v6297_v63, %v6204_v49 }
 0x1d7   : > { %v6395_v42 = vpop.f32.mrf.mxu0  ;;  %v6397_v34 = vpop.f32.mrf.mxu1 }
 0x1d8   : > { %6877 = vst [vmem:[#allocation38_spill] sm:$0xff] %v6395_v42  ;;  %6878 = vst [vmem:[#allocation39_spill] sm:$0xff] %v6397_v34  ;;  %v2409_v14 = vadd.f32 %v6291_v9, %v2102_v51  ;;  %v2411_v49 = vadd.f32 %v6299_v55, %v2104_v36 }
 0x1d9   : > { %v6400_v52 = vpop.f32.mrf.mxu0  ;;  %v6402_v33 = vpop.f32.mrf.mxu1 }
 0x1da   : > { %6879 = vst [vmem:[#allocation40_spill] sm:$0xff] %v6400_v52 }
 0x1db   : > { %v6405_v25 = vpop.f32.mrf.mxu0  ;;  %v6407_v7 = vpop.f32.mrf.mxu1 }
 0x1dd   : > { %v6412_v42 = vpop.f32.mrf.mxu0  ;;  %v4766_v34 = vpop.f32.mrf.mxu1 }
 0x1de   : > { %v2713_v52 = vadd.f32 %v4766_v34, %v2407_v2 }
 0x1df   : > { %v4846_v38 = vpop.f32.mrf.mxu0  ;;  %v2553_v58 = vpop.f32.mrf.mxu1 }
 0x1e0   : > { %v6425_v26 = vadd.f32 %v4846_v38, %v2713_v52  ;;  %v2712_v35 = vadd.f32 %v2553_v58, %v2406_v21  ;;  %v2106_v52 = vadd.f32 %v6305_v16, %v6210_v48  ;;  %v2108_v16 = vadd.f32 %v6313_v20, %v6216_v5 }
 0x1e1   : > { %v2859_v2 = vpop.f32.mrf.mxu0  ;;  %v4769_v34 = vpop.f32.mrf.mxu1 }
 0x1e2   : > { %3118 = vst [vmem:[%s6420_s22 + $0x8] sm:$0xff] %v6425_v26  ;;  %v6432_v18 = vadd.f32 %v2859_v2, %v2712_v35  ;;  %v2715_v50 = vadd.f32 %v4769_v34, %v2409_v14  ;;  %v2413_v59 = vadd.f32 %v6307_v29, %v2106_v52  ;;  %v2107_v35 = vadd.f32 %v6317_v27, %v6219_v10 }
 0x1e3   : > { %v4849_v51 = vpop.f32.mrf.mxu0  ;;  %v2563_v9 = vpop.f32.mrf.mxu1  ;;  %v2412_v34 = vadd.f32 %v6311_v47, %v2105_v12 }
 0x1e4   : > { %3117 = vst [vmem:[%s6420_s22] sm:$0xff] %v6432_v18  ;;  %v6439_v60 = vadd.f32 %v4849_v51, %v2715_v50  ;;  %v2714_v63 = vadd.f32 %v2563_v9, %v2408_v53  ;;  %v3149_v38 = vadd.f32 %v6425_v26, %v6432_v18  ;;  %v2415_v53 = vadd.f32 %v6315_v62, %v2108_v16 }
 0x1e5   : > { %v2869_v56 = vpop.f32.mrf.mxu0  ;;  %v4772_v21 = vpop.f32.mrf.mxu1  ;;  %v2110_v9 = vadd.f32 %v6321_v22, %v6222_v61  ;;  %v2109_v62 = vadd.f32 %v6325_v40, %v6225_v24 }
 0x1e6   : > { %3120 = vst [vmem:[%s6420_s22 + $0x18] sm:$0xff] %v6439_v60  ;;  %v6448_v48 = vadd.f32 %v2869_v56, %v2714_v63  ;;  %v2717_v55 = vadd.f32 %v4772_v21, %v2411_v49  ;;  %v2414_v49 = vadd.f32 %v6319_v45, %v2107_v35  ;;  %v2112_v56 = vadd.f32 %v6329_v32, %v6228_v30 }
 0x1e7   : > { %v4852_v58 = vpop.f32.mrf.mxu0  ;;  %v2573_v14 = vpop.f32.mrf.mxu1  ;;  %v2417_v45 = vadd.f32 %v6323_v6, %v2110_v9  ;;  %v2114_v35 = vadd.f32 %v6337_v44, %v6234_v46  ;;  %v2115_v9 = vadd.f32 %v6349_v17, %v6243_v13 }
 0x1e8   : > { %3119 = vst [vmem:[%s6420_s22 + $0x10] sm:$0xff] %v6448_v48  ;;  %v3150_v39 = vadd.f32 %v3149_v38, %v6448_v48  ;;  %v6456_v11 = vadd.f32 %v4852_v58, %v2717_v55  ;;  %v2716_v36 = vadd.f32 %v2573_v14, %v2410_v57  ;;  %v2111_v55 = vadd.f32 %v6333_v54, %v6231_v28 }
 0x1e9   : > { %v2879_v41 = vpop.f32.mrf.mxu0  ;;  %v4775_v2 = vpop.f32.mrf.mxu1  ;;  %v2416_v14 = vadd.f32 %v6327_v37, %v2109_v62 }
 0x1ea   : > { %3122 = vst [vmem:[%s6420_s22 + $0x28] sm:$0xff] %v6456_v11  ;;  %v6463_v5 = vadd.f32 %v2879_v41, %v2716_v36  ;;  %v3151_v29 = vadd.f32 %v3150_v39, %v6439_v60  ;;  %v2719_v20 = vadd.f32 %v4775_v2, %v2413_v59  ;;  %v2419_v59 = vadd.f32 %v6331_v43, %v2112_v56 }
 0x1eb   : > { %v4855_v50 = vpop.f32.mrf.mxu0  ;;  %v2583_v51 = vpop.f32.mrf.mxu1  ;;  %v2418_v41 = vadd.f32 %v6335_v8, %v2111_v55  ;;  %v2113_v43 = vadd.f32 %v6341_v3, %v6237_v1  ;;  %v2421_v8 = vadd.f32 %v6339_v23, %v2114_v35  ;;  %v6884_v55 = vld [vmem:[#allocation19_spill] sm:$0xff]  ;;  %v6887_v35 = vld [vmem:[#allocation18_spill] sm:$0xff] }
 0x1ec   : > { %3121 = vst [vmem:[%s6420_s22 + $0x20] sm:$0xff] %v6463_v5  ;;  %v3152_v10 = vadd.f32 %v3151_v29, %v6463_v5  ;;  %v6472_v47 = vadd.f32 %v4855_v50, %v2719_v20  ;;  %v2718_v27 = vadd.f32 %v2583_v51, %v2412_v34  ;;  %v2116_v20 = vadd.f32 %v6345_v19, %v6240_v31 }
 0x1ed   : > { %v2889_v52 = vpop.f32.mrf.mxu0  ;;  %v4778_v63 = vpop.f32.mrf.mxu1 }
 0x1ee   : > { %3124 = vst [vmem:[%s6420_s22 + $0x38] sm:$0xff] %v6472_v47  ;;  %v6479_v57 = vadd.f32 %v2889_v52, %v2718_v27  ;;  %v3153_v61 = vadd.f32 %v3152_v10, %v6456_v11  ;;  %v2721_v22 = vadd.f32 %v4778_v63, %v2415_v53  ;;  %v2423_v52 = vadd.f32 %v6347_v15, %v2116_v20 }
 0x1ef   : > { %v4858_v21 = vpop.f32.mrf.mxu0  ;;  %v2593_v12 = vpop.f32.mrf.mxu1 }
 0x1f0   : > { %3123 = vst [vmem:[%s6420_s22 + $0x30] sm:$0xff] %v6479_v57  ;;  %v3154_v24 = vadd.f32 %v3153_v61, %v6479_v57  ;;  %v6488_v40 = vadd.f32 %v4858_v21, %v2721_v22  ;;  %v2720_v38 = vadd.f32 %v2593_v12, %v2414_v49  ;;  %v2420_v49 = vadd.f32 %v6343_v4, %v2113_v43  ;;  %v6880_v61 = vld [vmem:[#allocation31_spill] sm:$0xff]  ;;  %v6881_v22 = vld [vmem:[#allocation17_spill] sm:$0xff]  ;;  %v6882_v21 = vld [vmem:[#allocation16_spill] sm:$0xff] }
 0x1f1   : > { %v2899_v16 = vpop.f32.mrf.mxu0  ;;  %v4781_v58 = vpop.f32.mrf.mxu1  ;;  %v2118_v56 = vadd.f32 %v6881_v22, %v6880_v61  ;;  %v2422_v12 = vadd.f32 %v6882_v21, %v2115_v9  ;;  %v6889_v43 = vld [vmem:[#allocation23_spill] sm:$0xff]  ;;  %v6891_v9 = vld [vmem:[#allocation22_spill] sm:$0xff]  ;;  %v6894_v22 = vld [vmem:[#allocation24_spill] sm:$0xff] }
 0x1f2   : > { %3126 = vst [vmem:[%s6420_s22 + $0x48] sm:$0xff] %v6488_v40  ;;  %v6495_v30 = vadd.f32 %v2899_v16, %v2720_v38  ;;  %v3155_v6 = vadd.f32 %v3154_v24, %v6472_v47  ;;  %v2723_v32 = vadd.f32 %v4781_v58, %v2417_v45  ;;  %v6883_v38 = vld [vmem:[#allocation3_spill] sm:$0xff] }
 0x1f3   : > { %v4861_v39 = vpop.f32.mrf.mxu0  ;;  %v2603_v36 = vpop.f32.mrf.mxu1  ;;  %v2117_v15 = vadd.f32 %v6884_v55, %v6883_v38  ;;  %v6895_v21 = vld [vmem:[#allocation7_spill] sm:$0xff] }
 0x1f4   : > { %3125 = vst [vmem:[%s6420_s22 + $0x40] sm:$0xff] %v6495_v30  ;;  %v3156_v28 = vadd.f32 %v3155_v6, %v6495_v30  ;;  %v6504_v37 = vadd.f32 %v4861_v39, %v2723_v32  ;;  %v2722_v54 = vadd.f32 %v2603_v36, %v2416_v14  ;;  %v6885_v6 = vld [vmem:[#allocation4_spill] sm:$0xff]  ;;  %v6886_v32 = vld [vmem:[#allocation21_spill] sm:$0xff] }
 0x1f5   : > { %v2909_v2 = vpop.f32.mrf.mxu0  ;;  %v4784_v34 = vpop.f32.mrf.mxu1 }
 0x1f6   : > { %3128 = vst [vmem:[%s6420_s22 + $0x58] sm:$0xff] %v6504_v37  ;;  %v6511_v29 = vadd.f32 %v2909_v2, %v2722_v54  ;;  %v3157_v46 = vadd.f32 %v3156_v28, %v6488_v40  ;;  %v2725_v44 = vadd.f32 %v4784_v34, %v2419_v59  ;;  %v2120_v59 = vadd.f32 %v6886_v32, %v6885_v6  ;;  %v6888_v34 = vld [vmem:[#allocation5_spill] sm:$0xff] }
 0x1f7   : > { %v4864_v53 = vpop.f32.mrf.mxu0  ;;  %v2613_v50 = vpop.f32.mrf.mxu1  ;;  %v2425_v28 = vadd.f32 %v6887_v35, %v2118_v56 }
 0x1f8   : > { %3127 = vst [vmem:[%s6420_s22 + $0x50] sm:$0xff] %v6511_v29  ;;  %v3158_v1 = vadd.f32 %v3157_v46, %v6511_v29  ;;  %v6520_v3 = vadd.f32 %v4864_v53, %v2725_v44  ;;  %v2724_v51 = vadd.f32 %v2613_v50, %v2418_v41  ;;  %v2119_v46 = vadd.f32 %v6889_v43, %v6888_v34  ;;  %v6890_v53 = vld [vmem:[#allocation20_spill] sm:$0xff] }
 0x1f9   : > { %v2919_v10 = vpop.f32.mrf.mxu0  ;;  %v4787_v27 = vpop.f32.mrf.mxu1  ;;  %v2424_v50 = vadd.f32 %v6890_v53, %v2117_v15  ;;  %v6897_v15 = vld [vmem:[#allocation8_spill] sm:$0xff] }
 0x1fa   : > { %3130 = vst [vmem:[%s6420_s22 + $0x68] sm:$0xff] %v6520_v3  ;;  %v6527_v31 = vadd.f32 %v2919_v10, %v2724_v51  ;;  %v3159_v19 = vadd.f32 %v3158_v1, %v6504_v37  ;;  %v2727_v23 = vadd.f32 %v4787_v27, %v2421_v8  ;;  %v2427_v10 = vadd.f32 %v6891_v9, %v2120_v59  ;;  %v6899_v59 = vld [vmem:[#allocation26_spill] sm:$0xff] }
 0x1fb   : > { %v4867_v63 = vpop.f32.mrf.mxu0  ;;  %v2623_v62 = vpop.f32.mrf.mxu1  ;;  %v2426_v56 = vadd.f32 %v6894_v22, %v2119_v46  ;;  %v6906_v22 = vld [vmem:[#allocation33_spill] sm:$0xff] }
 0x1fc   : > { %3129 = vst [vmem:[%s6420_s22 + $0x60] sm:$0xff] %v6527_v31  ;;  %v3160_v13 = vadd.f32 %v3159_v19, %v6527_v31  ;;  %v6536_v17 = vadd.f32 %v4867_v63, %v2727_v23  ;;  %v2726_v4 = vadd.f32 %v2623_v62, %v2420_v49  ;;  %v6892_v19 = vld [vmem:[#allocation6_spill] sm:$0xff]  ;;  %v6893_v23 = vld [vmem:[#allocation25_spill] sm:$0xff] }
 0x1fd   : > { %v2929_v45 = vpop.f32.mrf.mxu0  ;;  %v4790_v24 = vpop.f32.mrf.mxu1 }
 0x1fe   : > { %3132 = vst [vmem:[%s6420_s22 + $0x78] sm:$0xff] %v6536_v17  ;;  %v6543_v16 = vadd.f32 %v2929_v45, %v2726_v4  ;;  %v3161_v58 = vadd.f32 %v3160_v13, %v6520_v3  ;;  %v2729_v14 = vadd.f32 %v4790_v24, %v2423_v52  ;;  %v2122_v52 = vadd.f32 %v6893_v23, %v6892_v19  ;;  %v6905_v19 = vld [vmem:[#allocation34_spill] sm:$0xff] }
 0x1ff   : > { %v4870_v39 = vpop.f32.mrf.mxu0  ;;  %v2633_v36 = vpop.f32.mrf.mxu1 }
 0x200   : > { %3131 = vst [vmem:[%s6420_s22 + $0x70] sm:$0xff] %v6543_v16  ;;  %v3162_v54 = vadd.f32 %v3161_v58, %v6543_v16  ;;  %v6552_v41 = vadd.f32 %v4870_v39, %v2729_v14  ;;  %v2728_v2 = vadd.f32 %v2633_v36, %v2422_v12  ;;  %v6896_v12 = vld [vmem:[#allocation27_spill] sm:$0xff]  ;;  %v6898_v58 = vld [vmem:[#allocation29_spill] sm:$0xff]  ;;  %v2429_v39 = vadd.f32 %v6899_v59, %v2122_v52 }
 0x201   : > { %v2939_v44 = vpop.f32.mrf.mxu0  ;;  %v4793_v20 = vpop.f32.mrf.mxu1  ;;  %v2121_v45 = vadd.f32 %v6896_v12, %v6895_v21  ;;  %v2124_v14 = vadd.f32 %v6898_v58, %v6897_v15  ;;  %v6907_v21 = vld [vmem:[#allocation11_spill] sm:$0xff]  ;;  %v6908_v15 = vld [vmem:[#allocation12_spill] sm:$0xff]  ;;  %v6909_v58 = vld [vmem:[#allocation37_spill] sm:$0xff] }
 0x202   : > { %3134 = vst [vmem:[%s6420_s22 + $0x88] sm:$0xff] %v6552_v41  ;;  %v6559_v8 = vadd.f32 %v2939_v44, %v2728_v2  ;;  %v3163_v1 = vadd.f32 %v3162_v54, %v6536_v17  ;;  %v2731_v51 = vadd.f32 %v4793_v20, %v2425_v28  ;;  %v6900_v54 = vld [vmem:[#allocation9_spill] sm:$0xff]  ;;  %v6901_v2 = vld [vmem:[#allocation32_spill] sm:$0xff]  ;;  %v2125_v12 = vadd.f32 %v6389_v0, %v6907_v21  ;;  %v6910_v59 = vld [vmem:[#allocation35_spill] sm:$0xff] }
 0x203   : > { %v4873_v27 = vpop.f32.mrf.mxu0  ;;  %v2643_v49 = vpop.f32.mrf.mxu1  ;;  %v2123_v34 = vadd.f32 %v6901_v2, %v6900_v54  ;;  %v6902_v44 = vld [vmem:[#allocation28_spill] sm:$0xff]  ;;  %v6911_v54 = vld [vmem:[#allocation13_spill] sm:$0xff]  ;;  %v6912_v2 = vld [vmem:[#allocation39_spill] sm:$0xff] }
 0x204   : > { %3133 = vst [vmem:[%s6420_s22 + $0x80] sm:$0xff] %v6559_v8  ;;  %v3164_v63 = vadd.f32 %v3163_v1, %v6559_v8  ;;  %v6568_v62 = vadd.f32 %v4873_v27, %v2731_v51  ;;  %v2730_v61 = vadd.f32 %v2643_v49, %v2424_v50  ;;  %v2428_v20 = vadd.f32 %v6902_v44, %v2121_v45  ;;  %v6903_v51 = vld [vmem:[#allocation30_spill] sm:$0xff]  ;;  %v6913_v44 = vld [vmem:[#allocation36_spill] sm:$0xff] }
 0x205   : > { %v2949_v13 = vpop.f32.mrf.mxu0  ;;  %v4796_v4 = vpop.f32.mrf.mxu1  ;;  %v2431_v9 = vadd.f32 %v6903_v51, %v2124_v14  ;;  %v6904_v49 = vld [vmem:[#allocation10_spill] sm:$0xff]  ;;  %v2128_v14 = vadd.f32 %v6909_v58, %v6908_v15 }
 0x206   : > { %3136 = vst [vmem:[%s6420_s22 + $0x98] sm:$0xff] %v6568_v62  ;;  %v6575_v24 = vadd.f32 %v2949_v13, %v2730_v61  ;;  %v3165_v38 = vadd.f32 %v3164_v63, %v6552_v41  ;;  %v2733_v55 = vadd.f32 %v4796_v4, %v2427_v10  ;;  %v2126_v23 = vadd.f32 %v6905_v19, %v6904_v49  ;;  %v6915_v19 = vld [vmem:[#allocation14_spill] sm:$0xff] }
 0x207   : > { %v4876_v6 = vpop.f32.mrf.mxu0  ;;  %v2653_v32 = vpop.f32.mrf.mxu1 }
 0x208   : > { %3135 = vst [vmem:[%s6420_s22 + $0x90] sm:$0xff] %v6575_v24  ;;  %v3166_v36 = vadd.f32 %v3165_v38, %v6575_v24  ;;  %v6584_v35 = vadd.f32 %v4876_v6, %v2733_v55  ;;  %v2732_v28 = vadd.f32 %v2653_v32, %v2426_v56  ;;  %v2430_v56 = vadd.f32 %v6906_v22, %v2123_v34 }
 0x209   : > { %v2959_v43 = vpop.f32.mrf.mxu0  ;;  %v4799_v46 = vpop.f32.mrf.mxu1  ;;  %v2127_v34 = vadd.f32 %v6912_v2, %v6911_v54 }
 0x20a   : > { %3138 = vst [vmem:[%s6420_s22 + $0xa8] sm:$0xff] %v6584_v35  ;;  %v6591_v53 = vadd.f32 %v2959_v43, %v2732_v28  ;;  %v3167_v50 = vadd.f32 %v3166_v36, %v6568_v62  ;;  %v2735_v1 = vadd.f32 %v4799_v46, %v2429_v39  ;;  %v2433_v39 = vadd.f32 %v6910_v59, %v2126_v23 }
 0x20b   : > { %v4879_v10 = vpop.f32.mrf.mxu0  ;;  %v2663_v27 = vpop.f32.mrf.mxu1  ;;  %v2130_v23 = vadd.f32 %v6402_v33, %v6915_v19 }
 0x20c   : > { %3137 = vst [vmem:[%s6420_s22 + $0xa0] sm:$0xff] %v6591_v53  ;;  %v3168_v52 = vadd.f32 %v3167_v50, %v6591_v53  ;;  %v6600_v63 = vadd.f32 %v4879_v10, %v2735_v1  ;;  %v2734_v61 = vadd.f32 %v2663_v27, %v2428_v20  ;;  %v2432_v20 = vadd.f32 %v6913_v44, %v2125_v12  ;;  %v6917_v12 = vld [vmem:[#allocation15_spill] sm:$0xff] }
 0x20d   : > { %v2969_v13 = vpop.f32.mrf.mxu0  ;;  %v4802_v4 = vpop.f32.mrf.mxu1 }
 0x20e   : > { %3140 = vst [vmem:[%s6420_s22 + $0xb8] sm:$0xff] %v6600_v63  ;;  %v6607_v45 = vadd.f32 %v2969_v13, %v2734_v61  ;;  %v3169_v38 = vadd.f32 %v3168_v52, %v6584_v35  ;;  %v2737_v55 = vadd.f32 %v4802_v4, %v2431_v9  ;;  %v6914_v9 = vld [vmem:[#allocation38_spill] sm:$0xff] }
 0x20f   : > { %v4882_v6 = vpop.f32.mrf.mxu0  ;;  %v2673_v32 = vpop.f32.mrf.mxu1  ;;  %v2435_v10 = vadd.f32 %v6914_v9, %v2128_v14 }
 0x210   : > { %3139 = vst [vmem:[%s6420_s22 + $0xb0] sm:$0xff] %v6607_v45  ;;  %v3170_v0 = vadd.f32 %v3169_v38, %v6607_v45  ;;  %v6616_v36 = vadd.f32 %v4882_v6, %v2737_v55  ;;  %v2736_v28 = vadd.f32 %v2673_v32, %v2430_v56  ;;  %v6916_v56 = vld [vmem:[#allocation40_spill] sm:$0xff]  ;;  %v2129_v38 = vadd.f32 %v6407_v7, %v6917_v12 }
 0x211   : > { %v2979_v43 = vpop.f32.mrf.mxu0  ;;  %v4805_v46 = vpop.f32.mrf.mxu1  ;;  %v2434_v13 = vadd.f32 %v6916_v56, %v2127_v34  ;;  %v2437_v6 = vadd.f32 %v6405_v25, %v2130_v23 }
 0x212   : > { %3142 = vst [vmem:[%s6420_s22 + $0xc8] sm:$0xff] %v6616_v36  ;;  %v6623_v50 = vadd.f32 %v2979_v43, %v2736_v28  ;;  %v3171_v1 = vadd.f32 %v3170_v0, %v6600_v63  ;;  %v2739_v51 = vadd.f32 %v4805_v46, %v2433_v39  ;;  %v2436_v28 = vadd.f32 %v6412_v42, %v2129_v38 }
 0x213   : > { %v4885_v27 = vpop.f32.mrf.mxu0  ;;  %v2683_v49 = vpop.f32.mrf.mxu1 }
 0x214   : > { %3141 = vst [vmem:[%s6420_s22 + $0xc0] sm:$0xff] %v6623_v50  ;;  %v3172_v52 = vadd.f32 %v3171_v1, %v6623_v50  ;;  %v6632_v61 = vadd.f32 %v4885_v27, %v2739_v51  ;;  %v2738_v22 = vadd.f32 %v2683_v49, %v2432_v20 }
 0x215   : > { %v2989_v4 = vpop.f32.mrf.mxu0  ;;  %v4808_v21 = vpop.f32.mrf.mxu1 }
 0x216   : > { %3144 = vst [vmem:[%s6420_s22 + $0xd8] sm:$0xff] %v6632_v61  ;;  %v6639_v55 = vadd.f32 %v2989_v4, %v2738_v22  ;;  %v3173_v33 = vadd.f32 %v3172_v52, %v6616_v36  ;;  %v2741_v15 = vadd.f32 %v4808_v21, %v2435_v10 }
 0x217   : > { %v4888_v58 = vpop.f32.mrf.mxu0  ;;  %v2693_v14 = vpop.f32.mrf.mxu1 }
 0x218   : > { %3143 = vst [vmem:[%s6420_s22 + $0xd0] sm:$0xff] %v6639_v55  ;;  %v3174_v32 = vadd.f32 %v3173_v33, %v6639_v55  ;;  %v6646_v59 = vadd.f32 %v4888_v58, %v2741_v15  ;;  %v2740_v7 = vadd.f32 %v2693_v14, %v2434_v13 }
 0x219   : > { %v2999_v39 = vpop.f32.mrf.mxu0  ;;  %v4811_v0 = vpop.f32.mrf.mxu1 }
 0x21a   : > { %3146 = vst [vmem:[%s6420_s22 + $0xe8] sm:$0xff] %v6646_v59  ;;  %v6651_v54 = vadd.f32 %v2999_v39, %v2740_v7  ;;  %v3175_v2 = vadd.f32 %v3174_v32, %v6632_v61  ;;  %v2743_v25 = vadd.f32 %v4811_v0, %v2437_v6 }
 0x21b   : > { %v4891_v34 = vpop.f32.mrf.mxu0  ;;  %v2703_v43 = vpop.f32.mrf.mxu1 }
 0x21c   : > { %3145 = vst [vmem:[%s6420_s22 + $0xe0] sm:$0xff] %v6651_v54  ;;  %v3176_v46 = vadd.f32 %v3175_v2, %v6651_v54  ;;  %v6657_v44 = vadd.f32 %v4891_v34, %v2743_v25  ;;  %v2742_v20 = vadd.f32 %v2703_v43, %v2436_v28 }
 0x21d   : > { %v3009_v1 = vpop.f32.mrf.mxu0 }
 0x21e   : > { %3148 = vst [vmem:[%s6420_s22 + $0xf8] sm:$0xff] %v6657_v44  ;;  %v6661_v42 = vadd.f32 %v3009_v1, %v2742_v20  ;;  %v3177_v51 = vadd.f32 %v3176_v46, %v6646_v59 }
 0x220   : > { %3147 = vst [vmem:[%s6420_s22 + $0xf0] sm:$0xff] %v6661_v42  ;;  %v3178_v9 = vadd.f32 %v3177_v51, %v6661_v42 }
 0x222   : > { %v3179_v10 = vadd.f32 %v3178_v9, %v6657_v44 }
 0x224   : > { %v3180_v27 = vrot.slane %v3179_v10, 4 }
 0x226   : > { %v3181_v49 = vadd.f32 %v3180_v27, %v3179_v10 }
 0x228   : > { %v3182_v19 = vrot.slane %v3181_v49, 2 }
 0x22a   : > { %v3183_v23 = vadd.f32 %v3182_v19, %v3181_v49 }
 0x22c   : > { %v3184_v52 = vrot.slane %v3183_v23, 1 }
 0x22e   : > { %v3185_v22 = vadd.f32 %v3184_v52, %v3183_v23 }
 0x230   : > { %v6668_v56 = vmul.f32 0.00390625, %v3185_v22 }
 0x232   : > { %v3187_v13 = vsub.f32 %v6432_v18, %v6668_v56  ;;  %v3188_v4 = vsub.f32 %v6425_v26, %v6668_v56  ;;  %v3189_v21 = vsub.f32 %v6448_v48, %v6668_v56  ;;  %v3190_v33 = vsub.f32 %v6439_v60, %v6668_v56 }
 0x233   : > { %v3191_v15 = vsub.f32 %v6463_v5, %v6668_v56  ;;  %v3192_v6 = vsub.f32 %v6456_v11, %v6668_v56  ;;  %v3193_v26 = vsub.f32 %v6479_v57, %v6668_v56  ;;  %v3194_v39 = vsub.f32 %v6472_v47, %v6668_v56 }
 0x234   : > { %v3219_v12 = vmul.f32 %v3187_v13, %v3187_v13  ;;  %v3220_v38 = vmul.f32 %v3188_v4, %v3188_v4  ;;  %v3221_v58 = vmul.f32 %v3189_v21, %v3189_v21  ;;  %v3222_v18 = vmul.f32 %v3190_v33, %v3190_v33 }
 0x235   : > { %v3223_v7 = vmul.f32 %v3191_v15, %v3191_v15  ;;  %v3224_v0 = vmul.f32 %v3192_v6, %v3192_v6  ;;  %v3195_v5 = vsub.f32 %v6495_v30, %v6668_v56  ;;  %v3225_v28 = vmul.f32 %v3193_v26, %v3193_v26 }
 0x236   : > { %v3251_v14 = vadd.f32 %v3220_v38, %v3219_v12  ;;  %v3196_v11 = vsub.f32 %v6488_v40, %v6668_v56  ;;  %v3226_v25 = vmul.f32 %v3194_v39, %v3194_v39  ;;  %v3197_v57 = vsub.f32 %v6511_v29, %v6668_v56 }
 0x237   : > { %v3227_v43 = vmul.f32 %v3195_v5, %v3195_v5  ;;  %v3198_v47 = vsub.f32 %v6504_v37, %v6668_v56  ;;  %v3199_v30 = vsub.f32 %v6527_v31, %v6668_v56  ;;  %v3200_v40 = vsub.f32 %v6520_v3, %v6668_v56 }
 0x238   : > { %v3252_v32 = vadd.f32 %v3251_v14, %v3221_v58  ;;  %v3228_v20 = vmul.f32 %v3196_v11, %v3196_v11  ;;  %v3229_v51 = vmul.f32 %v3197_v57, %v3197_v57  ;;  %v3201_v29 = vsub.f32 %v6543_v16, %v6668_v56 }
 0x239   : > { %v3230_v10 = vmul.f32 %v3198_v47, %v3198_v47  ;;  %v3231_v49 = vmul.f32 %v3199_v30, %v3199_v30  ;;  %v3202_v37 = vsub.f32 %v6536_v17, %v6668_v56  ;;  %v3232_v23 = vmul.f32 %v3200_v40, %v3200_v40 }
 0x23a   : > { %v3253_v48 = vadd.f32 %v3252_v32, %v3222_v18  ;;  %v3203_v31 = vsub.f32 %v6559_v8, %v6668_v56  ;;  %v3233_v22 = vmul.f32 %v3201_v29, %v3201_v29  ;;  %v3204_v3 = vsub.f32 %v6552_v41, %v6668_v56 }
 0x23b   : > { %v3234_v4 = vmul.f32 %v3202_v37, %v3202_v37  ;;  %v3205_v16 = vsub.f32 %v6575_v24, %v6668_v56  ;;  %v3206_v17 = vsub.f32 %v6568_v62, %v6668_v56  ;;  %v3207_v8 = vsub.f32 %v6591_v53, %v6668_v56 }
 0x23c   : > { %v3254_v60 = vadd.f32 %v3253_v48, %v3223_v7  ;;  %v3235_v12 = vmul.f32 %v3203_v31, %v3203_v31  ;;  %v3236_v33 = vmul.f32 %v3204_v3, %v3204_v3  ;;  %v3208_v41 = vsub.f32 %v6584_v35, %v6668_v56 }
 0x23d   : > { %v3237_v58 = vmul.f32 %v3205_v16, %v3205_v16  ;;  %v3238_v6 = vmul.f32 %v3206_v17, %v3206_v17  ;;  %v3209_v24 = vsub.f32 %v6607_v45, %v6668_v56  ;;  %v3239_v32 = vmul.f32 %v3207_v8, %v3207_v8 }
 0x23e   : > { %v3255_v2 = vadd.f32 %v3254_v60, %v3224_v0  ;;  %v3210_v62 = vsub.f32 %v6600_v63, %v6668_v56  ;;  %v3240_v7 = vmul.f32 %v3208_v41, %v3208_v41  ;;  %v3211_v53 = vsub.f32 %v6623_v50, %v6668_v56 }
 0x23f   : > { %v3241_v39 = vmul.f32 %v3209_v24, %v3209_v24  ;;  %v3212_v35 = vsub.f32 %v6616_v36, %v6668_v56  ;;  %v3213_v45 = vsub.f32 %v6639_v55, %v6668_v56  ;;  %v3214_v63 = vsub.f32 %v6632_v61, %v6668_v56 }
 0x240   : > { %v3256_v34 = vadd.f32 %v3255_v2, %v3225_v28  ;;  %v3242_v60 = vmul.f32 %v3210_v62, %v3210_v62  ;;  %v3243_v28 = vmul.f32 %v3211_v53, %v3211_v53  ;;  %v3215_v50 = vsub.f32 %v6651_v54, %v6668_v56 }
 0x241   : > { %v3244_v11 = vmul.f32 %v3212_v35, %v3212_v35  ;;  %v3216_v36 = vsub.f32 %v6646_v59, %v6668_v56  ;;  %v3217_v55 = vsub.f32 %v6661_v42, %v6668_v56  ;;  %v3218_v61 = vsub.f32 %v6657_v44, %v6668_v56 }
 0x242   : > { %v3257_v46 = vadd.f32 %v3256_v34, %v3226_v25  ;;  %v3245_v34 = vmul.f32 %v3213_v45, %v3213_v45  ;;  %v3247_v47 = vmul.f32 %v3215_v50, %v3215_v50 }
 0x244   : > { %v3258_v1 = vadd.f32 %v3257_v46, %v3227_v43  ;;  %v3246_v43 = vmul.f32 %v3214_v63, %v3214_v63 }
 0x246   : > { %v3259_v9 = vadd.f32 %v3258_v1, %v3228_v20  ;;  %v3248_v1 = vmul.f32 %v3216_v36, %v3216_v36 }
 0x248   : > { %v3260_v27 = vadd.f32 %v3259_v9, %v3229_v51  ;;  %v3249_v51 = vmul.f32 %v3217_v55, %v3217_v55  ;;  %v3250_v9 = vmul.f32 %v3218_v61, %v3218_v61 }
 0x24a   : > { %v3261_v19 = vadd.f32 %v3260_v27, %v3230_v10 }
 0x24c   : > { %v3262_v52 = vadd.f32 %v3261_v19, %v3231_v49 }
 0x24e   : > { %v3263_v13 = vadd.f32 %v3262_v52, %v3232_v23 }
 0x250   : > { %v3264_v21 = vadd.f32 %v3263_v13, %v3233_v22 }
 0x252   : > { %v3265_v38 = vadd.f32 %v3264_v21, %v3234_v4 }
 0x254   : > { %v3266_v15 = vadd.f32 %v3265_v38, %v3235_v12 }
 0x256   : > { %v3267_v14 = vadd.f32 %v3266_v15, %v3236_v33 }
 0x258   : > { %v3268_v18 = vadd.f32 %v3267_v14, %v3237_v58 }
 0x25a   : > { %v3269_v26 = vadd.f32 %v3268_v18, %v3238_v6 }
 0x25c   : > { %v3270_v48 = vadd.f32 %v3269_v26, %v3239_v32 }
 0x25e   : > { %v3271_v0 = vadd.f32 %v3270_v48, %v3240_v7 }
 0x260   : > { %v3272_v5 = vadd.f32 %v3271_v0, %v3241_v39 }
 0x262   : > { %v3273_v2 = vadd.f32 %v3272_v5, %v3242_v60 }
 0x264   : > { %v3274_v25 = vadd.f32 %v3273_v2, %v3243_v28 }
 0x266   : > { %v3275_v57 = vadd.f32 %v3274_v25, %v3244_v11 }
 0x268   : > { %v3276_v46 = vadd.f32 %v3275_v57, %v3245_v34 }
 0x26a   : > { %v3277_v20 = vadd.f32 %v3276_v46, %v3246_v43 }
 0x26c   : > { %v3278_v30 = vadd.f32 %v3277_v20, %v3247_v47 }
 0x26e   : > { %v3279_v54 = vadd.f32 %v3278_v30, %v3248_v1 }
 0x270   : > { %v3280_v40 = vadd.f32 %v3279_v54, %v3249_v51 }
 0x272   : > { %v3281_v10 = vadd.f32 %v3280_v40, %v3250_v9 }
 0x274   : > { %v3282_v27 = vrot.slane %v3281_v10, 4 }
 0x276   : > { %v3283_v59 = vadd.f32 %v3282_v27, %v3281_v10 }
 0x278   : > { %v3284_v29 = vrot.slane %v3283_v59, 2 }
 0x27a   : > { %v3285_v49 = vadd.f32 %v3284_v29, %v3283_v59 }
 0x27c   : > { %v3286_v19 = vrot.slane %v3285_v49, 1 }
 0x27e   : > { %v3287_v42 = vadd.f32 %v3286_v19, %v3285_v49 }
 0x280   : > { %v3289_v44 = vsel %vm3288_vm0, %v6668_v56, %v3287_v42 }
 0x281   : > { %3290 = vst [vmem:[%s226_s27] sm:$0x3] %v3289_v44 }
 0x282 PF: > { %s14_s14 = sadd.s32 1, %s4971_s14   ;;  %s6918_s12 = smov %s4967_s13 }
 0x283   : > { %p11_p5 = scmp.ge.s32.totalorder %s14_s14, 4   ;;  %s6919_s13 = smov %s6921_s15 }
 0x285   :  { %13 = sbr.rel (!%p11_p5) target bundleno = 2 (0x2), region = 91 }

</bundles_post_ra>
